<compile_context>
chip_gen: v6e
topology: v6e:2x2x1
jax: 0.10.0
libtpu: 0.0.40
codegen_flags: <defaults>
</compile_context>

<pallas_src>
import functools

import jax
import jax.numpy as jnp
from jax.experimental import pallas as pl
from jax.experimental.pallas import tpu as pltpu


def _round_up(x, m):
    return (x + m - 1) // m * m


# ----------------------------- Pallas kernels ------------------------------ #

def _conv_gemm_kernel(p_ref, w_ref, b_ref, o_ref):
    """Conv-as-GEMM for one image (no pooling epilogue).

    p_ref: (1, Rp, Kp) bf16 im2col patches (Rp = padded Ho*Wo, Kp = padded k*k*Cin)
    w_ref: (Kp, Cp)    bf16 flattened conv weights (Cp = Cout padded to 128)
    b_ref: (1, Cp)     f32 bias (zero in padded channels)
    o_ref: (1, Rp, Cp) f32 pre-activation output, flat spatial layout (row = h*Wo + w)
    """
    o_ref[0] = (jnp.dot(p_ref[0], w_ref[...], preferred_element_type=jnp.float32)
                + b_ref[...])


def _conv_gemm_pool_kernel(p_ref, w_ref, b_ref, conv_ref, pool_ref, *, wo, rm):
    """Conv-as-GEMM with fused bias + ReLU + MaxPool2d(3, stride=2) epilogue.

    conv_ref: (1, Rp, Cp) pre-activation conv output, row r = h * wo + w
    pool_ref: (1, rm, Cp) "dense" (stride-1) 3x3 window max on the flat layout;
              the wrapper selects the stride-2 rows/cols.  Rows whose w > wo-3 see
              wrap-around taps but are never selected by the wrapper.
    """
    acc = (jnp.dot(p_ref[0], w_ref[...], preferred_element_type=jnp.float32)
           + b_ref[...])
    conv_ref[0] = acc

    # 3x3 window max on the flat (Ho*Wo, C) layout: tap (i, j) is a unit-stride
    # slice shifted by i*wo + j rows (read back from the just-written VMEM block).
    # relu(max(.)) == max(relu(.)) since ReLU is monotone -> apply ReLU once.
    m = conv_ref[0, pl.ds(0, rm), :]
    for i in range(3):
        for j in range(3):
            d = i * wo + j
            if d == 0:
                continue
            m = jnp.maximum(m, conv_ref[0, pl.ds(d, rm), :])
    pool_ref[0] = jnp.maximum(m, 0.0)


# ----------------------------- wrapper (XLA glue) --------------------------- #

def conv2d_pallas(x_nhwc, w, b, *, k, stride, pad, with_pool):
    """Conv2d (+ optional fused ReLU + MaxPool2d(3, 2)).

    x_nhwc: (N, H, W, Cx) f32.  Cx may exceed the weight's Cin; the extra channels
            are zero (padding from a previous layer) and get zero weight rows.
    w: (k, k, Cin, Cout) f32;  b: (Cout,) f32.
    Returns (conv (N, Ho, Wo, Cout) f32 pre-activation,
             pooled (N, Hq, Wq, Cp) f32 or None, where Cp = Cout rounded to 128 and
             channels >= Cout are exactly zero).
    """
    N, H, W, Cx = x_nhwc.shape
    Cin, Cout = w.shape[2], w.shape[3]
    if Cx > Cin:                          # zero weight rows for zero-padded channels
        w = jnp.pad(w, ((0, 0), (0, 0), (0, Cx - Cin), (0, 0)))
    Cp = _round_up(Cout, 128)

    # -- im2col (XLA glue), tap order (kh, kw, cin) to match w.reshape(K, Cout) --
    xp = jnp.pad(x_nhwc, ((0, 0), (pad, pad), (pad, pad), (0, 0)))
    Ho = (H + 2 * pad - k) // stride + 1
    Wo = (W + 2 * pad - k) // stride + 1
    cols = [xp[:, i:i + stride * Ho:stride, j:j + stride * Wo:stride, :]
            for i in range(k) for j in range(k)]
    R, K = Ho * Wo, k * k * Cx
    patches = jnp.concatenate(cols, axis=-1).reshape(N, R, K)

    # -- pad to MXU/vreg-friendly shapes; MXU inputs in bf16, accumulate in f32 --
    Kp = _round_up(K, 128)
    Rp = _round_up(R + 2, 16) if with_pool else _round_up(R, 16)
    patches = jnp.pad(patches, ((0, 0), (0, Rp - R), (0, Kp - K))).astype(jnp.bfloat16)
    w2 = jnp.pad(w.reshape(K, Cout), ((0, Kp - K), (0, Cp - Cout))).astype(jnp.bfloat16)
    b2 = jnp.pad(b.reshape(1, Cout), ((0, 0), (0, Cp - Cout))).astype(jnp.float32)

    in_specs = [
        pl.BlockSpec((1, Rp, Kp), lambda n: (n, 0, 0)),
        pl.BlockSpec((Kp, Cp), lambda n: (0, 0)),
        pl.BlockSpec((1, Cp), lambda n: (0, 0)),
    ]
    cparams = pltpu.CompilerParams(dimension_semantics=("parallel",))

    if with_pool:
        Hq = (Ho - 3) // 2 + 1
        Wq = (Wo - 3) // 2 + 1
        Rm = (Ho - 2) * Wo                       # dense (stride-1) pooled rows, flat
        kern = functools.partial(_conv_gemm_pool_kernel, wo=Wo, rm=Rm)
        conv_flat, pool_flat = pl.pallas_call(
            kern,
            out_shape=(jax.ShapeDtypeStruct((N, Rp, Cp), jnp.float32),
                       jax.ShapeDtypeStruct((N, Rm, Cp), jnp.float32)),
            grid=(N,),
            in_specs=in_specs,
            out_specs=(pl.BlockSpec((1, Rp, Cp), lambda n: (n, 0, 0)),
                       pl.BlockSpec((1, Rm, Cp), lambda n: (n, 0, 0))),
            compiler_params=cparams,
        )(patches, w2, b2)
        conv = conv_flat[:, :R, :Cout].reshape(N, Ho, Wo, Cout)
        # stride-2 subsample of the dense window max == MaxPool2d(3, stride=2)
        pooled = pool_flat.reshape(N, Ho - 2, Wo, Cp)[:, ::2, ::2, :][:, :Hq, :Wq, :]
        return conv, pooled

    conv_flat = pl.pallas_call(
        _conv_gemm_kernel,
        out_shape=jax.ShapeDtypeStruct((N, Rp, Cp), jnp.float32),
        grid=(N,),
        in_specs=in_specs,
        out_specs=pl.BlockSpec((1, Rp, Cp), lambda n: (n, 0, 0)),
        compiler_params=cparams,
    )(patches, w2, b2)
    conv = conv_flat[:, :R, :Cout].reshape(N, Ho, Wo, Cout)
    return conv, None


# ----------------------------- model ---------------------------------------- #

def init_params(key):
    """Synthetic params with the module's shapes (kaiming fan_out/relu, zero bias)."""
    k1, k2, k3 = jax.random.split(key, 3)

    def kaiming(k, shape):
        kh, kw, _, cout = shape
        std = (2.0 / (kh * kw * cout)) ** 0.5
        return jax.random.normal(k, shape, jnp.float32) * std

    return {
        "w1": kaiming(k1, (11, 11, 3, 48)),  "b1": jnp.zeros((48,), jnp.float32),
        "w2": kaiming(k2, (5, 5, 48, 128)),  "b2": jnp.zeros((128,), jnp.float32),
        "w3": kaiming(k3, (3, 3, 128, 192)), "b3": jnp.zeros((192,), jnp.float32),
    }


@jax.jit
def alexnet_forward(x_nchw, params):
    """Reproduces AlexNet.forward: returns [features '0', '3', '6' outputs] in NCHW."""
    x = jnp.transpose(x_nchw, (0, 2, 3, 1)).astype(jnp.float32)     # NCHW -> NHWC

    # features.0 Conv2d(3,48,11,s=4,p=2) [captured] + fused .1 ReLU / .2 MaxPool(3,2)
    c1, p1 = conv2d_pallas(x, params["w1"], params["b1"],
                           k=11, stride=4, pad=2, with_pool=True)
    # features.3 Conv2d(48,128,5,p=2)    [captured] + fused .4 ReLU / .5 MaxPool(3,2)
    c2, p2 = conv2d_pallas(p1, params["w2"], params["b2"],
                           k=5, stride=1, pad=2, with_pool=True)
    # features.6 Conv2d(128,192,3,p=1)   [captured]
    c3, _ = conv2d_pallas(p2, params["w3"], params["b3"],
                          k=3, stride=1, pad=1, with_pool=False)

    # Remaining features layers and the classifier do not affect the returned list.
    to_nchw = lambda t: jnp.transpose(t, (0, 3, 1, 2))
    return [to_nchw(c1), to_nchw(c2), to_nchw(c3)]


@jax.jit
def _reference_forward(x_nchw, params):
    """Pure-XLA f32 reference (lax.conv + reduce_window) for a sanity check."""
    x = jnp.transpose(x_nchw, (0, 2, 3, 1)).astype(jnp.float32)

    def conv(t, w, b, stride, pad):
        y = jax.lax.conv_general_dilated(
            t, w, window_strides=(stride, stride),
            padding=((pad, pad), (pad, pad)),
            dimension_numbers=("NHWC", "HWIO", "NHWC"))
        return y + b

    def relu_pool(y):
        return jax.lax.reduce_window(jnp.maximum(y, 0.0), -jnp.inf, jax.lax.max,
                                     (1, 3, 3, 1), (1, 2, 2, 1), "VALID")

    c1 = conv(x, params["w1"], params["b1"], 4, 2)
    c2 = conv(relu_pool(c1), params["w2"], params["b2"], 1, 2)
    c3 = conv(relu_pool(c2), params["w3"], params["b3"], 1, 1)
    to_nchw = lambda t: jnp.transpose(t, (0, 3, 1, 2))
    return [to_nchw(c1), to_nchw(c2), to_nchw(c3)]


if __name__ == "__main__":
    key = jax.random.PRNGKey(0)
    pkey, xkey = jax.random.split(key)
    params = init_params(pkey)

    # Small input consistent with the module: N=2, C=3, 67x67 spatial
    # -> features.0: (2,48,16,16), .3: (2,128,7,7), .6: (2,192,3,3)
    x = jax.random.normal(xkey, (2, 3, 67, 67), jnp.float32)

    outs = jax.block_until_ready(alexnet_forward(x, params))
    refs = jax.block_until_ready(_reference_forward(x, params))

    expected = [(2, 48, 16, 16), (2, 128, 7, 7), (2, 192, 3, 3)]
    for o, r, s in zip(outs, refs, expected):
        assert o.shape == s, (o.shape, s)
        err = float(jnp.max(jnp.abs(o - r)))
        assert err < 1e-1, err           # relaxed: bf16 MXU inputs, f32 accumulate
    print("KERNEL_OK")
</pallas_src>

<mosaic_0001>
module attributes {stable_mosaic.version = 11 : i64} {
  func.func @_conv_gemm_pool_kernel(%arg0: i32, %arg1: memref<1x272x384xbf16, #tpu.memory_space<vmem>>, %arg2: memref<384x128xbf16, #tpu.memory_space<vmem>>, %arg3: memref<1x128xf32, #tpu.memory_space<vmem>>, %arg4: memref<1x272x128xf32, #tpu.memory_space<vmem>>, %arg5: memref<1x224x128xf32, #tpu.memory_space<vmem>>) attributes {dimension_semantics = [#tpu.dimension_semantics<parallel>], iteration_bounds = array<i64: 2>, scalar_prefetch = 0 : i64, scratch_operands = 0 : i64, tpu.core_type = #tpu.core_type<tc>, window_params = [{transform_indices = @transform_0, window_bounds = array<i64: 1, 272, 384>}, {pipeline_mode = #tpu.pipeline_mode<synchronous>, transform_indices = @transform_1, window_bounds = array<i64: 384, 128>}, {pipeline_mode = #tpu.pipeline_mode<synchronous>, transform_indices = @transform_2, window_bounds = array<i64: 1, 128>}, {transform_indices = @transform_3, window_bounds = array<i64: 1, 272, 128>}, {transform_indices = @transform_4, window_bounds = array<i64: 1, 224, 128>}]} {
    %c0 = arith.constant 0 : index
    %c0_0 = arith.constant 0 : index
    %c0_1 = arith.constant 0 : index
    %0 = vector.load %arg1[%c0, %c0_0, %c0_1] : memref<1x272x384xbf16, #tpu.memory_space<vmem>>, vector<1x272x384xbf16>
    %1 = vector.shape_cast %0 : vector<1x272x384xbf16> to vector<272x384xbf16>
    %c0_2 = arith.constant 0 : index
    %c0_3 = arith.constant 0 : index
    %2 = vector.load %arg2[%c0_2, %c0_3] : memref<384x128xbf16, #tpu.memory_space<vmem>>, vector<384x128xbf16>
    %cst = arith.constant dense<0.000000e+00> : vector<272x128xf32>
    %3 = tpu.matmul %1, %2, %cst {dimension_numbers = #tpu.dot_dimension_numbers<[1], [0], [0], [1], [0, 0, 1, 1], [], []>} : vector<272x384xbf16>, vector<384x128xbf16>, vector<272x128xf32> -> vector<272x128xf32>
    %c0_4 = arith.constant 0 : index
    %c0_5 = arith.constant 0 : index
    %4 = vector.load %arg3[%c0_4, %c0_5] : memref<1x128xf32, #tpu.memory_space<vmem>>, vector<1x128xf32>
    %5 = vector.broadcast %4 : vector<1x128xf32> to vector<272x128xf32>
    %6 = arith.addf %3, %5 : vector<272x128xf32>
    %c0_6 = arith.constant 0 : index
    %c0_7 = arith.constant 0 : index
    %c0_8 = arith.constant 0 : index
    %7 = vector.load %arg4[%c0_6, %c0_7, %c0_8] : memref<1x272x128xf32, #tpu.memory_space<vmem>>, vector<1x272x128xf32>
    %8 = vector.shape_cast %7 : vector<1x272x128xf32> to vector<272x128xf32>
    %9 = vector.shape_cast %6 : vector<272x128xf32> to vector<1x272x128xf32>
    tpu.vector_store %arg4[%c0_6, %c0_7, %c0_8], %9 {strides = array<i32>} : memref<1x272x128xf32, #tpu.memory_space<vmem>>, vector<1x272x128xf32>,
    %c0_9 = arith.constant 0 : index
    %c0_10 = arith.constant 0 : index
    %c0_11 = arith.constant 0 : index
    %10 = vector.load %arg4[%c0_9, %c0_10, %c0_11] : memref<1x272x128xf32, #tpu.memory_space<vmem>>, vector<1x224x128xf32>
    %11 = vector.shape_cast %10 : vector<1x224x128xf32> to vector<224x128xf32>
    %c0_12 = arith.constant 0 : index
    %c1 = arith.constant 1 : index
    %c0_13 = arith.constant 0 : index
    %12 = vector.load %arg4[%c0_12, %c1, %c0_13] : memref<1x272x128xf32, #tpu.memory_space<vmem>>, vector<1x224x128xf32>
    %13 = vector.shape_cast %12 : vector<1x224x128xf32> to vector<224x128xf32>
    %14 = arith.maximumf %11, %13 : vector<224x128xf32>
    %c0_14 = arith.constant 0 : index
    %c2 = arith.constant 2 : index
    %c0_15 = arith.constant 0 : index
    %15 = vector.load %arg4[%c0_14, %c2, %c0_15] : memref<1x272x128xf32, #tpu.memory_space<vmem>>, vector<1x224x128xf32>
    %16 = vector.shape_cast %15 : vector<1x224x128xf32> to vector<224x128xf32>
    %17 = arith.maximumf %14, %16 : vector<224x128xf32>
    %c0_16 = arith.constant 0 : index
    %c16 = arith.constant 16 : index
    %c0_17 = arith.constant 0 : index
    %18 = vector.load %arg4[%c0_16, %c16, %c0_17] : memref<1x272x128xf32, #tpu.memory_space<vmem>>, vector<1x224x128xf32>
    %19 = vector.shape_cast %18 : vector<1x224x128xf32> to vector<224x128xf32>
    %20 = arith.maximumf %17, %19 : vector<224x128xf32>
    %c0_18 = arith.constant 0 : index
    %c17 = arith.constant 17 : index
    %c0_19 = arith.constant 0 : index
    %21 = vector.load %arg4[%c0_18, %c17, %c0_19] : memref<1x272x128xf32, #tpu.memory_space<vmem>>, vector<1x224x128xf32>
    %22 = vector.shape_cast %21 : vector<1x224x128xf32> to vector<224x128xf32>
    %23 = arith.maximumf %20, %22 : vector<224x128xf32>
    %c0_20 = arith.constant 0 : index
    %c18 = arith.constant 18 : index
    %c0_21 = arith.constant 0 : index
    %24 = vector.load %arg4[%c0_20, %c18, %c0_21] : memref<1x272x128xf32, #tpu.memory_space<vmem>>, vector<1x224x128xf32>
    %25 = vector.shape_cast %24 : vector<1x224x128xf32> to vector<224x128xf32>
    %26 = arith.maximumf %23, %25 : vector<224x128xf32>
    %c0_22 = arith.constant 0 : index
    %c32 = arith.constant 32 : index
    %c0_23 = arith.constant 0 : index
    %27 = vector.load %arg4[%c0_22, %c32, %c0_23] : memref<1x272x128xf32, #tpu.memory_space<vmem>>, vector<1x224x128xf32>
    %28 = vector.shape_cast %27 : vector<1x224x128xf32> to vector<224x128xf32>
    %29 = arith.maximumf %26, %28 : vector<224x128xf32>
    %c0_24 = arith.constant 0 : index
    %c33 = arith.constant 33 : index
    %c0_25 = arith.constant 0 : index
    %30 = vector.load %arg4[%c0_24, %c33, %c0_25] : memref<1x272x128xf32, #tpu.memory_space<vmem>>, vector<1x224x128xf32>
    %31 = vector.shape_cast %30 : vector<1x224x128xf32> to vector<224x128xf32>
    %32 = arith.maximumf %29, %31 : vector<224x128xf32>
    %c0_26 = arith.constant 0 : index
    %c34 = arith.constant 34 : index
    %c0_27 = arith.constant 0 : index
    %33 = vector.load %arg4[%c0_26, %c34, %c0_27] : memref<1x272x128xf32, #tpu.memory_space<vmem>>, vector<1x224x128xf32>
    %34 = vector.shape_cast %33 : vector<1x224x128xf32> to vector<224x128xf32>
    %35 = arith.maximumf %32, %34 : vector<224x128xf32>
    %cst_28 = arith.constant 0.000000e+00 : f32
    %36 = vector.broadcast %cst_28 : f32 to vector<224x128xf32>
    %37 = arith.maximumf %35, %36 : vector<224x128xf32>
    %c0_29 = arith.constant 0 : index
    %c0_30 = arith.constant 0 : index
    %c0_31 = arith.constant 0 : index
    %38 = vector.load %arg5[%c0_29, %c0_30, %c0_31] : memref<1x224x128xf32, #tpu.memory_space<vmem>>, vector<1x224x128xf32>
    %39 = vector.shape_cast %38 : vector<1x224x128xf32> to vector<224x128xf32>
    %40 = vector.shape_cast %37 : vector<224x128xf32> to vector<1x224x128xf32>
    tpu.vector_store %arg5[%c0_29, %c0_30, %c0_31], %40 {strides = array<i32>} : memref<1x224x128xf32, #tpu.memory_space<vmem>>, vector<1x224x128xf32>,
    return
  }
  func.func @transform_0(%arg0: i32) -> (i32, i32, i32) {
    %c0_i32 = arith.constant 0 : i32
    %c0_i32_0 = arith.constant 0 : i32
    %c0_i32_1 = arith.constant 0 : i32
    return %arg0, %c0_i32, %c0_i32_0 : i32, i32, i32
  }
  func.func @transform_1(%arg0: i32) -> (i32, i32) {
    %c0_i32 = arith.constant 0 : i32
    %c0_i32_0 = arith.constant 0 : i32
    %c0_i32_1 = arith.constant 0 : i32
    return %c0_i32, %c0_i32_0 : i32, i32
  }
  func.func @transform_2(%arg0: i32) -> (i32, i32) {
    %c0_i32 = arith.constant 0 : i32
    %c0_i32_0 = arith.constant 0 : i32
    %c0_i32_1 = arith.constant 0 : i32
    return %c0_i32, %c0_i32_0 : i32, i32
  }
  func.func @transform_3(%arg0: i32) -> (i32, i32, i32) {
    %c0_i32 = arith.constant 0 : i32
    %c0_i32_0 = arith.constant 0 : i32
    %c0_i32_1 = arith.constant 0 : i32
    return %arg0, %c0_i32, %c0_i32_0 : i32, i32, i32
  }
  func.func @transform_4(%arg0: i32) -> (i32, i32, i32) {
    %c0_i32 = arith.constant 0 : i32
    %c0_i32_0 = arith.constant 0 : i32
    %c0_i32_1 = arith.constant 0 : i32
    return %arg0, %c0_i32, %c0_i32_0 : i32, i32, i32
  }
}

module attributes {stable_mosaic.version = 11 : i64} {
  func.func @_conv_gemm_pool_kernel(%arg0: i32, %arg1: memref<1x64x3200xbf16, #tpu.memory_space<vmem>>, %arg2: memref<3200x128xbf16, #tpu.memory_space<vmem>>, %arg3: memref<1x128xf32, #tpu.memory_space<vmem>>, %arg4: memref<1x64x128xf32, #tpu.memory_space<vmem>>, %arg5: memref<1x35x128xf32, #tpu.memory_space<vmem>>) attributes {dimension_semantics = [#tpu.dimension_semantics<parallel>], iteration_bounds = array<i64: 2>, scalar_prefetch = 0 : i64, scratch_operands = 0 : i64, tpu.core_type = #tpu.core_type<tc>, window_params = [{transform_indices = @transform_0, window_bounds = array<i64: 1, 64, 3200>}, {pipeline_mode = #tpu.pipeline_mode<synchronous>, transform_indices = @transform_1, window_bounds = array<i64: 3200, 128>}, {pipeline_mode = #tpu.pipeline_mode<synchronous>, transform_indices = @transform_2, window_bounds = array<i64: 1, 128>}, {transform_indices = @transform_3, window_bounds = array<i64: 1, 64, 128>}, {transform_indices = @transform_4, window_bounds = array<i64: 1, 35, 128>}]} {
    %c0 = arith.constant 0 : index
    %c0_0 = arith.constant 0 : index
    %c0_1 = arith.constant 0 : index
    %0 = vector.load %arg1[%c0, %c0_0, %c0_1] : memref<1x64x3200xbf16, #tpu.memory_space<vmem>>, vector<1x64x3200xbf16>
    %1 = vector.shape_cast %0 : vector<1x64x3200xbf16> to vector<64x3200xbf16>
    %c0_2 = arith.constant 0 : index
    %c0_3 = arith.constant 0 : index
    %2 = vector.load %arg2[%c0_2, %c0_3] : memref<3200x128xbf16, #tpu.memory_space<vmem>>, vector<3200x128xbf16>
    %cst = arith.constant dense<0.000000e+00> : vector<64x128xf32>
    %3 = tpu.matmul %1, %2, %cst {dimension_numbers = #tpu.dot_dimension_numbers<[1], [0], [0], [1], [0, 0, 1, 1], [], []>} : vector<64x3200xbf16>, vector<3200x128xbf16>, vector<64x128xf32> -> vector<64x128xf32>
    %c0_4 = arith.constant 0 : index
    %c0_5 = arith.constant 0 : index
    %4 = vector.load %arg3[%c0_4, %c0_5] : memref<1x128xf32, #tpu.memory_space<vmem>>, vector<1x128xf32>
    %5 = vector.broadcast %4 : vector<1x128xf32> to vector<64x128xf32>
    %6 = arith.addf %3, %5 : vector<64x128xf32>
    %c0_6 = arith.constant 0 : index
    %c0_7 = arith.constant 0 : index
    %c0_8 = arith.constant 0 : index
    %7 = vector.load %arg4[%c0_6, %c0_7, %c0_8] : memref<1x64x128xf32, #tpu.memory_space<vmem>>, vector<1x64x128xf32>
    %8 = vector.shape_cast %7 : vector<1x64x128xf32> to vector<64x128xf32>
    %9 = vector.shape_cast %6 : vector<64x128xf32> to vector<1x64x128xf32>
    tpu.vector_store %arg4[%c0_6, %c0_7, %c0_8], %9 {strides = array<i32>} : memref<1x64x128xf32, #tpu.memory_space<vmem>>, vector<1x64x128xf32>,
    %c0_9 = arith.constant 0 : index
    %c0_10 = arith.constant 0 : index
    %c0_11 = arith.constant 0 : index
    %10 = vector.load %arg4[%c0_9, %c0_10, %c0_11] : memref<1x64x128xf32, #tpu.memory_space<vmem>>, vector<1x35x128xf32>
    %11 = vector.shape_cast %10 : vector<1x35x128xf32> to vector<35x128xf32>
    %c0_12 = arith.constant 0 : index
    %c1 = arith.constant 1 : index
    %c0_13 = arith.constant 0 : index
    %12 = vector.load %arg4[%c0_12, %c1, %c0_13] : memref<1x64x128xf32, #tpu.memory_space<vmem>>, vector<1x35x128xf32>
    %13 = vector.shape_cast %12 : vector<1x35x128xf32> to vector<35x128xf32>
    %14 = arith.maximumf %11, %13 : vector<35x128xf32>
    %c0_14 = arith.constant 0 : index
    %c2 = arith.constant 2 : index
    %c0_15 = arith.constant 0 : index
    %15 = vector.load %arg4[%c0_14, %c2, %c0_15] : memref<1x64x128xf32, #tpu.memory_space<vmem>>, vector<1x35x128xf32>
    %16 = vector.shape_cast %15 : vector<1x35x128xf32> to vector<35x128xf32>
    %17 = arith.maximumf %14, %16 : vector<35x128xf32>
    %c0_16 = arith.constant 0 : index
    %c7 = arith.constant 7 : index
    %c0_17 = arith.constant 0 : index
    %18 = vector.load %arg4[%c0_16, %c7, %c0_17] : memref<1x64x128xf32, #tpu.memory_space<vmem>>, vector<1x35x128xf32>
    %19 = vector.shape_cast %18 : vector<1x35x128xf32> to vector<35x128xf32>
    %20 = arith.maximumf %17, %19 : vector<35x128xf32>
    %c0_18 = arith.constant 0 : index
    %c8 = arith.constant 8 : index
    %c0_19 = arith.constant 0 : index
    %21 = vector.load %arg4[%c0_18, %c8, %c0_19] : memref<1x64x128xf32, #tpu.memory_space<vmem>>, vector<1x35x128xf32>
    %22 = vector.shape_cast %21 : vector<1x35x128xf32> to vector<35x128xf32>
    %23 = arith.maximumf %20, %22 : vector<35x128xf32>
    %c0_20 = arith.constant 0 : index
    %c9 = arith.constant 9 : index
    %c0_21 = arith.constant 0 : index
    %24 = vector.load %arg4[%c0_20, %c9, %c0_21] : memref<1x64x128xf32, #tpu.memory_space<vmem>>, vector<1x35x128xf32>
    %25 = vector.shape_cast %24 : vector<1x35x128xf32> to vector<35x128xf32>
    %26 = arith.maximumf %23, %25 : vector<35x128xf32>
    %c0_22 = arith.constant 0 : index
    %c14 = arith.constant 14 : index
    %c0_23 = arith.constant 0 : index
    %27 = vector.load %arg4[%c0_22, %c14, %c0_23] : memref<1x64x128xf32, #tpu.memory_space<vmem>>, vector<1x35x128xf32>
    %28 = vector.shape_cast %27 : vector<1x35x128xf32> to vector<35x128xf32>
    %29 = arith.maximumf %26, %28 : vector<35x128xf32>
    %c0_24 = arith.constant 0 : index
    %c15 = arith.constant 15 : index
    %c0_25 = arith.constant 0 : index
    %30 = vector.load %arg4[%c0_24, %c15, %c0_25] : memref<1x64x128xf32, #tpu.memory_space<vmem>>, vector<1x35x128xf32>
    %31 = vector.shape_cast %30 : vector<1x35x128xf32> to vector<35x128xf32>
    %32 = arith.maximumf %29, %31 : vector<35x128xf32>
    %c0_26 = arith.constant 0 : index
    %c16 = arith.constant 16 : index
    %c0_27 = arith.constant 0 : index
    %33 = vector.load %arg4[%c0_26, %c16, %c0_27] : memref<1x64x128xf32, #tpu.memory_space<vmem>>, vector<1x35x128xf32>
    %34 = vector.shape_cast %33 : vector<1x35x128xf32> to vector<35x128xf32>
    %35 = arith.maximumf %32, %34 : vector<35x128xf32>
    %cst_28 = arith.constant 0.000000e+00 : f32
    %36 = vector.broadcast %cst_28 : f32 to vector<35x128xf32>
    %37 = arith.maximumf %35, %36 : vector<35x128xf32>
    %c0_29 = arith.constant 0 : index
    %c0_30 = arith.constant 0 : index
    %c0_31 = arith.constant 0 : index
    %38 = vector.load %arg5[%c0_29, %c0_30, %c0_31] : memref<1x35x128xf32, #tpu.memory_space<vmem>>, vector<1x35x128xf32>
    %39 = vector.shape_cast %38 : vector<1x35x128xf32> to vector<35x128xf32>
    %40 = vector.shape_cast %37 : vector<35x128xf32> to vector<1x35x128xf32>
    tpu.vector_store %arg5[%c0_29, %c0_30, %c0_31], %40 {strides = array<i32>} : memref<1x35x128xf32, #tpu.memory_space<vmem>>, vector<1x35x128xf32>,
    return
  }
  func.func @transform_0(%arg0: i32) -> (i32, i32, i32) {
    %c0_i32 = arith.constant 0 : i32
    %c0_i32_0 = arith.constant 0 : i32
    %c0_i32_1 = arith.constant 0 : i32
    return %arg0, %c0_i32, %c0_i32_0 : i32, i32, i32
  }
  func.func @transform_1(%arg0: i32) -> (i32, i32) {
    %c0_i32 = arith.constant 0 : i32
    %c0_i32_0 = arith.constant 0 : i32
    %c0_i32_1 = arith.constant 0 : i32
    return %c0_i32, %c0_i32_0 : i32, i32
  }
  func.func @transform_2(%arg0: i32) -> (i32, i32) {
    %c0_i32 = arith.constant 0 : i32
    %c0_i32_0 = arith.constant 0 : i32
    %c0_i32_1 = arith.constant 0 : i32
    return %c0_i32, %c0_i32_0 : i32, i32
  }
  func.func @transform_3(%arg0: i32) -> (i32, i32, i32) {
    %c0_i32 = arith.constant 0 : i32
    %c0_i32_0 = arith.constant 0 : i32
    %c0_i32_1 = arith.constant 0 : i32
    return %arg0, %c0_i32, %c0_i32_0 : i32, i32, i32
  }
  func.func @transform_4(%arg0: i32) -> (i32, i32, i32) {
    %c0_i32 = arith.constant 0 : i32
    %c0_i32_0 = arith.constant 0 : i32
    %c0_i32_1 = arith.constant 0 : i32
    return %arg0, %c0_i32, %c0_i32_0 : i32, i32, i32
  }
}

module attributes {stable_mosaic.version = 11 : i64} {
  func.func @_conv_gemm_kernel(%arg0: i32, %arg1: memref<1x16x1152xbf16, #tpu.memory_space<vmem>>, %arg2: memref<1152x256xbf16, #tpu.memory_space<vmem>>, %arg3: memref<1x256xf32, #tpu.memory_space<vmem>>, %arg4: memref<1x16x256xf32, #tpu.memory_space<vmem>>) attributes {dimension_semantics = [#tpu.dimension_semantics<parallel>], iteration_bounds = array<i64: 2>, scalar_prefetch = 0 : i64, scratch_operands = 0 : i64, tpu.core_type = #tpu.core_type<tc>, window_params = [{transform_indices = @transform_0, window_bounds = array<i64: 1, 16, 1152>}, {pipeline_mode = #tpu.pipeline_mode<synchronous>, transform_indices = @transform_1, window_bounds = array<i64: 1152, 256>}, {pipeline_mode = #tpu.pipeline_mode<synchronous>, transform_indices = @transform_2, window_bounds = array<i64: 1, 256>}, {transform_indices = @transform_3, window_bounds = array<i64: 1, 16, 256>}]} {
    %c0 = arith.constant 0 : index
    %c0_0 = arith.constant 0 : index
    %c0_1 = arith.constant 0 : index
    %0 = vector.load %arg1[%c0, %c0_0, %c0_1] : memref<1x16x1152xbf16, #tpu.memory_space<vmem>>, vector<1x16x1152xbf16>
    %1 = vector.shape_cast %0 : vector<1x16x1152xbf16> to vector<16x1152xbf16>
    %c0_2 = arith.constant 0 : index
    %c0_3 = arith.constant 0 : index
    %2 = vector.load %arg2[%c0_2, %c0_3] : memref<1152x256xbf16, #tpu.memory_space<vmem>>, vector<1152x256xbf16>
    %cst = arith.constant dense<0.000000e+00> : vector<16x256xf32>
    %3 = tpu.matmul %1, %2, %cst {dimension_numbers = #tpu.dot_dimension_numbers<[1], [0], [0], [1], [0, 0, 1, 1], [], []>} : vector<16x1152xbf16>, vector<1152x256xbf16>, vector<16x256xf32> -> vector<16x256xf32>
    %c0_4 = arith.constant 0 : index
    %c0_5 = arith.constant 0 : index
    %4 = vector.load %arg3[%c0_4, %c0_5] : memref<1x256xf32, #tpu.memory_space<vmem>>, vector<1x256xf32>
    %5 = vector.broadcast %4 : vector<1x256xf32> to vector<16x256xf32>
    %6 = arith.addf %3, %5 : vector<16x256xf32>
    %c0_6 = arith.constant 0 : index
    %c0_7 = arith.constant 0 : index
    %c0_8 = arith.constant 0 : index
    %7 = vector.load %arg4[%c0_6, %c0_7, %c0_8] : memref<1x16x256xf32, #tpu.memory_space<vmem>>, vector<1x16x256xf32>
    %8 = vector.shape_cast %7 : vector<1x16x256xf32> to vector<16x256xf32>
    %9 = vector.shape_cast %6 : vector<16x256xf32> to vector<1x16x256xf32>
    tpu.vector_store %arg4[%c0_6, %c0_7, %c0_8], %9 {strides = array<i32>} : memref<1x16x256xf32, #tpu.memory_space<vmem>>, vector<1x16x256xf32>,
    return
  }
  func.func @transform_0(%arg0: i32) -> (i32, i32, i32) {
    %c0_i32 = arith.constant 0 : i32
    %c0_i32_0 = arith.constant 0 : i32
    %c0_i32_1 = arith.constant 0 : i32
    return %arg0, %c0_i32, %c0_i32_0 : i32, i32, i32
  }
  func.func @transform_1(%arg0: i32) -> (i32, i32) {
    %c0_i32 = arith.constant 0 : i32
    %c0_i32_0 = arith.constant 0 : i32
    %c0_i32_1 = arith.constant 0 : i32
    return %c0_i32, %c0_i32_0 : i32, i32
  }
  func.func @transform_2(%arg0: i32) -> (i32, i32) {
    %c0_i32 = arith.constant 0 : i32
    %c0_i32_0 = arith.constant 0 : i32
    %c0_i32_1 = arith.constant 0 : i32
    return %c0_i32, %c0_i32_0 : i32, i32
  }
  func.func @transform_3(%arg0: i32) -> (i32, i32, i32) {
    %c0_i32 = arith.constant 0 : i32
    %c0_i32_0 = arith.constant 0 : i32
    %c0_i32_1 = arith.constant 0 : i32
    return %arg0, %c0_i32, %c0_i32_0 : i32, i32, i32
  }
}

</mosaic_0001>

<bundles_post_ra>
// kernel: alexnet_forward.3
= control target key start
LH: loop header
LB: loop body
LE: loop exit
PB: predicated region body
PF: predicated region fallthrough
CT: control target
= control target key end

     0   :  { %s1925_s15 = smov 0   ;;  %s2530_s0 = inlined_call_operand.vmem [shape: bf16[2,272,384], index: 0, kind: input, shape index: {}]   ;;  %s2531_s1 = inlined_call_operand.vmem [shape: bf16[384,128], index: 1, kind: input, shape index: {}]   ;;  %s2532_s2 = inlined_call_operand.vmem [shape: f32[1,128], index: 2, kind: input, shape index: {}]   ;;  %s2533_s3 = inlined_call_operand.vmem [shape: f32[2,272,128], index: 3, kind: output, shape index: {0}]   ;;  %s2534_s4 = inlined_call_operand.vmem [shape: f32[2,224,128], index: 4, kind: output, shape index: {1}]  }
   0x1 LB: > { %s1587_s16 = sadd.s32 4294967295, %s1895_s15   ;;  %p1591_p0 = scmp.ge.s32.totalorder %s1895_s15, 1  ;;  %s1895_s15 = sphi %s1925_s15, %s15_s15  }
   0x2   : > { %p165_p1 = scmp.lt.s32.totalorder %s1895_s15, 3 }
   0x4   : > { %p166_p2 = pnand %p1591_p0, %p165_p1 }
   0x5   : > { %p196_p3 = scmp.lt.s32.totalorder (!%p166_p2), %s1587_s16, 1 }
   0x6   : > { %169 = sbr.rel (%p166_p2) target bundleno = 416 (0x1a0), region = 32 }
   0xb   : > { %v1796_v0 = vld [vmem:[%s2531_s1 + $0x38] sm:$0xff]   ;;  %v1897_v1 = vmov 0   ;;  %v1797_v2 = vld [vmem:[%s2531_s1 + $0x30] sm:$0xff]   ;;  %v1898_v3 = vmov 0.0   ;;  %vm1899_vm0 = vmmov 0   ;;  %v1798_v4 = vld [vmem:[%s2531_s1 + $0x28] sm:$0xff]  }
   0xc   : > { %751 = vmatprep.subr.bf16.mxu0 %v1897_v1  ;;  %1698 = vmatprep.subr.bf16.mxu1 %v1898_v3  ;;  %v1804_v5 = vld [vmem:[%s2531_s1 + $0xb8] sm:$0xff]   ;;  %v1799_v6 = vld [vmem:[%s2531_s1 + $0x20] sm:$0xff]   ;;  %v1806_v7 = vld [vmem:[%s2531_s1 + $0xb0] sm:$0xff]   ;;  %s2536_s16 = smov (!%p196_p3, %s1587_s16), 1 }
   0xd   : > { %752 = vmatpush1.bf16.msra.mxu0 %v1796_v0  ;;  %1714 = vmatprep.mubr.msk.bf16.mxu1 %vm1899_vm0, %v1898_v3  ;;  %v1800_v8 = vld [vmem:[%s2531_s1 + $0x18] sm:$0xff]   ;;  %v1808_v9 = vld [vmem:[%s2531_s1 + $0xa8] sm:$0xff]   ;;  %v1801_v10 = vld [vmem:[%s2531_s1 + $0x10] sm:$0xff]   ;;  %s1782_s11 = smul.u32 408, %s2536_s16 }
   0xe   : > { %753 = vmatprep.subr.bf16.mxu0 %v1897_v1  ;;  %1699 = vmatpush3.bf16.msra.mxu1 %v1804_v5  ;;  %v1810_v11 = vld [vmem:[%s2531_s1 + $0xa0] sm:$0xff]   ;;  %v1802_v12 = vld [vmem:[%s2531_s1 + $0x8] sm:$0xff]   ;;  %v1812_v13 = vld [vmem:[%s2531_s1 + $0x98] sm:$0xff]   ;;  %s1783_s22 = smul.u32 272, %s2536_s16 }
   0xf   : > { %1700 = vmatprep.subr.bf16.mxu1 %v1898_v3  ;;  %s1991_s20 = scalar_lea.vmem %s2530_s0, %s1782_s11  ;;  %v1803_v14 = vld [vmem:[%s2531_s1] sm:$0xff]   ;;  %v1814_v15 = vld [vmem:[%s2531_s1 + $0x90] sm:$0xff]   ;;  %v1805_v17 = vld [vmem:[%s2531_s1 + $0x78] sm:$0xff]   ;;  %s1784_s27 = smul.u32 224, %s2536_s16 }
  0x10   : > { %v1823_v16 = vld [vmem:[%s1991_s20 + $0x4] ss:$12 sps:$4 sm:$0xff]   ;;  %v1816_v18 = vld [vmem:[%s2531_s1 + $0x88] sm:$0xff]   ;;  %v1813_v25 = vld [vmem:[%s2531_s1 + $0x58] sm:$0xff]   ;;  %s2136_s26 = scalar_lea.vmem %s2533_s3, %s1783_s22 }
  0x11   : > { %754 = vmatpush1.bf16.msra.mxu0 %v1797_v2  ;;  %783 = vmatprep.mubr.bf16.mxu0 %v1823_v16  ;;  %v1807_v19 = vld [vmem:[%s2531_s1 + $0x70] sm:$0xff]   ;;  %v1818_v20 = vld [vmem:[%s2531_s1 + $0x80] sm:$0xff]   ;;  %v1809_v22 = vld [vmem:[%s2531_s1 + $0x68] sm:$0xff]   ;;  %s2202_s29 = scalar_lea.vmem %s2534_s4, %s1784_s27 }
  0x12   : > { %755 = vmatprep.subr.bf16.mxu0 %v1897_v1  ;;  %1701 = vmatpush3.bf16.msra.mxu1 %v1806_v7  ;;  %v1819_v21 = vld [vmem:[%s1991_s20 + $0x8] ss:$12 sps:$4 sm:$0xff]   ;;  %v1811_v23 = vld [vmem:[%s2531_s1 + $0x60] sm:$0xff]   ;;  %v1832_v31 = vld [vmem:[%s1991_s20 + $0x50] ss:$12 sps:$4 sm:$0xff]  }
  0x13   : > { %1702 = vmatprep.subr.bf16.mxu1 %v1898_v3  ;;  %v1824_v24 = vld [vmem:[%s1991_s20 + $0x20] ss:$12 sps:$4 sm:$0xff]   ;;  %v1815_v26 = vld [vmem:[%s2531_s1 + $0x50] sm:$0xff]   ;;  %v1828_v27 = vld [vmem:[%s1991_s20 + $0x38] ss:$12 sps:$4 sm:$0xff]  }
  0x14   : > { %v1817_v28 = vld [vmem:[%s2531_s1 + $0x48] sm:$0xff]   ;;  %v1820_v29 = vld [vmem:[%s2531_s1 + $0x40] sm:$0xff]   ;;  %v1831_v36 = vld [vmem:[%s1991_s20 + $0x30] ss:$12 sps:$4 sm:$0xff]  }
  0x15   : > { %756 = vmatpush1.bf16.msra.mxu0 %v1798_v4  ;;  %v1821_v30 = vld [vmem:[%s1991_s20] ss:$12 sps:$4 sm:$0xff]   ;;  %v1825_v32 = vld [vmem:[%s1991_s20 + $0x1c] ss:$12 sps:$4 sm:$0xff]   ;;  %v1827_v33 = vld [vmem:[%s1991_s20 + $0x18] ss:$12 sps:$4 sm:$0xff]  }
  0x16   : > { %757 = vmatprep.subr.bf16.mxu0 %v1897_v1  ;;  %1703 = vmatpush3.bf16.msra.mxu1 %v1808_v9  ;;  %v1836_v34 = vld [vmem:[%s1991_s20 + $0x68] ss:$12 sps:$4 sm:$0xff]   ;;  %v1840_v37 = vld [vmem:[%s1991_s20 + $0x80] ss:$12 sps:$4 sm:$0xff]   ;;  %v1844_v40 = vld [vmem:[%s1991_s20 + $0x98] ss:$12 sps:$4 sm:$0xff]  }
  0x17   : > { %1704 = vmatprep.subr.bf16.mxu1 %v1898_v3  ;;  %v1829_v35 = vld [vmem:[%s1991_s20 + $0x34] ss:$12 sps:$4 sm:$0xff]   ;;  %v1833_v38 = vld [vmem:[%s1991_s20 + $0x4c] ss:$12 sps:$4 sm:$0xff]   ;;  %v1837_v41 = vld [vmem:[%s1991_s20 + $0x64] ss:$12 sps:$4 sm:$0xff]  }
  0x18   : > { %v1835_v39 = vld [vmem:[%s1991_s20 + $0x48] ss:$12 sps:$4 sm:$0xff]   ;;  %v1839_v42 = vld [vmem:[%s1991_s20 + $0x60] ss:$12 sps:$4 sm:$0xff]   ;;  %v1848_v43 = vld [vmem:[%s1991_s20 + $0xb0] ss:$12 sps:$4 sm:$0xff]  }
  0x19   : > { %758 = vmatpush1.bf16.msra.mxu0 %v1799_v6  ;;  %v1841_v44 = vld [vmem:[%s1991_s20 + $0x7c] ss:$12 sps:$4 sm:$0xff]   ;;  %v1843_v45 = vld [vmem:[%s1991_s20 + $0x78] ss:$12 sps:$4 sm:$0xff]   ;;  %v1845_v47 = vld [vmem:[%s1991_s20 + $0x94] ss:$12 sps:$4 sm:$0xff]  }
  0x1a   : > { %759 = vmatprep.subr.bf16.mxu0 %v1897_v1  ;;  %1705 = vmatpush3.bf16.msra.mxu1 %v1810_v11  ;;  %v1852_v46 = vld [vmem:[%s1991_s20 + $0xc8] ss:$12 sps:$4 sm:$0xff]   ;;  %v1847_v48 = vld [vmem:[%s1991_s20 + $0x90] ss:$12 sps:$4 sm:$0xff]   ;;  %v1856_v49 = vld [vmem:[%s1991_s20 + $0xe0] ss:$12 sps:$4 sm:$0xff]  }
  0x1b   : > { %1706 = vmatprep.subr.bf16.mxu1 %v1898_v3  ;;  %v1849_v50 = vld [vmem:[%s1991_s20 + $0xac] ss:$12 sps:$4 sm:$0xff]   ;;  %v1851_v51 = vld [vmem:[%s1991_s20 + $0xa8] ss:$12 sps:$4 sm:$0xff]   ;;  %v1853_v53 = vld [vmem:[%s1991_s20 + $0xc4] ss:$12 sps:$4 sm:$0xff]  }
  0x1c   : > { %v1860_v52 = vld [vmem:[%s1991_s20 + $0xf8] ss:$12 sps:$4 sm:$0xff]   ;;  %v1855_v54 = vld [vmem:[%s1991_s20 + $0xc0] ss:$12 sps:$4 sm:$0xff]   ;;  %v1864_v55 = vld [vmem:[%s1991_s20 + $0x110] ss:$12 sps:$4 sm:$0xff]  }
  0x1d   : > { %760 = vmatpush1.bf16.msra.mxu0 %v1800_v8  ;;  %v1857_v56 = vld [vmem:[%s1991_s20 + $0xdc] ss:$12 sps:$4 sm:$0xff]   ;;  %v1859_v57 = vld [vmem:[%s1991_s20 + $0xd8] ss:$12 sps:$4 sm:$0xff]   ;;  %v1861_v59 = vld [vmem:[%s1991_s20 + $0xf4] ss:$12 sps:$4 sm:$0xff]  }
  0x1e   : > { %761 = vmatprep.subr.bf16.mxu0 %v1897_v1  ;;  %1707 = vmatpush3.bf16.msra.mxu1 %v1812_v13  ;;  %v1868_v58 = vld [vmem:[%s1991_s20 + $0x128] ss:$12 sps:$4 sm:$0xff]   ;;  %v1863_v60 = vld [vmem:[%s1991_s20 + $0xf0] ss:$12 sps:$4 sm:$0xff]   ;;  %v1872_v61 = vld [vmem:[%s1991_s20 + $0x140] ss:$12 sps:$4 sm:$0xff]  }
  0x1f   : > { %1708 = vmatprep.subr.bf16.mxu1 %v1898_v3  ;;  %v1865_v62 = vld [vmem:[%s1991_s20 + $0x10c] ss:$12 sps:$4 sm:$0xff]   ;;  %v1867_v63 = vld [vmem:[%s1991_s20 + $0x108] ss:$12 sps:$4 sm:$0xff]   ;;  %v1880_v4 = vld [vmem:[%s1991_s20 + $0x170] ss:$12 sps:$4 sm:$0xff]  }
  0x20   : > { %v1876_v0 = vld [vmem:[%s1991_s20 + $0x158] ss:$12 sps:$4 sm:$0xff]   ;;  %v1871_v2 = vld [vmem:[%s1991_s20 + $0x120] ss:$12 sps:$4 sm:$0xff]   ;;  %v1873_v5 = vld [vmem:[%s1991_s20 + $0x13c] ss:$12 sps:$4 sm:$0xff]  }
  0x21   : > { %762 = vmatpush1.bf16.msra.mxu0 %v1801_v10  ;;  %v1875_v6 = vld [vmem:[%s1991_s20 + $0x138] ss:$12 sps:$4 sm:$0xff]   ;;  %v1884_v7 = vld [vmem:[%s1991_s20 + $0x188] ss:$12 sps:$4 sm:$0xff]   ;;  %v1879_v9 = vld [vmem:[%s1991_s20 + $0x150] ss:$12 sps:$4 sm:$0xff]  }
  0x22   : > { %763 = vmatprep.subr.bf16.mxu0 %v1897_v1  ;;  %1709 = vmatpush3.bf16.msra.mxu1 %v1814_v15  ;;  %v1877_v8 = vld [vmem:[%s1991_s20 + $0x154] ss:$12 sps:$4 sm:$0xff]   ;;  %v1881_v10 = vld [vmem:[%s1991_s20 + $0x16c] ss:$12 sps:$4 sm:$0xff]  }
  0x23   : > { %1710 = vmatprep.subr.bf16.mxu1 %v1898_v3  ;;  %v1883_v11 = vld [vmem:[%s1991_s20 + $0x168] ss:$12 sps:$4 sm:$0xff]   ;;  %v1887_v13 = vld [vmem:[%s1991_s20 + $0x180] ss:$12 sps:$4 sm:$0xff]  }
  0x25   : > { %764 = vmatpush1.bf16.msra.mxu0 %v1802_v12  ;;  %v1885_v12 = vld [vmem:[%s1991_s20 + $0x184] ss:$12 sps:$4 sm:$0xff]  }
  0x26   : > { %765 = vmatprep.subr.bf16.mxu0 %v1897_v1  ;;  %1711 = vmatpush3.bf16.msra.mxu1 %v1816_v18 }
  0x27   : > { %1712 = vmatprep.subr.bf16.mxu1 %v1898_v3 }
  0x29   : > { %766 = vmatpush1.bf16.msra.mxu0 %v1803_v14 }
  0x2a   : > { %767 = vmatprep.subr.bf16.mxu0 %v1897_v1  ;;  %1713 = vmatpush3.bf16.msra.mxu1 %v1818_v20 }
  0x2d   : > { %768 = vmatpush2.bf16.msra.mxu0 %v1805_v17  ;;  %1715 = vmatmul.mubr.bf16.vlgmr.msra.gmra.mxu1 %v1819_v21 }
  0x2e   : > { %769 = vmatprep.subr.bf16.mxu0 %v1897_v1  ;;  %1718 = vmatprep.mubr.msk.bf16.mxu1 %vm1899_vm0, %v1898_v3 }
  0x31   : > { %770 = vmatpush2.bf16.msra.mxu0 %v1807_v19 }
  0x32   : > { %771 = vmatprep.subr.bf16.mxu0 %v1897_v1 }
  0x35   : > { %772 = vmatpush2.bf16.msra.mxu0 %v1809_v22  ;;  %1719 = vmatmul.mubr.bf16.gmra.mxu1 %v1824_v24  ;;  %v2130_v24 = vld [vmem:[%s2532_s2] ss:$0 sm:$0xff] }
  0x36   : > { %773 = vmatprep.subr.bf16.mxu0 %v1897_v1  ;;  %1722 = vmatprep.mubr.msk.bf16.mxu1 %vm1899_vm0, %v1898_v3 }
  0x39   : > { %774 = vmatpush2.bf16.msra.mxu0 %v1811_v23 }
  0x3a   : > { %775 = vmatprep.subr.bf16.mxu0 %v1897_v1 }
  0x3d   : > { %776 = vmatpush2.bf16.msra.mxu0 %v1813_v25  ;;  %1723 = vmatmul.mubr.bf16.gmra.mxu1 %v1828_v27 }
  0x3e   : > { %777 = vmatprep.subr.bf16.mxu0 %v1897_v1  ;;  %1726 = vmatprep.mubr.msk.bf16.mxu1 %vm1899_vm0, %v1898_v3 }
  0x41   : > { %778 = vmatpush2.bf16.msra.mxu0 %v1815_v26 }
  0x42   : > { %779 = vmatprep.subr.bf16.mxu0 %v1897_v1 }
  0x45   : > { %780 = vmatpush2.bf16.msra.mxu0 %v1817_v28  ;;  %1727 = vmatmul.mubr.bf16.gmra.mxu1 %v1832_v31 }
  0x46   : > { %781 = vmatprep.subr.bf16.mxu0 %v1897_v1  ;;  %1730 = vmatprep.mubr.msk.bf16.mxu1 %vm1899_vm0, %v1898_v3  ;;  %v1869_v1 = vld [vmem:[%s1991_s20 + $0x124] ss:$12 sps:$4 sm:$0xff]  }
  0x49   : > { %782 = vmatpush2.bf16.msra.mxu0 %v1820_v29 }
  0x4c   : > { %784 = vmatmul.mubr.bf16.vlgmr.msra.gmra.mxu0 %v1821_v30 }
  0x4d   : > { %791 = vmatprep.mubr.bf16.mxu0 %v1825_v32  ;;  %1731 = vmatmul.mubr.bf16.gmra.mxu1 %v1836_v34 }
  0x4e   : > { %1734 = vmatprep.mubr.msk.bf16.mxu1 %vm1899_vm0, %v1898_v3 }
  0x54   : > { %792 = vmatmul.mubr.bf16.gmra.mxu0 %v1827_v33 }
  0x55   : > { %799 = vmatprep.mubr.bf16.mxu0 %v1829_v35  ;;  %1735 = vmatmul.mubr.bf16.gmra.mxu1 %v1840_v37 }
  0x56   : > { %1738 = vmatprep.mubr.msk.bf16.mxu1 %vm1899_vm0, %v1898_v3 }
  0x5c   : > { %800 = vmatmul.mubr.bf16.gmra.mxu0 %v1831_v36 }
  0x5d   : > { %807 = vmatprep.mubr.bf16.mxu0 %v1833_v38  ;;  %1739 = vmatmul.mubr.bf16.gmra.mxu1 %v1844_v40 }
  0x5e   : > { %1742 = vmatprep.mubr.msk.bf16.mxu1 %vm1899_vm0, %v1898_v3 }
  0x64   : > { %808 = vmatmul.mubr.bf16.gmra.mxu0 %v1835_v39 }
  0x65   : > { %815 = vmatprep.mubr.bf16.mxu0 %v1837_v41  ;;  %1743 = vmatmul.mubr.bf16.gmra.mxu1 %v1848_v43 }
  0x66   : > { %1746 = vmatprep.mubr.msk.bf16.mxu1 %vm1899_vm0, %v1898_v3 }
  0x6c   : > { %816 = vmatmul.mubr.bf16.gmra.mxu0 %v1839_v42 }
  0x6d   : > { %823 = vmatprep.mubr.bf16.mxu0 %v1841_v44  ;;  %1747 = vmatmul.mubr.bf16.gmra.mxu1 %v1852_v46 }
  0x6e   : > { %1750 = vmatprep.mubr.msk.bf16.mxu1 %vm1899_vm0, %v1898_v3 }
  0x74   : > { %824 = vmatmul.mubr.bf16.gmra.mxu0 %v1843_v45 }
  0x75   : > { %831 = vmatprep.mubr.bf16.mxu0 %v1845_v47  ;;  %1751 = vmatmul.mubr.bf16.gmra.mxu1 %v1856_v49 }
  0x76   : > { %1754 = vmatprep.mubr.msk.bf16.mxu1 %vm1899_vm0, %v1898_v3 }
  0x7c   : > { %832 = vmatmul.mubr.bf16.gmra.mxu0 %v1847_v48 }
  0x7d   : > { %839 = vmatprep.mubr.bf16.mxu0 %v1849_v50  ;;  %1755 = vmatmul.mubr.bf16.gmra.mxu1 %v1860_v52 }
  0x7e   : > { %1758 = vmatprep.mubr.msk.bf16.mxu1 %vm1899_vm0, %v1898_v3 }
  0x84   : > { %840 = vmatmul.mubr.bf16.gmra.mxu0 %v1851_v51 }
  0x85   : > { %847 = vmatprep.mubr.bf16.mxu0 %v1853_v53  ;;  %1759 = vmatmul.mubr.bf16.gmra.mxu1 %v1864_v55 }
  0x86   : > { %1762 = vmatprep.mubr.msk.bf16.mxu1 %vm1899_vm0, %v1898_v3 }
  0x8c   : > { %848 = vmatmul.mubr.bf16.gmra.mxu0 %v1855_v54 }
  0x8d   : > { %855 = vmatprep.mubr.bf16.mxu0 %v1857_v56  ;;  %1763 = vmatmul.mubr.bf16.gmra.mxu1 %v1868_v58 }
  0x8e   : > { %1766 = vmatprep.mubr.msk.bf16.mxu1 %vm1899_vm0, %v1898_v3 }
  0x94   : > { %856 = vmatmul.mubr.bf16.gmra.mxu0 %v1859_v57 }
  0x95   : > { %863 = vmatprep.mubr.bf16.mxu0 %v1861_v59  ;;  %1767 = vmatmul.mubr.bf16.gmra.mxu1 %v1872_v61 }
  0x96   : > { %1770 = vmatprep.mubr.msk.bf16.mxu1 %vm1899_vm0, %v1898_v3 }
  0x9c   : > { %864 = vmatmul.mubr.bf16.gmra.mxu0 %v1863_v60 }
  0x9d   : > { %871 = vmatprep.mubr.bf16.mxu0 %v1865_v62  ;;  %1771 = vmatmul.mubr.bf16.gmra.mxu1 %v1876_v0 }
  0x9e   : > { %1774 = vmatprep.mubr.msk.bf16.mxu1 %vm1899_vm0, %v1898_v3 }
  0xa4   : > { %872 = vmatmul.mubr.bf16.gmra.mxu0 %v1867_v63 }
  0xa5   : > { %879 = vmatprep.mubr.bf16.mxu0 %v1869_v1  ;;  %1775 = vmatmul.mubr.bf16.gmra.mxu1 %v1880_v4 }
  0xa6   : > { %1778 = vmatprep.mubr.msk.bf16.mxu1 %vm1899_vm0, %v1898_v3 }
  0xac   : > { %880 = vmatmul.mubr.bf16.gmra.mxu0 %v1871_v2 }
  0xad   : > { %887 = vmatprep.mubr.bf16.mxu0 %v1873_v5  ;;  %1779 = vmatmul.mubr.bf16.gmra.mxu1 %v1884_v7 }
  0xb4   : > { %888 = vmatmul.mubr.bf16.gmra.mxu0 %v1875_v6 }
  0xb5   : > { %895 = vmatprep.mubr.bf16.mxu0 %v1877_v8 }
  0xbc   : > { %896 = vmatmul.mubr.bf16.gmra.mxu0 %v1879_v9 }
  0xbd   : > { %903 = vmatprep.mubr.bf16.mxu0 %v1881_v10 }
  0xc4   : > { %904 = vmatmul.mubr.bf16.gmra.mxu0 %v1883_v11 }
  0xc5   : > { %911 = vmatprep.mubr.bf16.mxu0 %v1885_v12 }
  0xcc   : > { %912 = vmatmul.mubr.bf16.gmra.mxu0 %v1887_v13 }
  0xed   : > { %v954_v14 = vpop.f32.mrf.mxu1 }
  0xef   : > { %v1716_v15 = vpop.f32.mrf.mxu1 }
  0xf1   : > { %v957_v3 = vpop.f32.mrf.mxu1 }
  0xf3   : > { %v1717_v16 = vpop.f32.mrf.mxu1 }
  0xf5   : > { %v962_v17 = vpop.f32.mrf.mxu1 }
  0xf7   : > { %v1720_v18 = vpop.f32.mrf.mxu1 }
  0xf9   : > { %v965_v19 = vpop.f32.mrf.mxu1 }
  0xfb   : > { %v1721_v20 = vpop.f32.mrf.mxu1 }
  0xfd   : > { %v970_v21 = vpop.f32.mrf.mxu1 }
  0xff   : > { %v1724_v22 = vpop.f32.mrf.mxu1 }
 0x101   : > { %v973_v23 = vpop.f32.mrf.mxu1 }
 0x103   : > { %v1725_v25 = vpop.f32.mrf.mxu1 }
 0x105   : > { %v978_v27 = vpop.f32.mrf.mxu1 }
 0x107   : > { %v1728_v30 = vpop.f32.mrf.mxu1 }
 0x109   : > { %v2138_v33 = vpop.f32.mrf.mxu1 }
 0x10b   : > { %v1729_v36 = vpop.f32.mrf.mxu1 }
 0x10c   : > { %v785_v26 = vpop.f32.mrf.mxu0 }
 0x10d   : > { %v786_v28 = vadd.f32 %v2130_v24, %v785_v26  ;;  %v2142_v39 = vpop.f32.mrf.mxu1 }
 0x10e   : > { %v787_v29 = vpop.f32.mrf.mxu0 }
 0x10f   : > { %v955_v31 = vadd.f32 %v954_v14, %v786_v28  ;;  %v1732_v42 = vpop.f32.mrf.mxu1 }
 0x110   : > { %v788_v32 = vpop.f32.mrf.mxu0 }
 0x111   : > { %1089 = vst [vmem:[%s2136_s26] sm:$0xff] %v955_v31  ;;  %v789_v34 = vadd.f32 %v2130_v24, %v788_v32  ;;  %v2146_v45 = vpop.f32.mrf.mxu1 }
 0x112   : > { %v790_v35 = vpop.f32.mrf.mxu0 }
 0x113   : > { %v958_v37 = vadd.f32 %v957_v3, %v789_v34  ;;  %v1733_v48 = vpop.f32.mrf.mxu1 }
 0x114   : > { %v793_v38 = vpop.f32.mrf.mxu0 }
 0x115   : > { %1090 = vst [vmem:[%s2136_s26 + $0x8] sm:$0xff] %v958_v37  ;;  %v794_v40 = vadd.f32 %v2130_v24, %v793_v38  ;;  %v2151_v52 = vpop.f32.mrf.mxu1 }
 0x116   : > { %v795_v41 = vpop.f32.mrf.mxu0 }
 0x117   : > { %v963_v43 = vadd.f32 %v962_v17, %v794_v40  ;;  %v1736_v57 = vpop.f32.mrf.mxu1 }
 0x118   : > { %v796_v44 = vpop.f32.mrf.mxu0 }
 0x119   : > { %1091 = vst [vmem:[%s2136_s26 + $0x10] sm:$0xff] %v963_v43  ;;  %v797_v46 = vadd.f32 %v2130_v24, %v796_v44  ;;  %v2157_v62 = vpop.f32.mrf.mxu1 }
 0x11a   : > { %v798_v47 = vpop.f32.mrf.mxu0 }
 0x11b   : > { %v966_v49 = vadd.f32 %v965_v19, %v797_v46  ;;  %v1737_v4 = vpop.f32.mrf.mxu1 }
 0x11c   : > { %v1151_v50 = vld [vmem:[%s2136_s26 + $0x1] sm:$0xff]  ;;  %v801_v51 = vpop.f32.mrf.mxu0 }
 0x11d   : > { %v1179_v53 = vmax.f32 %v955_v31, %v1151_v50  ;;  %1092 = vst [vmem:[%s2136_s26 + $0x18] sm:$0xff] %v966_v49  ;;  %v802_v54 = vadd.f32 %v2130_v24, %v801_v51  ;;  %v1207_v55 = vld [vmem:[%s2136_s26 + $0x2] sm:$0xff]  ;;  %v2165_v10 = vpop.f32.mrf.mxu1 }
 0x11e   : > { %v803_v56 = vpop.f32.mrf.mxu0 }
 0x11f   : > { %v1235_v58 = vmax.f32 %v1179_v53, %v1207_v55  ;;  %v971_v59 = vadd.f32 %v970_v21, %v802_v54  ;;  %v1740_v3 = vpop.f32.mrf.mxu1 }
 0x120   : > { %v1152_v60 = vld [vmem:[%s2136_s26 + $0x9] sm:$0xff]  ;;  %v804_v61 = vpop.f32.mrf.mxu0 }
 0x121   : > { %v1180_v63 = vmax.f32 %v958_v37, %v1152_v60  ;;  %1093 = vst [vmem:[%s2136_s26 + $0x20] sm:$0xff] %v971_v59  ;;  %v805_v0 = vadd.f32 %v2130_v24, %v804_v61  ;;  %v1208_v1 = vld [vmem:[%s2136_s26 + $0xa] sm:$0xff]  ;;  %v1265_v6 = vmax.f32 %v1235_v58, %v963_v43  ;;  %v2174_v22 = vpop.f32.mrf.mxu1 }
 0x122   : > { %v806_v2 = vpop.f32.mrf.mxu0 }
 0x123   : > { %v1236_v5 = vmax.f32 %v1180_v63, %v1208_v1  ;;  %v2162_v7 = vadd.f32 %v973_v23, %v805_v0  ;;  %v1741_v30 = vpop.f32.mrf.mxu1 }
 0x124   : > { %v1153_v8 = vld [vmem:[%s2136_s26 + $0x11] sm:$0xff]  ;;  %v809_v9 = vpop.f32.mrf.mxu0 }
 0x125   : > { %v1181_v11 = vmax.f32 %v963_v43, %v1153_v8  ;;  %v1295_v12 = vmax.f32 %v1265_v6, %v1153_v8  ;;  %1094 = vst [vmem:[%s2136_s26 + $0x28] sm:$0xff] %v2162_v7  ;;  %v810_v13 = vadd.f32 %v2130_v24, %v809_v9  ;;  %v1209_v14 = vld [vmem:[%s2136_s26 + $0x12] sm:$0xff]  ;;  %v1266_v17 = vmax.f32 %v1236_v5, %v966_v49  ;;  %v2184_v38 = vpop.f32.mrf.mxu1 }
 0x126   : > { %v811_v15 = vpop.f32.mrf.mxu0 }
 0x127   : > { %v1237_v16 = vmax.f32 %v1181_v11, %v1209_v14  ;;  %v2171_v18 = vadd.f32 %v978_v27, %v810_v13  ;;  %v1325_v19 = vmax.f32 %v1295_v12, %v1209_v14  ;;  %v1744_v47 = vpop.f32.mrf.mxu1 }
 0x128   : > { %v1154_v20 = vld [vmem:[%s2136_s26 + $0x19] sm:$0xff]  ;;  %v812_v21 = vpop.f32.mrf.mxu0 }
 0x129   : > { %v1182_v23 = vmax.f32 %v966_v49, %v1154_v20  ;;  %v1296_v25 = vmax.f32 %v1266_v17, %v1154_v20  ;;  %1095 = vst [vmem:[%s2136_s26 + $0x30] sm:$0xff] %v2171_v18  ;;  %v1210_v26 = vld [vmem:[%s2136_s26 + $0x1a] sm:$0xff]  ;;  %v813_v28 = vadd.f32 %v2130_v24, %v812_v21  ;;  %v1267_v31 = vmax.f32 %v1237_v16, %v971_v59  ;;  %v2197_v56 = vpop.f32.mrf.mxu1 }
 0x12a   : > { %v814_v29 = vpop.f32.mrf.mxu0  ;;  %v1355_v34 = vmax.f32 %v1325_v19, %v971_v59 }
 0x12b   : > { %v1238_v27 = vmax.f32 %v1182_v23, %v1210_v26  ;;  %v1326_v32 = vmax.f32 %v1296_v25, %v1210_v26  ;;  %v2182_v36 = vadd.f32 %v2138_v33, %v813_v28  ;;  %v1745_v63 = vpop.f32.mrf.mxu1 }
 0x12c   : > { %v1155_v35 = vld [vmem:[%s2136_s26 + $0x21] sm:$0xff]  ;;  %v817_v37 = vpop.f32.mrf.mxu0 }
 0x12d   : > { %v1183_v40 = vmax.f32 %v971_v59, %v1155_v35  ;;  %v1297_v41 = vmax.f32 %v1267_v31, %v1155_v35  ;;  %v1211_v42 = vld [vmem:[%s2136_s26 + $0x22] sm:$0xff]  ;;  %v1385_v43 = vmax.f32 %v1355_v34, %v1155_v35  ;;  %1096 = vst [vmem:[%s2136_s26 + $0x38] sm:$0xff] %v2182_v36  ;;  %v818_v44 = vadd.f32 %v2130_v24, %v817_v37  ;;  %v2215_v8 = vpop.f32.mrf.mxu1 }
 0x12e   : > { %v819_v46 = vpop.f32.mrf.mxu0  ;;  %v1268_v33 = vmax.f32 %v1238_v27, %v2162_v7  ;;  %v1356_v50 = vmax.f32 %v1326_v32, %v2162_v7 }
 0x12f   : > { %v1239_v48 = vmax.f32 %v1183_v40, %v1211_v42  ;;  %v1327_v49 = vmax.f32 %v1297_v41, %v1211_v42  ;;  %v1415_v51 = vmax.f32 %v1385_v43, %v1211_v42  ;;  %v2195_v54 = vadd.f32 %v2142_v39, %v818_v44  ;;  %v1748_v17 = vpop.f32.mrf.mxu1 }
 0x130   : > { %v1156_v53 = vld [vmem:[%s2136_s26 + $0x29] sm:$0xff]  ;;  %v820_v55 = vpop.f32.mrf.mxu0 }
 0x131   : > { %v1184_v57 = vmax.f32 %v2162_v7, %v1156_v53  ;;  %v1298_v58 = vmax.f32 %v1268_v33, %v1156_v53  ;;  %v1443_v59 = vmax.f32 %v1415_v51, 0.0  ;;  %v1386_v60 = vmax.f32 %v1356_v50, %v1156_v53  ;;  %1097 = vst [vmem:[%s2136_s26 + $0x40] sm:$0xff] %v2195_v54  ;;  %v1212_v0 = vld [vmem:[%s2136_s26 + $0x2a] sm:$0xff]  ;;  %v2228_v25 = vpop.f32.mrf.mxu1 }
 0x132   : > { %v821_v39 = vadd.f32 %v2130_v24, %v820_v55  ;;  %v822_v61 = vpop.f32.mrf.mxu0  ;;  %v1269_v1 = vmax.f32 %v1239_v48, %v2171_v18  ;;  %v1357_v4 = vmax.f32 %v1327_v49, %v2171_v18 }
 0x133   : > { %1471 = vst [vmem:[%s2202_s29] sm:$0xff] %v1443_v59  ;;  %v1240_v2 = vmax.f32 %v1184_v57, %v1212_v0  ;;  %v1416_v5 = vmax.f32 %v1386_v60, %v1212_v0  ;;  %v1328_v9 = vmax.f32 %v1298_v58, %v1212_v0  ;;  %v1749_v34 = vpop.f32.mrf.mxu1 }
 0x134   : > { %v2213_v6 = vadd.f32 %v2146_v45, %v821_v39  ;;  %v825_v7 = vpop.f32.mrf.mxu0  ;;  %v1157_v11 = vld [vmem:[%s2136_s26 + $0x31] sm:$0xff] }
 0x135   : > { %v826_v12 = vadd.f32 %v2130_v24, %v825_v7  ;;  %v1444_v13 = vmax.f32 %v1416_v5, 0.0  ;;  %v1185_v14 = vmax.f32 %v2171_v18, %v1157_v11  ;;  %v1299_v15 = vmax.f32 %v1269_v1, %v1157_v11  ;;  %v1213_v45 = vld [vmem:[%s2136_s26 + $0x32] sm:$0xff]  ;;  %v2242_v46 = vpop.f32.mrf.mxu1 }
 0x136   : > { %v1387_v3 = vmax.f32 %v1357_v4, %v1157_v11  ;;  %1098 = vst [vmem:[%s2136_s26 + $0x48] sm:$0xff] %v2213_v6  ;;  %v827_v16 = vpop.f32.mrf.mxu0  ;;  %v1270_v21 = vmax.f32 %v1240_v2, %v2182_v36  ;;  %v1358_v28 = vmax.f32 %v1328_v9, %v2182_v36 }
 0x137   : > { %v2224_v19 = vadd.f32 %v2151_v52, %v826_v12  ;;  %1472 = vst [vmem:[%s2202_s29 + $0x8] sm:$0xff] %v1444_v13  ;;  %v1241_v20 = vmax.f32 %v1185_v14, %v1213_v45  ;;  %v1329_v26 = vmax.f32 %v1299_v15, %v1213_v45  ;;  %v1752_v53 = vpop.f32.mrf.mxu1 }
 0x138   : > { %v1417_v23 = vmax.f32 %v1387_v3, %v1213_v45  ;;  %v828_v18 = vpop.f32.mrf.mxu0  ;;  %v1158_v29 = vld [vmem:[%s2136_s26 + $0x39] sm:$0xff] }
 0x139   : > { %1099 = vst [vmem:[%s2136_s26 + $0x50] sm:$0xff] %v2224_v19  ;;  %v829_v30 = vadd.f32 %v2130_v24, %v828_v18  ;;  %v1186_v27 = vmax.f32 %v2182_v36, %v1158_v29  ;;  %v1300_v31 = vmax.f32 %v1270_v21, %v1158_v29  ;;  %v1214_v35 = vld [vmem:[%s2136_s26 + $0x3a] sm:$0xff]  ;;  %v1388_v37 = vmax.f32 %v1358_v28, %v1158_v29 }
 0x13a   : > { %v1445_v52 = vmax.f32 %v1417_v23, 0.0  ;;  %v830_v32 = vpop.f32.mrf.mxu0  ;;  %v1271_v42 = vmax.f32 %v1241_v20, %v2195_v54  ;;  %v1359_v36 = vmax.f32 %v1329_v26, %v2195_v54 }
 0x13b   : > { %v2238_v40 = vadd.f32 %v2157_v62, %v829_v30  ;;  %v1242_v41 = vmax.f32 %v1186_v27, %v1214_v35  ;;  %v1330_v43 = vmax.f32 %v1300_v31, %v1214_v35  ;;  %v1418_v47 = vmax.f32 %v1388_v37, %v1214_v35 }
 0x13c   : > { %1473 = vst [vmem:[%s2202_s29 + $0x10] sm:$0xff] %v1445_v52  ;;  %v833_v44 = vpop.f32.mrf.mxu0 }
 0x13d   : > { %v1159_v48 = vld [vmem:[%s2136_s26 + $0x41] sm:$0xff]  ;;  %1100 = vst [vmem:[%s2136_s26 + $0x58] sm:$0xff] %v2238_v40  ;;  %v834_v33 = vadd.f32 %v2130_v24, %v833_v44  ;;  %v1272_v49 = vmax.f32 %v1242_v41, %v2213_v6  ;;  %v1446_v55 = vmax.f32 %v1418_v47, 0.0  ;;  %v1360_v58 = vmax.f32 %v1330_v43, %v2213_v6 }
 0x13e   : > { %v1187_v62 = vmax.f32 %v2195_v54, %v1159_v48  ;;  %v1301_v50 = vmax.f32 %v1271_v42, %v1159_v48  ;;  %v835_v51 = vpop.f32.mrf.mxu0  ;;  %v1215_v57 = vld [vmem:[%s2136_s26 + $0x42] sm:$0xff]  ;;  %v1389_v59 = vmax.f32 %v1359_v36, %v1159_v48  ;;  %v2257_v54 = vpop.f32.mrf.mxu1 }
 0x13f   : > { %v2254_v60 = vadd.f32 %v2165_v10, %v834_v33  ;;  %1474 = vst [vmem:[%s2202_s29 + $0x18] sm:$0xff] %v1446_v55 }
 0x140   : > { %v1243_v39 = vmax.f32 %v1187_v62, %v1215_v57  ;;  %v1331_v61 = vmax.f32 %v1301_v50, %v1215_v57  ;;  %v1160_v63 = vld [vmem:[%s2136_s26 + $0x49] sm:$0xff]  ;;  %v836_v0 = vpop.f32.mrf.mxu0  ;;  %v1419_v1 = vmax.f32 %v1389_v59, %v1215_v57  ;;  %v1753_v11 = vpop.f32.mrf.mxu1 }
 0x141   : > { %v1188_v2 = vmax.f32 %v2213_v6, %v1160_v63  ;;  %v1302_v4 = vmax.f32 %v1272_v49, %v1160_v63  ;;  %v1390_v5 = vmax.f32 %v1360_v58, %v1160_v63  ;;  %1101 = vst [vmem:[%s2136_s26 + $0x60] sm:$0xff] %v2254_v60  ;;  %v1216_v7 = vld [vmem:[%s2136_s26 + $0x4a] sm:$0xff]  ;;  %v837_v10 = vadd.f32 %v2130_v24, %v836_v0 }
 0x142   : > { %v838_v9 = vpop.f32.mrf.mxu0  ;;  %v1447_v12 = vmax.f32 %v1419_v1, 0.0  ;;  %v1273_v14 = vmax.f32 %v1243_v39, %v2224_v19  ;;  %v1361_v6 = vmax.f32 %v1331_v61, %v2224_v19  ;;  %v2271_v20 = vpop.f32.mrf.mxu1 }
 0x143   : > { %v1244_v13 = vmax.f32 %v1188_v2, %v1216_v7  ;;  %v1420_v15 = vmax.f32 %v1390_v5, %v1216_v7  ;;  %v1332_v3 = vmax.f32 %v1302_v4, %v1216_v7  ;;  %v2269_v17 = vadd.f32 %v2174_v22, %v837_v10 }
 0x144   : > { %v1161_v16 = vld [vmem:[%s2136_s26 + $0x51] sm:$0xff]  ;;  %v841_v45 = vpop.f32.mrf.mxu0  ;;  %1475 = vst [vmem:[%s2202_s29 + $0x20] sm:$0xff] %v1447_v12  ;;  %v1756_v52 = vpop.f32.mrf.mxu1 }
 0x145   : > { %v1448_v21 = vmax.f32 %v1420_v15, 0.0  ;;  %v1189_v23 = vmax.f32 %v2224_v19, %v1161_v16  ;;  %v1303_v18 = vmax.f32 %v1273_v14, %v1161_v16  ;;  %v1217_v26 = vld [vmem:[%s2136_s26 + $0x52] sm:$0xff]  ;;  %v1391_v28 = vmax.f32 %v1361_v6, %v1161_v16  ;;  %1102 = vst [vmem:[%s2136_s26 + $0x68] sm:$0xff] %v2269_v17 }
 0x146   : > { %v842_v29 = vadd.f32 %v2130_v24, %v841_v45  ;;  %v843_v30 = vpop.f32.mrf.mxu0  ;;  %v1274_v27 = vmax.f32 %v1244_v13, %v2238_v40  ;;  %v1362_v32 = vmax.f32 %v1332_v3, %v2238_v40  ;;  %v2286_v41 = vpop.f32.mrf.mxu1 }
 0x147   : > { %1476 = vst [vmem:[%s2202_s29 + $0x28] sm:$0xff] %v1448_v21  ;;  %v1245_v22 = vmax.f32 %v1189_v23, %v1217_v26  ;;  %v1333_v31 = vmax.f32 %v1303_v18, %v1217_v26  ;;  %v1421_v19 = vmax.f32 %v1391_v28, %v1217_v26 }
 0x148   : > { %v1162_v34 = vld [vmem:[%s2136_s26 + $0x59] sm:$0xff]  ;;  %v2284_v35 = vadd.f32 %v2184_v38, %v842_v29  ;;  %v844_v37 = vpop.f32.mrf.mxu0  ;;  %v1757_v33 = vpop.f32.mrf.mxu1 }
 0x149   : > { %v1190_v42 = vmax.f32 %v2238_v40, %v1162_v34  ;;  %v1304_v43 = vmax.f32 %v1274_v27, %v1162_v34  ;;  %v1449_v44 = vmax.f32 %v1421_v19, 0.0  ;;  %v1392_v36 = vmax.f32 %v1362_v32, %v1162_v34  ;;  %v1218_v62 = vld [vmem:[%s2136_s26 + $0x5a] sm:$0xff] }
 0x14a   : > { %1103 = vst [vmem:[%s2136_s26 + $0x70] sm:$0xff] %v2284_v35  ;;  %v845_v47 = vadd.f32 %v2130_v24, %v844_v37  ;;  %v846_v48 = vpop.f32.mrf.mxu0  ;;  %v1275_v38 = vmax.f32 %v1245_v22, %v2254_v60  ;;  %v1363_v50 = vmax.f32 %v1333_v31, %v2254_v60  ;;  %v2299_v55 = vpop.f32.mrf.mxu1 }
 0x14b   : > { %1477 = vst [vmem:[%s2202_s29 + $0x30] sm:$0xff] %v1449_v44  ;;  %v1246_v49 = vmax.f32 %v1190_v42, %v1218_v62  ;;  %v1422_v40 = vmax.f32 %v1392_v36, %v1218_v62  ;;  %v1334_v57 = vmax.f32 %v1304_v43, %v1218_v62 }
 0x14c   : > { %v2297_v51 = vadd.f32 %v2197_v56, %v845_v47  ;;  %v849_v53 = vpop.f32.mrf.mxu0  ;;  %v1163_v58 = vld [vmem:[%s2136_s26 + $0x61] sm:$0xff]  ;;  %v1760_v2 = vpop.f32.mrf.mxu1 }
 0x14d   : > { %v850_v59 = vadd.f32 %v2130_v24, %v849_v53  ;;  %v1450_v39 = vmax.f32 %v1422_v40, 0.0  ;;  %v1191_v61 = vmax.f32 %v2254_v60, %v1163_v58  ;;  %v1305_v63 = vmax.f32 %v1275_v38, %v1163_v58  ;;  %v1219_v56 = vld [vmem:[%s2136_s26 + $0x62] sm:$0xff] }
 0x14e   : > { %v1393_v0 = vmax.f32 %v1363_v50, %v1163_v58  ;;  %1104 = vst [vmem:[%s2136_s26 + $0x78] sm:$0xff] %v2297_v51  ;;  %v851_v1 = vpop.f32.mrf.mxu0  ;;  %v1276_v7 = vmax.f32 %v1246_v49, %v2269_v17  ;;  %v2312_v9 = vpop.f32.mrf.mxu1  ;;  %v1364_v12 = vmax.f32 %v1334_v57, %v2269_v17 }
 0x14f   : > { %v2308_v4 = vadd.f32 %v2215_v8, %v850_v59  ;;  %1478 = vst [vmem:[%s2202_s29 + $0x38] sm:$0xff] %v1450_v39  ;;  %v1247_v5 = vmax.f32 %v1191_v61, %v1219_v56  ;;  %v1335_v11 = vmax.f32 %v1305_v63, %v1219_v56 }
 0x150   : > { %v1423_v10 = vmax.f32 %v1393_v0, %v1219_v56  ;;  %v852_v60 = vpop.f32.mrf.mxu0  ;;  %v1761_v16 = vpop.f32.mrf.mxu1 }
 0x151   : > { %v1164_v13 = vld [vmem:[%s2136_s26 + $0x69] sm:$0xff]  ;;  %1105 = vst [vmem:[%s2136_s26 + $0x80] sm:$0xff] %v2308_v4  ;;  %v853_v14 = vadd.f32 %v2130_v24, %v852_v60  ;;  %v1277_v26 = vmax.f32 %v1247_v5, %v2284_v35 }
 0x152   : > { %v1451_v8 = vmax.f32 %v1423_v10, 0.0  ;;  %v1192_v15 = vmax.f32 %v2269_v17, %v1164_v13  ;;  %v1306_v3 = vmax.f32 %v1276_v7, %v1164_v13  ;;  %v854_v6 = vpop.f32.mrf.mxu0  ;;  %v1220_v45 = vld [vmem:[%s2136_s26 + $0x6a] sm:$0xff]  ;;  %v1394_v21 = vmax.f32 %v1364_v12, %v1164_v13  ;;  %v2326_v30 = vpop.f32.mrf.mxu1 }
 0x153   : > { %v2322_v23 = vadd.f32 %v2228_v25, %v853_v14  ;;  %v1365_v17 = vmax.f32 %v1335_v11, %v2284_v35 }
 0x154   : > { %1479 = vst [vmem:[%s2202_s29 + $0x40] sm:$0xff] %v1451_v8  ;;  %v1248_v18 = vmax.f32 %v1192_v15, %v1220_v45  ;;  %v1336_v28 = vmax.f32 %v1306_v3, %v1220_v45  ;;  %v857_v29 = vpop.f32.mrf.mxu0  ;;  %v1424_v52 = vmax.f32 %v1394_v21, %v1220_v45  ;;  %v1764_v34 = vpop.f32.mrf.mxu1 }
 0x155   : > { %v1165_v22 = vld [vmem:[%s2136_s26 + $0x71] sm:$0xff]  ;;  %1106 = vst [vmem:[%s2136_s26 + $0x88] sm:$0xff] %v2322_v23  ;;  %v858_v27 = vadd.f32 %v2130_v24, %v857_v29 }
 0x156   : > { %v1193_v25 = vmax.f32 %v2284_v35, %v1165_v22  ;;  %v1278_v31 = vmax.f32 %v1248_v18, %v2297_v51  ;;  %v1307_v32 = vmax.f32 %v1277_v26, %v1165_v22  ;;  %v859_v19 = vpop.f32.mrf.mxu0  ;;  %v1452_v37 = vmax.f32 %v1424_v52, 0.0  ;;  %v1221_v42 = vld [vmem:[%s2136_s26 + $0x72] sm:$0xff]  ;;  %v2341_v35 = vpop.f32.mrf.mxu1 }
 0x157   : > { %v1366_v43 = vmax.f32 %v1336_v28, %v2297_v51  ;;  %v1395_v44 = vmax.f32 %v1365_v17, %v1165_v22  ;;  %v2338_v36 = vadd.f32 %v2242_v46, %v858_v27 }
 0x158   : > { %v1249_v47 = vmax.f32 %v1193_v25, %v1221_v42  ;;  %v1337_v48 = vmax.f32 %v1307_v32, %v1221_v42  ;;  %v1166_v33 = vld [vmem:[%s2136_s26 + $0x79] sm:$0xff]  ;;  %v860_v62 = vpop.f32.mrf.mxu0  ;;  %1480 = vst [vmem:[%s2202_s29 + $0x48] sm:$0xff] %v1452_v37  ;;  %v1765_v58 = vpop.f32.mrf.mxu1 }
 0x159   : > { %v1425_v38 = vmax.f32 %v1395_v44, %v1221_v42  ;;  %v1194_v49 = vmax.f32 %v2297_v51, %v1166_v33  ;;  %v1308_v50 = vmax.f32 %v1278_v31, %v1166_v33  ;;  %v1396_v40 = vmax.f32 %v1366_v43, %v1166_v33  ;;  %1107 = vst [vmem:[%s2136_s26 + $0x90] sm:$0xff] %v2338_v36  ;;  %v1222_v53 = vld [vmem:[%s2136_s26 + $0x7a] sm:$0xff] }
 0x15a   : > { %v861_v46 = vadd.f32 %v2130_v24, %v860_v62  ;;  %v862_v57 = vpop.f32.mrf.mxu0  ;;  %v1279_v61 = vmax.f32 %v1249_v47, %v2308_v4  ;;  %v1367_v51 = vmax.f32 %v1337_v48, %v2308_v4  ;;  %v2355_v5 = vpop.f32.mrf.mxu1 }
 0x15b   : > { %v1453_v59 = vmax.f32 %v1425_v38, 0.0  ;;  %v1250_v39 = vmax.f32 %v1194_v49, %v1222_v53  ;;  %v1426_v63 = vmax.f32 %v1396_v40, %v1222_v53  ;;  %v1338_v0 = vmax.f32 %v1308_v50, %v1222_v53 }
 0x15c   : > { %v1167_v1 = vld [vmem:[%s2136_s26 + $0x81] sm:$0xff]  ;;  %v2353_v2 = vadd.f32 %v2257_v54, %v861_v46  ;;  %v865_v56 = vpop.f32.mrf.mxu0  ;;  %v1768_v8 = vpop.f32.mrf.mxu1 }
 0x15d   : > { %1481 = vst [vmem:[%s2202_s29 + $0x50] sm:$0xff] %v1453_v59  ;;  %v1454_v7 = vmax.f32 %v1426_v63, 0.0  ;;  %v1195_v10 = vmax.f32 %v2308_v4, %v1167_v1  ;;  %v1309_v60 = vmax.f32 %v1279_v61, %v1167_v1  ;;  %v1223_v11 = vld [vmem:[%s2136_s26 + $0x82] sm:$0xff]  ;;  %v1397_v12 = vmax.f32 %v1367_v51, %v1167_v1 }
 0x15e   : > { %1108 = vst [vmem:[%s2136_s26 + $0x98] sm:$0xff] %v2353_v2  ;;  %v866_v13 = vadd.f32 %v2130_v24, %v865_v56  ;;  %v867_v14 = vpop.f32.mrf.mxu0  ;;  %v1280_v15 = vmax.f32 %v1250_v39, %v2322_v23  ;;  %v1368_v6 = vmax.f32 %v1338_v0, %v2322_v23  ;;  %v2370_v18 = vpop.f32.mrf.mxu1 }
 0x15f   : > { %1482 = vst [vmem:[%s2202_s29 + $0x58] sm:$0xff] %v1454_v7  ;;  %v1251_v54 = vmax.f32 %v1195_v10, %v1223_v11  ;;  %v1339_v3 = vmax.f32 %v1309_v60, %v1223_v11  ;;  %v1427_v4 = vmax.f32 %v1397_v12, %v1223_v11 }
 0x160   : > { %v1168_v16 = vld [vmem:[%s2136_s26 + $0x89] sm:$0xff]  ;;  %v2368_v45 = vadd.f32 %v2271_v20, %v866_v13  ;;  %v868_v21 = vpop.f32.mrf.mxu0  ;;  %v1769_v27 = vpop.f32.mrf.mxu1 }
 0x161   : > { %v1196_v26 = vmax.f32 %v2322_v23, %v1168_v16  ;;  %v1310_v28 = vmax.f32 %v1280_v15, %v1168_v16  ;;  %v1455_v29 = vmax.f32 %v1427_v4, 0.0  ;;  %v1398_v17 = vmax.f32 %v1368_v6, %v1168_v16  ;;  %v1224_v25 = vld [vmem:[%s2136_s26 + $0x8a] sm:$0xff] }
 0x162   : > { %1109 = vst [vmem:[%s2136_s26 + $0xa0] sm:$0xff] %v2368_v45  ;;  %v869_v52 = vadd.f32 %v2130_v24, %v868_v21  ;;  %v870_v22 = vpop.f32.mrf.mxu0  ;;  %v1281_v20 = vmax.f32 %v1251_v54, %v2338_v36  ;;  %v1369_v32 = vmax.f32 %v1339_v3, %v2338_v36  ;;  %v2383_v37 = vpop.f32.mrf.mxu1 }
 0x163   : > { %1483 = vst [vmem:[%s2202_s29 + $0x60] sm:$0xff] %v1455_v29  ;;  %v1252_v31 = vmax.f32 %v1196_v26, %v1224_v25  ;;  %v1428_v23 = vmax.f32 %v1398_v17, %v1224_v25  ;;  %v1340_v42 = vmax.f32 %v1310_v28, %v1224_v25 }
 0x164   : > { %v2381_v19 = vadd.f32 %v2286_v41, %v869_v52  ;;  %v873_v34 = vpop.f32.mrf.mxu0  ;;  %v1772_v49 = vpop.f32.mrf.mxu1 }
 0x165   : > { %v1169_v43 = vld [vmem:[%s2136_s26 + $0x91] sm:$0xff]  ;;  %v874_v44 = vadd.f32 %v2130_v24, %v873_v34  ;;  %v1456_v47 = vmax.f32 %v1428_v23, 0.0  ;;  %v1282_v53 = vmax.f32 %v1252_v31, %v2353_v2  ;;  %v1370_v59 = vmax.f32 %v1340_v42, %v2353_v2 }
 0x166   : > { %v1197_v48 = vmax.f32 %v2338_v36, %v1169_v43  ;;  %v1311_v33 = vmax.f32 %v1281_v20, %v1169_v43  ;;  %v1399_v62 = vmax.f32 %v1369_v32, %v1169_v43  ;;  %1110 = vst [vmem:[%s2136_s26 + $0xa8] sm:$0xff] %v2381_v19  ;;  %v875_v38 = vpop.f32.mrf.mxu0  ;;  %v1225_v41 = vld [vmem:[%s2136_s26 + $0x92] sm:$0xff]  ;;  %v2396_v57 = vpop.f32.mrf.mxu1 }
 0x167   : > { %v2392_v50 = vadd.f32 %v2299_v55, %v874_v44  ;;  %1484 = vst [vmem:[%s2202_s29 + $0x68] sm:$0xff] %v1456_v47 }
 0x168   : > { %v1253_v40 = vmax.f32 %v1197_v48, %v1225_v41  ;;  %v1429_v46 = vmax.f32 %v1399_v62, %v1225_v41  ;;  %v876_v36 = vpop.f32.mrf.mxu0  ;;  %v1341_v58 = vmax.f32 %v1311_v33, %v1225_v41  ;;  %v1773_v1 = vpop.f32.mrf.mxu1 }
 0x169   : > { %v1170_v39 = vld [vmem:[%s2136_s26 + $0x99] sm:$0xff]  ;;  %1111 = vst [vmem:[%s2136_s26 + $0xb0] sm:$0xff] %v2392_v50  ;;  %v877_v61 = vadd.f32 %v2130_v24, %v876_v36 }
 0x16a   : > { %v1457_v55 = vmax.f32 %v1429_v46, 0.0  ;;  %v1198_v63 = vmax.f32 %v2353_v2, %v1170_v39  ;;  %v1312_v0 = vmax.f32 %v1282_v53, %v1170_v39  ;;  %v878_v51 = vpop.f32.mrf.mxu0  ;;  %v1226_v56 = vld [vmem:[%s2136_s26 + $0x9a] sm:$0xff]  ;;  %v1400_v7 = vmax.f32 %v1370_v59, %v1170_v39  ;;  %v2410_v14 = vpop.f32.mrf.mxu1 }
 0x16b   : > { %v2406_v10 = vadd.f32 %v2312_v9, %v877_v61  ;;  %v1283_v11 = vmax.f32 %v1253_v40, %v2368_v45  ;;  %v1371_v2 = vmax.f32 %v1341_v58, %v2368_v45 }
 0x16c   : > { %1485 = vst [vmem:[%s2202_s29 + $0x70] sm:$0xff] %v1457_v55  ;;  %v1254_v60 = vmax.f32 %v1198_v63, %v1226_v56  ;;  %v1342_v12 = vmax.f32 %v1312_v0, %v1226_v56  ;;  %v881_v13 = vpop.f32.mrf.mxu0  ;;  %v1430_v8 = vmax.f32 %v1400_v7, %v1226_v56  ;;  %v1776_v16 = vpop.f32.mrf.mxu1 }
 0x16d   : > { %v1171_v54 = vld [vmem:[%s2136_s26 + $0xa1] sm:$0xff]  ;;  %1112 = vst [vmem:[%s2136_s26 + $0xb8] sm:$0xff] %v2406_v10  ;;  %v882_v15 = vadd.f32 %v2130_v24, %v881_v13 }
 0x16e   : > { %v1199_v9 = vmax.f32 %v2368_v45, %v1171_v54  ;;  %v1284_v3 = vmax.f32 %v1254_v60, %v2381_v19  ;;  %v1313_v6 = vmax.f32 %v1283_v11, %v1171_v54  ;;  %v883_v4 = vpop.f32.mrf.mxu0  ;;  %v1458_v21 = vmax.f32 %v1430_v8, 0.0  ;;  %v1227_v26 = vld [vmem:[%s2136_s26 + $0xa2] sm:$0xff]  ;;  %v2425_v45 = vpop.f32.mrf.mxu1 }
 0x16f   : > { %v1372_v28 = vmax.f32 %v1342_v12, %v2381_v19  ;;  %v1401_v29 = vmax.f32 %v1371_v2, %v1171_v54  ;;  %v2422_v17 = vadd.f32 %v2326_v30, %v882_v15 }
 0x170   : > { %v1255_v52 = vmax.f32 %v1199_v9, %v1227_v26  ;;  %v1343_v22 = vmax.f32 %v1313_v6, %v1227_v26  ;;  %v1172_v27 = vld [vmem:[%s2136_s26 + $0xa9] sm:$0xff]  ;;  %v884_v25 = vpop.f32.mrf.mxu0  ;;  %1486 = vst [vmem:[%s2202_s29 + $0x78] sm:$0xff] %v1458_v21  ;;  %v1777_v43 = vpop.f32.mrf.mxu1 }
 0x171   : > { %v1431_v20 = vmax.f32 %v1401_v29, %v1227_v26  ;;  %v1200_v31 = vmax.f32 %v2381_v19, %v1172_v27  ;;  %v1314_v32 = vmax.f32 %v1284_v3, %v1172_v27  ;;  %v1402_v23 = vmax.f32 %v1372_v28, %v1172_v27  ;;  %1113 = vst [vmem:[%s2136_s26 + $0xc0] sm:$0xff] %v2422_v17  ;;  %v1228_v34 = vld [vmem:[%s2136_s26 + $0xaa] sm:$0xff] }
 0x172   : > { %v885_v30 = vadd.f32 %v2130_v24, %v884_v25  ;;  %v886_v42 = vpop.f32.mrf.mxu0  ;;  %v1285_v48 = vmax.f32 %v1255_v52, %v2392_v50  ;;  %v1373_v19 = vmax.f32 %v1343_v22, %v2392_v50  ;;  %v2439_v40 = vpop.f32.mrf.mxu1 }
 0x173   : > { %v1459_v44 = vmax.f32 %v1431_v20, 0.0  ;;  %v1256_v47 = vmax.f32 %v1200_v31, %v1228_v34  ;;  %v1432_v33 = vmax.f32 %v1402_v23, %v1228_v34  ;;  %v1344_v62 = vmax.f32 %v1314_v32, %v1228_v34 }
 0x174   : > { %v1173_v38 = vld [vmem:[%s2136_s26 + $0xb1] sm:$0xff]  ;;  %v2437_v49 = vadd.f32 %v2341_v35, %v885_v30  ;;  %v889_v41 = vpop.f32.mrf.mxu0  ;;  %v1780_v55 = vpop.f32.mrf.mxu1 }
 0x175   : > { %1487 = vst [vmem:[%s2202_s29 + $0x80] sm:$0xff] %v1459_v44  ;;  %v1460_v53 = vmax.f32 %v1432_v33, 0.0  ;;  %v1201_v46 = vmax.f32 %v2392_v50, %v1173_v38  ;;  %v1315_v36 = vmax.f32 %v1285_v48, %v1173_v38  ;;  %v1229_v58 = vld [vmem:[%s2136_s26 + $0xb2] sm:$0xff]  ;;  %v1403_v59 = vmax.f32 %v1373_v19, %v1173_v38 }
 0x176   : > { %1114 = vst [vmem:[%s2136_s26 + $0xc8] sm:$0xff] %v2437_v49  ;;  %v890_v39 = vadd.f32 %v2130_v24, %v889_v41  ;;  %v891_v61 = vpop.f32.mrf.mxu0  ;;  %v1286_v63 = vmax.f32 %v1256_v47, %v2406_v10  ;;  %v1374_v51 = vmax.f32 %v1344_v62, %v2406_v10  ;;  %v2454_v60 = vpop.f32.mrf.mxu1 }
 0x177   : > { %1488 = vst [vmem:[%s2202_s29 + $0x88] sm:$0xff] %v1460_v53  ;;  %v1257_v35 = vmax.f32 %v1201_v46, %v1229_v58  ;;  %v1345_v0 = vmax.f32 %v1315_v36, %v1229_v58  ;;  %v1433_v50 = vmax.f32 %v1403_v59, %v1229_v58 }
 0x178   : > { %v1174_v1 = vld [vmem:[%s2136_s26 + $0xb9] sm:$0xff]  ;;  %v2452_v56 = vadd.f32 %v2355_v5, %v890_v39  ;;  %v892_v7 = vpop.f32.mrf.mxu0  ;;  %v1781_v15 = vpop.f32.mrf.mxu1 }
 0x179   : > { %v1202_v11 = vmax.f32 %v2406_v10, %v1174_v1  ;;  %v1316_v12 = vmax.f32 %v1286_v63, %v1174_v1  ;;  %v1461_v13 = vmax.f32 %v1433_v50, 0.0  ;;  %v1404_v2 = vmax.f32 %v1374_v51, %v1174_v1  ;;  %v1230_v9 = vld [vmem:[%s2136_s26 + $0xba] sm:$0xff] }
 0x17a   : > { %1115 = vst [vmem:[%s2136_s26 + $0xd0] sm:$0xff] %v2452_v56  ;;  %v893_v8 = vadd.f32 %v2130_v24, %v892_v7  ;;  %v894_v54 = vpop.f32.mrf.mxu0  ;;  %v1287_v5 = vmax.f32 %v1257_v35, %v2422_v17  ;;  %v1375_v10 = vmax.f32 %v1345_v0, %v2422_v17 }
 0x17b   : > { %1489 = vst [vmem:[%s2202_s29 + $0x90] sm:$0xff] %v1461_v13  ;;  %v1258_v3 = vmax.f32 %v1202_v11, %v1230_v9  ;;  %v1434_v6 = vmax.f32 %v1404_v2, %v1230_v9  ;;  %v1346_v21 = vmax.f32 %v1316_v12, %v1230_v9 }
 0x17c   : > { %v2465_v4 = vadd.f32 %v2370_v18, %v893_v8  ;;  %v897_v16 = vpop.f32.mrf.mxu0 }
 0x17d   : > { %v1175_v26 = vld [vmem:[%s2136_s26 + $0xc1] sm:$0xff]  ;;  %v898_v28 = vadd.f32 %v2130_v24, %v897_v16  ;;  %v1462_v29 = vmax.f32 %v1434_v6, 0.0  ;;  %v1288_v32 = vmax.f32 %v1258_v3, %v2437_v49 }
 0x17e   : > { %v1203_v52 = vmax.f32 %v2422_v17, %v1175_v26  ;;  %v1317_v22 = vmax.f32 %v1287_v5, %v1175_v26  ;;  %v1405_v27 = vmax.f32 %v1375_v10, %v1175_v26  ;;  %1116 = vst [vmem:[%s2136_s26 + $0xd8] sm:$0xff] %v2465_v4  ;;  %v899_v25 = vpop.f32.mrf.mxu0  ;;  %v1231_v20 = vld [vmem:[%s2136_s26 + $0xc2] sm:$0xff]  ;;  %v1376_v17 = vmax.f32 %v1346_v21, %v2437_v49 }
 0x17f   : > { %v2474_v18 = vadd.f32 %v2383_v37, %v898_v28  ;;  %1490 = vst [vmem:[%s2202_s29 + $0x98] sm:$0xff] %v1462_v29 }
 0x180   : > { %v1259_v31 = vmax.f32 %v1203_v52, %v1231_v20  ;;  %v1435_v23 = vmax.f32 %v1405_v27, %v1231_v20  ;;  %v900_v34 = vpop.f32.mrf.mxu0  ;;  %v1347_v30 = vmax.f32 %v1317_v22, %v1231_v20 }
 0x181   : > { %v1176_v42 = vld [vmem:[%s2136_s26 + $0xc9] sm:$0xff]  ;;  %1117 = vst [vmem:[%s2136_s26 + $0xe0] sm:$0xff] %v2474_v18  ;;  %v901_v43 = vadd.f32 %v2130_v24, %v900_v34 }
 0x182   : > { %v1463_v44 = vmax.f32 %v1435_v23, 0.0  ;;  %v1204_v37 = vmax.f32 %v2437_v49, %v1176_v42  ;;  %v1318_v47 = vmax.f32 %v1288_v32, %v1176_v42  ;;  %v902_v48 = vpop.f32.mrf.mxu0  ;;  %v1232_v33 = vld [vmem:[%s2136_s26 + $0xca] sm:$0xff]  ;;  %v1406_v62 = vmax.f32 %v1376_v17, %v1176_v42 }
 0x183   : > { %v1070_v19 = vadd.f32 %v2396_v57, %v901_v43  ;;  %v1289_v41 = vmax.f32 %v1259_v31, %v2452_v56  ;;  %v1377_v36 = vmax.f32 %v1347_v30, %v2452_v56 }
 0x184   : > { %1491 = vst [vmem:[%s2202_s29 + $0xa0] sm:$0xff] %v1463_v44  ;;  %v1260_v38 = vmax.f32 %v1204_v37, %v1232_v33  ;;  %v1348_v53 = vmax.f32 %v1318_v47, %v1232_v33  ;;  %v905_v46 = vpop.f32.mrf.mxu0  ;;  %v1436_v58 = vmax.f32 %v1406_v62, %v1232_v33 }
 0x185   : > { %v1177_v59 = vld [vmem:[%s2136_s26 + $0xd1] sm:$0xff]  ;;  %1118 = vst [vmem:[%s2136_s26 + $0xe8] sm:$0xff] %v1070_v19  ;;  %v906_v49 = vadd.f32 %v2130_v24, %v905_v46 }
 0x186   : > { %v1205_v39 = vmax.f32 %v2452_v56, %v1177_v59  ;;  %v1290_v57 = vmax.f32 %v1260_v38, %v2465_v4  ;;  %v1319_v61 = vmax.f32 %v1289_v41, %v1177_v59  ;;  %v907_v55 = vpop.f32.mrf.mxu0  ;;  %v1464_v35 = vmax.f32 %v1436_v58, 0.0  ;;  %v1233_v63 = vld [vmem:[%s2136_s26 + $0xd2] sm:$0xff] }
 0x187   : > { %v1378_v0 = vmax.f32 %v1348_v53, %v2465_v4  ;;  %v1407_v51 = vmax.f32 %v1377_v36, %v1177_v59  ;;  %v1075_v50 = vadd.f32 %v2410_v14, %v906_v49  ;;  %v1888_v14 = vld [vmem:[%s2532_s2] ss:$0 sm:$0xff] }
 0x188   : > { %v1261_v1 = vmax.f32 %v1205_v39, %v1233_v63  ;;  %v1349_v7 = vmax.f32 %v1319_v61, %v1233_v63  ;;  %v1178_v11 = vld [vmem:[%s2136_s26 + $0xd9] sm:$0xff]  ;;  %v908_v12 = vpop.f32.mrf.mxu0  ;;  %1492 = vst [vmem:[%s2202_s29 + $0xa8] sm:$0xff] %v1464_v35 }
 0x189   : > { %v1437_v24 = vmax.f32 %v1407_v51, %v1233_v63  ;;  %v1206_v56 = vmax.f32 %v2465_v4, %v1178_v11  ;;  %v1320_v13 = vmax.f32 %v1290_v57, %v1178_v11  ;;  %v1408_v2 = vmax.f32 %v1378_v0, %v1178_v11  ;;  %1119 = vst [vmem:[%s2136_s26 + $0xf0] sm:$0xff] %v1075_v50  ;;  %v1234_v8 = vld [vmem:[%s2136_s26 + $0xda] sm:$0xff] }
 0x18a   : > { %v1291_v54 = vmax.f32 %v1261_v1, %v2474_v18  ;;  %v909_v15 = vadd.f32 %v1888_v14, %v908_v12  ;;  %v910_v9 = vpop.f32.mrf.mxu0  ;;  %v1379_v4 = vmax.f32 %v1349_v7, %v2474_v18 }
 0x18b   : > { %v1465_v5 = vmax.f32 %v1437_v24, 0.0  ;;  %v1262_v3 = vmax.f32 %v1206_v56, %v1234_v8  ;;  %v1350_v10 = vmax.f32 %v1320_v13, %v1234_v8  ;;  %v1438_v6 = vmax.f32 %v1408_v2, %v1234_v8 }
 0x18c   : > { %v1293_v16 = vld [vmem:[%s2136_s26 + $0xe1] sm:$0xff]  ;;  %v1078_v21 = vadd.f32 %v2425_v45, %v909_v15  ;;  %v913_v26 = vpop.f32.mrf.mxu0 }
 0x18d   : > { %1493 = vst [vmem:[%s2202_s29 + $0xb0] sm:$0xff] %v1465_v5  ;;  %v1466_v28 = vmax.f32 %v1438_v6, 0.0  ;;  %v1321_v29 = vmax.f32 %v1291_v54, %v1293_v16  ;;  %v1409_v52 = vmax.f32 %v1379_v4, %v1293_v16  ;;  %v914_v22 = vadd.f32 %v1888_v14, %v913_v26  ;;  %v1323_v20 = vld [vmem:[%s2136_s26 + $0xe2] sm:$0xff] }
 0x18e   : > { %1120 = vst [vmem:[%s2136_s26 + $0xf8] sm:$0xff] %v1078_v21  ;;  %v915_v27 = vpop.f32.mrf.mxu0  ;;  %v1292_v25 = vmax.f32 %v1262_v3, %v1070_v19  ;;  %v1380_v31 = vmax.f32 %v1350_v10, %v1070_v19 }
 0x18f   : > { %1494 = vst [vmem:[%s2202_s29 + $0xb8] sm:$0xff] %v1466_v28  ;;  %v1351_v18 = vmax.f32 %v1321_v29, %v1323_v20  ;;  %v1439_v32 = vmax.f32 %v1409_v52, %v1323_v20  ;;  %v1083_v45 = vadd.f32 %v2439_v40, %v914_v22 }
 0x190   : > { %v1294_v23 = vld [vmem:[%s2136_s26 + $0xe9] sm:$0xff]  ;;  %v916_v34 = vpop.f32.mrf.mxu0 }
 0x191   : > { %v1322_v30 = vmax.f32 %v1292_v25, %v1294_v23  ;;  %v1410_v17 = vmax.f32 %v1380_v31, %v1294_v23  ;;  %v917_v42 = vadd.f32 %v1888_v14, %v916_v34  ;;  %v1467_v43 = vmax.f32 %v1439_v32, 0.0  ;;  %v1324_v44 = vld [vmem:[%s2136_s26 + $0xea] sm:$0xff]  ;;  %1121 = vst [vmem:[%s2136_s26 + $0x100] sm:$0xff] %v1083_v45 }
 0x192   : > { %v918_v37 = vpop.f32.mrf.mxu0  ;;  %v1381_v40 = vmax.f32 %v1351_v18, %v1075_v50 }
 0x193   : > { %v1440_v47 = vmax.f32 %v1410_v17, %v1324_v44  ;;  %v1086_v48 = vadd.f32 %v2454_v60, %v917_v42  ;;  %1495 = vst [vmem:[%s2202_s29 + $0xc0] sm:$0xff] %v1467_v43  ;;  %v1352_v33 = vmax.f32 %v1322_v30, %v1324_v44 }
 0x195   : > { %v1468_v62 = vmax.f32 %v1440_v47, 0.0  ;;  %v1383_v19 = vld [vmem:[%s2136_s26 + $0xf1] sm:$0xff]  ;;  %1122 = vst [vmem:[%s2136_s26 + $0x108] sm:$0xff] %v1086_v48  ;;  %v1382_v53 = vmax.f32 %v1352_v33, %v1078_v21 }
 0x196   : > { %v1411_v38 = vmax.f32 %v1381_v40, %v1383_v19  ;;  %v1413_v41 = vld [vmem:[%s2136_s26 + $0xf2] sm:$0xff] }
 0x197   : > { %1496 = vst [vmem:[%s2202_s29 + $0xc8] sm:$0xff] %v1468_v62 }
 0x198   : > { %v1441_v46 = vmax.f32 %v1411_v38, %v1413_v41  ;;  %v1384_v36 = vld [vmem:[%s2136_s26 + $0xf9] sm:$0xff] }
 0x199   : > { %v1412_v59 = vmax.f32 %v1382_v53, %v1384_v36  ;;  %v1414_v49 = vld [vmem:[%s2136_s26 + $0xfa] sm:$0xff] }
 0x19a   : > { %v1469_v58 = vmax.f32 %v1441_v46, 0.0 }
 0x19b   : > { %v1442_v39 = vmax.f32 %v1412_v59, %v1414_v49 }
 0x19c   : > { %1497 = vst [vmem:[%s2202_s29 + $0xd0] sm:$0xff] %v1469_v58 }
 0x19d   : > { %v1470_v60 = vmax.f32 %v1442_v39, 0.0 }
 0x19f   : > { %1498 = vst [vmem:[%s2202_s29 + $0xd8] sm:$0xff] %v1470_v60 }
 0x1a0 PF: > { %s15_s15 = sadd.s32 1, %s1895_s15  }
 0x1a1   : > { %p12_p4 = scmp.ge.s32.totalorder %s15_s15, 4  }
 0x1a3   :  { %14 = sbr.rel (!%p12_p4) target bundleno = 1 (0x1), region = 74 }

// kernel: alexnet_forward.5
= control target key start
LH: loop header
LB: loop body
LE: loop exit
PB: predicated region body
PF: predicated region fallthrough
CT: control target
= control target key end

     0   :  { %s1810_s12 = smov 0   ;;  %s2281_s0 = inlined_call_operand.vmem [shape: bf16[2,16,1152], index: 0, kind: input, shape index: {}]   ;;  %s2282_s1 = inlined_call_operand.vmem [shape: bf16[1152,256], index: 1, kind: input, shape index: {}]   ;;  %s2283_s2 = inlined_call_operand.vmem [shape: f32[1,256], index: 2, kind: input, shape index: {}]   ;;  %s2284_s3 = inlined_call_operand.vmem [shape: f32[2,16,256], index: 3, kind: output, shape index: {}]  }
   0x1 LB: > { %s1378_s13 = sadd.s32 4294967295, %s1787_s12   ;;  %p1382_p0 = scmp.ge.s32.totalorder %s1787_s12, 1  ;;  %s1787_s12 = sphi %s1810_s12, %s13_s12  }
   0x2   : > { %p137_p1 = scmp.lt.s32.totalorder %s1787_s12, 3 }
   0x4   : > { %p138_p2 = pnand %p1382_p0, %p137_p1 }
   0x5   : > { %p161_p3 = scmp.lt.s32.totalorder (!%p138_p2), %s1378_s13, 1 }
   0x6   : > { %141 = sbr.rel (%p138_p2) target bundleno = 374 (0x176), region = 32 }
   0xb   : > { %v1552_v0 = vld [vmem:[%s2282_s1 + $0x74] ss:$8 sps:$4 sm:$0xff]   ;;  %v1554_v1 = vld [vmem:[%s2282_s1 + $0x70] ss:$8 sps:$4 sm:$0xff]   ;;  %v1558_v4 = vld [vmem:[%s2282_s1 + $0x64] ss:$8 sps:$4 sm:$0xff]  }
   0xc   : > { %1104 = vmatprep.subr.bf16.mxu0 %v1552_v0  ;;  %v1555_v2 = vld [vmem:[%s2282_s1 + $0x174] ss:$8 sps:$4 sm:$0xff]   ;;  %v1557_v3 = vld [vmem:[%s2282_s1 + $0x170] ss:$8 sps:$4 sm:$0xff]   ;;  %v1560_v5 = vld [vmem:[%s2282_s1 + $0x60] ss:$8 sps:$4 sm:$0xff]  }
   0xd   : > { %1105 = vmatpush1.bf16.msra.mxu0 %v1554_v1  ;;  %1147 = vmatprep.subr.bf16.mxu1 %v1555_v2  ;;  %v1561_v6 = vld [vmem:[%s2282_s1 + $0x164] ss:$8 sps:$4 sm:$0xff]   ;;  %v1563_v7 = vld [vmem:[%s2282_s1 + $0x160] ss:$8 sps:$4 sm:$0xff]   ;;  %v1564_v8 = vld [vmem:[%s2282_s1 + $0x54] ss:$8 sps:$4 sm:$0xff]  }
   0xe   : > { %1148 = vmatpush1.bf16.msra.mxu1 %v1557_v3  ;;  %1106 = vmatprep.subr.bf16.mxu0 %v1558_v4  ;;  %v1566_v9 = vld [vmem:[%s2282_s1 + $0x50] ss:$8 sps:$4 sm:$0xff]   ;;  %v1567_v10 = vld [vmem:[%s2282_s1 + $0x154] ss:$8 sps:$4 sm:$0xff]   ;;  %v1570_v11 = vld [vmem:[%s2282_s1 + $0x44] ss:$8 sps:$4 sm:$0xff]  }
   0xf   : > { %1149 = vmatprep.subr.bf16.mxu1 %v1561_v6  ;;  %v1569_v12 = vld [vmem:[%s2282_s1 + $0x150] ss:$8 sps:$4 sm:$0xff]   ;;  %v1573_v13 = vld [vmem:[%s2282_s1 + $0x144] ss:$8 sps:$4 sm:$0xff]   ;;  %v1572_v14 = vld [vmem:[%s2282_s1 + $0x40] ss:$8 sps:$4 sm:$0xff]  }
  0x10   : > { %v1576_v15 = vld [vmem:[%s2282_s1 + $0x34] ss:$8 sps:$4 sm:$0xff]   ;;  %v1575_v16 = vld [vmem:[%s2282_s1 + $0x140] ss:$8 sps:$4 sm:$0xff]   ;;  %v1578_v18 = vld [vmem:[%s2282_s1 + $0x30] ss:$8 sps:$4 sm:$0xff]  }
  0x11   : > { %1107 = vmatpush1.bf16.msra.mxu0 %v1560_v5  ;;  %v1579_v17 = vld [vmem:[%s2282_s1 + $0x134] ss:$8 sps:$4 sm:$0xff]   ;;  %v1582_v19 = vld [vmem:[%s2282_s1 + $0x24] ss:$8 sps:$4 sm:$0xff]   ;;  %v1581_v20 = vld [vmem:[%s2282_s1 + $0x130] ss:$8 sps:$4 sm:$0xff]  }
  0x12   : > { %1108 = vmatprep.subr.bf16.mxu0 %v1564_v8  ;;  %1150 = vmatpush1.bf16.msra.mxu1 %v1563_v7  ;;  %v1585_v21 = vld [vmem:[%s2282_s1 + $0x124] ss:$8 sps:$4 sm:$0xff]   ;;  %v1584_v22 = vld [vmem:[%s2282_s1 + $0x20] ss:$8 sps:$4 sm:$0xff]   ;;  %v1588_v23 = vld [vmem:[%s2282_s1 + $0x14] ss:$8 sps:$4 sm:$0xff]  }
  0x13   : > { %1151 = vmatprep.subr.bf16.mxu1 %v1567_v10  ;;  %v1587_v24 = vld [vmem:[%s2282_s1 + $0x120] ss:$8 sps:$4 sm:$0xff]   ;;  %v1591_v25 = vld [vmem:[%s2282_s1 + $0x114] ss:$8 sps:$4 sm:$0xff]   ;;  %v1590_v26 = vld [vmem:[%s2282_s1 + $0x10] ss:$8 sps:$4 sm:$0xff]  }
  0x14   : > { %v1594_v27 = vld [vmem:[%s2282_s1 + $0x4] ss:$8 sps:$4 sm:$0xff]   ;;  %v1593_v28 = vld [vmem:[%s2282_s1 + $0x110] ss:$8 sps:$4 sm:$0xff]   ;;  %v1596_v30 = vld [vmem:[%s2282_s1] ss:$8 sps:$4 sm:$0xff]  }
  0x15   : > { %1109 = vmatpush1.bf16.msra.mxu0 %v1566_v9  ;;  %v1597_v29 = vld [vmem:[%s2282_s1 + $0x104] ss:$8 sps:$4 sm:$0xff]   ;;  %v1600_v31 = vld [vmem:[%s2282_s1 + $0xf4] ss:$8 sps:$4 sm:$0xff]   ;;  %v1599_v32 = vld [vmem:[%s2282_s1 + $0x100] ss:$8 sps:$4 sm:$0xff]  }
  0x16   : > { %1110 = vmatprep.subr.bf16.mxu0 %v1570_v11  ;;  %1152 = vmatpush1.bf16.msra.mxu1 %v1569_v12  ;;  %v1603_v33 = vld [vmem:[%s2282_s1 + $0x1f4] ss:$8 sps:$4 sm:$0xff]   ;;  %v1602_v34 = vld [vmem:[%s2282_s1 + $0xf0] ss:$8 sps:$4 sm:$0xff]   ;;  %v1606_v35 = vld [vmem:[%s2282_s1 + $0xe4] ss:$8 sps:$4 sm:$0xff]  }
  0x17   : > { %1153 = vmatprep.subr.bf16.mxu1 %v1573_v13  ;;  %s2286_s13 = smov (!%p161_p3, %s1378_s13), 1  ;;  %v1605_v36 = vld [vmem:[%s2282_s1 + $0x1f0] ss:$8 sps:$4 sm:$0xff]   ;;  %v1609_v37 = vld [vmem:[%s2282_s1 + $0x1e4] ss:$8 sps:$4 sm:$0xff]  }
  0x18   : > { %v1608_v38 = vld [vmem:[%s2282_s1 + $0xe0] ss:$8 sps:$4 sm:$0xff]   ;;  %v1612_v39 = vld [vmem:[%s2282_s1 + $0xd4] ss:$8 sps:$4 sm:$0xff]   ;;  %s1542_s19 = smul.u32 72, %s2286_s13 }
  0x19   : > { %1111 = vmatpush1.bf16.msra.mxu0 %v1572_v14  ;;  %v1611_v40 = vld [vmem:[%s2282_s1 + $0x1e0] ss:$8 sps:$4 sm:$0xff]   ;;  %v1615_v41 = vld [vmem:[%s2282_s1 + $0x1d4] ss:$8 sps:$4 sm:$0xff]   ;;  %v1614_v42 = vld [vmem:[%s2282_s1 + $0xd0] ss:$8 sps:$4 sm:$0xff]  }
  0x1a   : > { %1112 = vmatprep.subr.bf16.mxu0 %v1576_v15  ;;  %1154 = vmatpush1.bf16.msra.mxu1 %v1575_v16  ;;  %v1618_v43 = vld [vmem:[%s2282_s1 + $0xc4] ss:$8 sps:$4 sm:$0xff]   ;;  %s1960_s30 = scalar_lea.vmem %s2281_s0, %s1542_s19  ;;  %v1617_v44 = vld [vmem:[%s2282_s1 + $0x1d0] ss:$8 sps:$4 sm:$0xff]   ;;  %v1620_v46 = vld [vmem:[%s2282_s1 + $0xc0] ss:$8 sps:$4 sm:$0xff]  }
  0x1b   : > { %1155 = vmatprep.subr.bf16.mxu1 %v1579_v17  ;;  %v1621_v45 = vld [vmem:[%s2282_s1 + $0x1c4] ss:$8 sps:$4 sm:$0xff]   ;;  %v1624_v48 = vld [vmem:[%s2282_s1 + $0xb4] ss:$8 sps:$4 sm:$0xff]   ;;  %v1623_v49 = vld [vmem:[%s2282_s1 + $0x1c0] ss:$8 sps:$4 sm:$0xff]  }
  0x1c   : > { %v1649_v47 = vld [vmem:[%s1960_s30 + $0x4] ss:$36 sps:$4 sm:$0xff]   ;;  %v1627_v50 = vld [vmem:[%s2282_s1 + $0x1b4] ss:$8 sps:$4 sm:$0xff]   ;;  %v1656_v51 = vld [vmem:[%s1960_s30 + $0xc] ss:$36 sps:$4 sm:$0xff]  }
  0x1d   : > { %1113 = vmatpush1.bf16.msra.mxu0 %v1578_v18  ;;  %1136 = vmatprep.mubr.bf16.mxu0 %v1649_v47  ;;  %v1626_v52 = vld [vmem:[%s2282_s1 + $0xb0] ss:$8 sps:$4 sm:$0xff]   ;;  %v1630_v53 = vld [vmem:[%s2282_s1 + $0xa4] ss:$8 sps:$4 sm:$0xff]   ;;  %v1632_v56 = vld [vmem:[%s2282_s1 + $0xa0] ss:$8 sps:$4 sm:$0xff]  }
  0x1e   : > { %1114 = vmatprep.subr.bf16.mxu0 %v1582_v19  ;;  %1156 = vmatpush1.bf16.msra.mxu1 %v1581_v20  ;;  %v1629_v54 = vld [vmem:[%s2282_s1 + $0x1b0] ss:$8 sps:$4 sm:$0xff]   ;;  %v1633_v55 = vld [vmem:[%s2282_s1 + $0x1a4] ss:$8 sps:$4 sm:$0xff]   ;;  %v1636_v57 = vld [vmem:[%s2282_s1 + $0x94] ss:$8 sps:$4 sm:$0xff]  }
  0x1f   : > { %1157 = vmatprep.subr.bf16.mxu1 %v1585_v21  ;;  %1179 = vmatprep.mubr.bf16.mxu1 %v1656_v51  ;;  %v1635_v58 = vld [vmem:[%s2282_s1 + $0x1a0] ss:$8 sps:$4 sm:$0xff]   ;;  %v1639_v59 = vld [vmem:[%s2282_s1 + $0x194] ss:$8 sps:$4 sm:$0xff]   ;;  %v1638_v60 = vld [vmem:[%s2282_s1 + $0x90] ss:$8 sps:$4 sm:$0xff]  }
  0x20   : > { %v1642_v61 = vld [vmem:[%s2282_s1 + $0x84] ss:$8 sps:$4 sm:$0xff]   ;;  %v1641_v62 = vld [vmem:[%s2282_s1 + $0x190] ss:$8 sps:$4 sm:$0xff]   ;;  %v1644_v0 = vld [vmem:[%s2282_s1 + $0x80] ss:$8 sps:$4 sm:$0xff]  }
  0x21   : > { %1115 = vmatpush1.bf16.msra.mxu0 %v1584_v22  ;;  %v1645_v63 = vld [vmem:[%s2282_s1 + $0x184] ss:$8 sps:$4 sm:$0xff]   ;;  %v1653_v1 = vld [vmem:[%s2282_s1 + $0x274] ss:$8 sps:$4 sm:$0xff]   ;;  %v1650_v2 = vld [vmem:[%s2282_s1 + $0x180] ss:$8 sps:$4 sm:$0xff]  }
  0x22   : > { %1116 = vmatprep.subr.bf16.mxu0 %v1588_v23  ;;  %1158 = vmatpush1.bf16.msra.mxu1 %v1587_v24  ;;  %v1647_v3 = vld [vmem:[%s1960_s30] ss:$36 sps:$4 sm:$0xff]   ;;  %v1659_v4 = vld [vmem:[%s2282_s1 + $0x374] ss:$8 sps:$4 sm:$0xff]   ;;  %v1651_v5 = vld [vmem:[%s2282_s1 + $0x270] ss:$8 sps:$4 sm:$0xff]  }
  0x23   : > { %1159 = vmatprep.subr.bf16.mxu1 %v1591_v25  ;;  %v1654_v6 = vld [vmem:[%s1960_s30 + $0x8] ss:$36 sps:$4 sm:$0xff]   ;;  %v1657_v8 = vld [vmem:[%s2282_s1 + $0x370] ss:$8 sps:$4 sm:$0xff]   ;;  %v1668_v11 = vld [vmem:[%s2282_s1 + $0x254] ss:$8 sps:$4 sm:$0xff]  }
  0x24   : > { %v1662_v7 = vld [vmem:[%s2282_s1 + $0x264] ss:$8 sps:$4 sm:$0xff]   ;;  %v1660_v10 = vld [vmem:[%s2282_s1 + $0x260] ss:$8 sps:$4 sm:$0xff]   ;;  %v1671_v13 = vld [vmem:[%s2282_s1 + $0x354] ss:$8 sps:$4 sm:$0xff]  }
  0x25   : > { %1117 = vmatpush1.bf16.msra.mxu0 %v1590_v26  ;;  %v1665_v9 = vld [vmem:[%s2282_s1 + $0x364] ss:$8 sps:$4 sm:$0xff]   ;;  %v1663_v12 = vld [vmem:[%s2282_s1 + $0x360] ss:$8 sps:$4 sm:$0xff]   ;;  %v1666_v14 = vld [vmem:[%s2282_s1 + $0x250] ss:$8 sps:$4 sm:$0xff]  }
  0x26   : > { %1118 = vmatprep.subr.bf16.mxu0 %v1594_v27  ;;  %1160 = vmatpush1.bf16.msra.mxu1 %v1593_v28  ;;  %v1674_v15 = vld [vmem:[%s2282_s1 + $0x244] ss:$8 sps:$4 sm:$0xff]   ;;  %v1669_v16 = vld [vmem:[%s2282_s1 + $0x350] ss:$8 sps:$4 sm:$0xff]   ;;  %v1672_v18 = vld [vmem:[%s2282_s1 + $0x240] ss:$8 sps:$4 sm:$0xff]  }
  0x27   : > { %1161 = vmatprep.subr.bf16.mxu1 %v1597_v29  ;;  %v1677_v17 = vld [vmem:[%s2282_s1 + $0x344] ss:$8 sps:$4 sm:$0xff]   ;;  %v1680_v19 = vld [vmem:[%s2282_s1 + $0x234] ss:$8 sps:$4 sm:$0xff]   ;;  %v1675_v20 = vld [vmem:[%s2282_s1 + $0x340] ss:$8 sps:$4 sm:$0xff]  }
  0x28   : > { %v1683_v21 = vld [vmem:[%s2282_s1 + $0x334] ss:$8 sps:$4 sm:$0xff]   ;;  %v1678_v22 = vld [vmem:[%s2282_s1 + $0x230] ss:$8 sps:$4 sm:$0xff]   ;;  %v1686_v23 = vld [vmem:[%s2282_s1 + $0x224] ss:$8 sps:$4 sm:$0xff]  }
  0x29   : > { %1119 = vmatpush1.bf16.msra.mxu0 %v1596_v30  ;;  %v1681_v24 = vld [vmem:[%s2282_s1 + $0x330] ss:$8 sps:$4 sm:$0xff]   ;;  %v1689_v25 = vld [vmem:[%s2282_s1 + $0x324] ss:$8 sps:$4 sm:$0xff]   ;;  %v1684_v26 = vld [vmem:[%s2282_s1 + $0x220] ss:$8 sps:$4 sm:$0xff]  }
  0x2a   : > { %1120 = vmatprep.subr.bf16.mxu0 %v1600_v31  ;;  %1162 = vmatpush1.bf16.msra.mxu1 %v1599_v32  ;;  %v1692_v27 = vld [vmem:[%s2282_s1 + $0x214] ss:$8 sps:$4 sm:$0xff]   ;;  %v1687_v28 = vld [vmem:[%s2282_s1 + $0x320] ss:$8 sps:$4 sm:$0xff]   ;;  %v1690_v30 = vld [vmem:[%s2282_s1 + $0x210] ss:$8 sps:$4 sm:$0xff]  }
  0x2b   : > { %1163 = vmatprep.subr.bf16.mxu1 %v1603_v33  ;;  %v1695_v29 = vld [vmem:[%s2282_s1 + $0x314] ss:$8 sps:$4 sm:$0xff]   ;;  %v1693_v31 = vld [vmem:[%s2282_s1 + $0x310] ss:$8 sps:$4 sm:$0xff]   ;;  %v1698_v32 = vld [vmem:[%s2282_s1 + $0x204] ss:$8 sps:$4 sm:$0xff]  }
  0x2c   : > { %v1752_v33 = vld [vmem:[%s1960_s30 + $0x14] ss:$36 sps:$4 sm:$0xff]   ;;  %v1725_v51 = vld [vmem:[%s2282_s1 + $0x3c4] ss:$8 sps:$4 sm:$0xff]  }
  0x2d   : > { %1121 = vmatpush2.bf16.msra.mxu0 %v1602_v34  ;;  %v1701_v34 = vld [vmem:[%s2282_s1 + $0x304] ss:$8 sps:$4 sm:$0xff]   ;;  %v1719_v47 = vld [vmem:[%s2282_s1 + $0x3d4] ss:$8 sps:$4 sm:$0xff]  }
  0x2e   : > { %1122 = vmatprep.subr.bf16.mxu0 %v1606_v35  ;;  %1164 = vmatpush2.bf16.msra.mxu1 %v1605_v36  ;;  %v1696_v35 = vld [vmem:[%s2282_s1 + $0x200] ss:$8 sps:$4 sm:$0xff]  }
  0x2f   : > { %1165 = vmatprep.subr.bf16.mxu1 %v1609_v37  ;;  %v1758_v36 = vld [vmem:[%s1960_s30 + $0x1c] ss:$36 sps:$4 sm:$0xff]  }
  0x30   : > { %v1704_v37 = vld [vmem:[%s2282_s1 + $0x2f4] ss:$8 sps:$4 sm:$0xff]  }
  0x31   : > { %1123 = vmatpush2.bf16.msra.mxu0 %v1608_v38  ;;  %v1699_v38 = vld [vmem:[%s2282_s1 + $0x300] ss:$8 sps:$4 sm:$0xff]  }
  0x32   : > { %1124 = vmatprep.subr.bf16.mxu0 %v1612_v39  ;;  %1166 = vmatpush2.bf16.msra.mxu1 %v1611_v40  ;;  %v1707_v39 = vld [vmem:[%s2282_s1 + $0x3f4] ss:$8 sps:$4 sm:$0xff]   ;;  %v1702_v40 = vld [vmem:[%s2282_s1 + $0x2f0] ss:$8 sps:$4 sm:$0xff]  }
  0x33   : > { %1167 = vmatprep.subr.bf16.mxu1 %v1615_v41  ;;  %v1710_v41 = vld [vmem:[%s2282_s1 + $0x2e4] ss:$8 sps:$4 sm:$0xff]  }
  0x35   : > { %1125 = vmatpush2.bf16.msra.mxu0 %v1614_v42  ;;  %v1705_v42 = vld [vmem:[%s2282_s1 + $0x3f0] ss:$8 sps:$4 sm:$0xff]  }
  0x36   : > { %1126 = vmatprep.subr.bf16.mxu0 %v1618_v43  ;;  %1168 = vmatpush2.bf16.msra.mxu1 %v1617_v44  ;;  %v1713_v43 = vld [vmem:[%s2282_s1 + $0x3e4] ss:$8 sps:$4 sm:$0xff]   ;;  %v1708_v44 = vld [vmem:[%s2282_s1 + $0x2e0] ss:$8 sps:$4 sm:$0xff]  }
  0x37   : > { %1169 = vmatprep.subr.bf16.mxu1 %v1621_v45  ;;  %v1716_v45 = vld [vmem:[%s2282_s1 + $0x2d4] ss:$8 sps:$4 sm:$0xff]  }
  0x39   : > { %1127 = vmatpush2.bf16.msra.mxu0 %v1620_v46  ;;  %v1711_v46 = vld [vmem:[%s2282_s1 + $0x3e0] ss:$8 sps:$4 sm:$0xff]  }
  0x3a   : > { %1128 = vmatprep.subr.bf16.mxu0 %v1624_v48  ;;  %1170 = vmatpush2.bf16.msra.mxu1 %v1623_v49  ;;  %v1714_v48 = vld [vmem:[%s2282_s1 + $0x2d0] ss:$8 sps:$4 sm:$0xff]   ;;  %v1722_v49 = vld [vmem:[%s2282_s1 + $0x2c4] ss:$8 sps:$4 sm:$0xff]  }
  0x3b   : > { %1171 = vmatprep.subr.bf16.mxu1 %v1627_v50  ;;  %v1717_v50 = vld [vmem:[%s2282_s1 + $0x3d0] ss:$8 sps:$4 sm:$0xff]  }
  0x3d   : > { %1129 = vmatpush2.bf16.msra.mxu0 %v1626_v52  ;;  %v1720_v52 = vld [vmem:[%s2282_s1 + $0x2c0] ss:$8 sps:$4 sm:$0xff]  }
  0x3e   : > { %1130 = vmatprep.subr.bf16.mxu0 %v1630_v53  ;;  %1172 = vmatpush2.bf16.msra.mxu1 %v1629_v54  ;;  %v1728_v53 = vld [vmem:[%s2282_s1 + $0x2b4] ss:$8 sps:$4 sm:$0xff]   ;;  %v1723_v54 = vld [vmem:[%s2282_s1 + $0x3c0] ss:$8 sps:$4 sm:$0xff]  }
  0x3f   : > { %1173 = vmatprep.subr.bf16.mxu1 %v1633_v55  ;;  %v1731_v55 = vld [vmem:[%s2282_s1 + $0x3b4] ss:$8 sps:$4 sm:$0xff]  }
  0x41   : > { %1131 = vmatpush2.bf16.msra.mxu0 %v1632_v56  ;;  %v1726_v56 = vld [vmem:[%s2282_s1 + $0x2b0] ss:$8 sps:$4 sm:$0xff]  }
  0x42   : > { %1132 = vmatprep.subr.bf16.mxu0 %v1636_v57  ;;  %1174 = vmatpush2.bf16.msra.mxu1 %v1635_v58  ;;  %v1734_v57 = vld [vmem:[%s2282_s1 + $0x2a4] ss:$8 sps:$4 sm:$0xff]   ;;  %v1729_v58 = vld [vmem:[%s2282_s1 + $0x3b0] ss:$8 sps:$4 sm:$0xff]  }
  0x43   : > { %1175 = vmatprep.subr.bf16.mxu1 %v1639_v59  ;;  %v1737_v59 = vld [vmem:[%s2282_s1 + $0x3a4] ss:$8 sps:$4 sm:$0xff]  }
  0x45   : > { %1133 = vmatpush2.bf16.msra.mxu0 %v1638_v60  ;;  %v1732_v60 = vld [vmem:[%s2282_s1 + $0x2a0] ss:$8 sps:$4 sm:$0xff]  }
  0x46   : > { %1134 = vmatprep.subr.bf16.mxu0 %v1642_v61  ;;  %1176 = vmatpush2.bf16.msra.mxu1 %v1641_v62  ;;  %v1740_v61 = vld [vmem:[%s2282_s1 + $0x294] ss:$8 sps:$4 sm:$0xff]   ;;  %v1735_v62 = vld [vmem:[%s2282_s1 + $0x3a0] ss:$8 sps:$4 sm:$0xff]  }
  0x47   : > { %1177 = vmatprep.subr.bf16.mxu1 %v1645_v63  ;;  %v1743_v63 = vld [vmem:[%s2282_s1 + $0x394] ss:$8 sps:$4 sm:$0xff]  }
  0x49   : > { %1135 = vmatpush2.bf16.msra.mxu0 %v1644_v0  ;;  %v1738_v0 = vld [vmem:[%s2282_s1 + $0x290] ss:$8 sps:$4 sm:$0xff]  }
  0x4a   : > { %1190 = vmatprep.subr.bf16.mxu0 %v1653_v1  ;;  %1178 = vmatpush2.bf16.msra.mxu1 %v1650_v2  ;;  %v1746_v1 = vld [vmem:[%s2282_s1 + $0x284] ss:$8 sps:$4 sm:$0xff]   ;;  %v1741_v2 = vld [vmem:[%s2282_s1 + $0x390] ss:$8 sps:$4 sm:$0xff]  }
  0x4b   : > { %1233 = vmatprep.subr.bf16.mxu1 %v1659_v4  ;;  %v1744_v4 = vld [vmem:[%s2282_s1 + $0x280] ss:$8 sps:$4 sm:$0xff]  }
  0x4c   : > { %1137 = vmatmul.mubr.bf16.vlgmr.msra.gmra.mxu0 %v1647_v3  ;;  %v1749_v3 = vld [vmem:[%s2282_s1 + $0x384] ss:$8 sps:$4 sm:$0xff]  }
  0x4d   : > { %1191 = vmatpush1.bf16.msra.mxu0 %v1651_v5  ;;  %1180 = vmatmul.mubr.bf16.vlgmr.msra.gmra.mxu1 %v1654_v6  ;;  %v1755_v5 = vld [vmem:[%s2282_s1 + $0x474] ss:$8 sps:$4 sm:$0xff]   ;;  %v1747_v6 = vld [vmem:[%s2282_s1 + $0x380] ss:$8 sps:$4 sm:$0xff]  }
  0x4e   : > { %1192 = vmatprep.subr.bf16.mxu0 %v1662_v7  ;;  %1234 = vmatpush1.bf16.msra.mxu1 %v1657_v8  ;;  %v1750_v7 = vld [vmem:[%s1960_s30 + $0x10] ss:$36 sps:$4 sm:$0xff]  }
  0x4f   : > { %1235 = vmatprep.subr.bf16.mxu1 %v1665_v9  ;;  %1222 = vmatprep.mubr.bf16.mxu0 %v1752_v33  ;;  %v1753_v8 = vld [vmem:[%s2282_s1 + $0x470] ss:$8 sps:$4 sm:$0xff]  }
  0x50   : > { %1265 = vmatprep.mubr.bf16.mxu1 %v1758_v36  ;;  %v1756_v9 = vld [vmem:[%s1960_s30 + $0x18] ss:$36 sps:$4 sm:$0xff]  }
  0x51   : > { %1193 = vmatpush1.bf16.msra.mxu0 %v1660_v10  ;;  %v1761_v10 = vld [vmem:[%s2282_s1 + $0x464] ss:$8 sps:$4 sm:$0xff]  }
  0x52   : > { %1194 = vmatprep.subr.bf16.mxu0 %v1668_v11  ;;  %1236 = vmatpush1.bf16.msra.mxu1 %v1663_v12  ;;  %v1759_v11 = vld [vmem:[%s2282_s1 + $0x460] ss:$8 sps:$4 sm:$0xff]   ;;  %v1789_v12 = vmov 0  }
  0x53   : > { %1237 = vmatprep.subr.bf16.mxu1 %v1671_v13  ;;  %v1764_v13 = vld [vmem:[%s2282_s1 + $0x454] ss:$8 sps:$4 sm:$0xff]  }
  0x55   : > { %1195 = vmatpush1.bf16.msra.mxu0 %v1666_v14  ;;  %v1762_v14 = vld [vmem:[%s2282_s1 + $0x450] ss:$8 sps:$4 sm:$0xff]  }
  0x56   : > { %1196 = vmatprep.subr.bf16.mxu0 %v1674_v15  ;;  %1238 = vmatpush1.bf16.msra.mxu1 %v1669_v16  ;;  %v1767_v15 = vld [vmem:[%s2282_s1 + $0x444] ss:$8 sps:$4 sm:$0xff]   ;;  %v1765_v16 = vld [vmem:[%s2282_s1 + $0x440] ss:$8 sps:$4 sm:$0xff]  }
  0x57   : > { %1239 = vmatprep.subr.bf16.mxu1 %v1677_v17  ;;  %v1770_v17 = vld [vmem:[%s2282_s1 + $0x434] ss:$8 sps:$4 sm:$0xff]  }
  0x59   : > { %1197 = vmatpush1.bf16.msra.mxu0 %v1672_v18  ;;  %v1768_v18 = vld [vmem:[%s2282_s1 + $0x430] ss:$8 sps:$4 sm:$0xff]  }
  0x5a   : > { %1198 = vmatprep.subr.bf16.mxu0 %v1680_v19  ;;  %1240 = vmatpush1.bf16.msra.mxu1 %v1675_v20  ;;  %v1773_v19 = vld [vmem:[%s2282_s1 + $0x424] ss:$8 sps:$4 sm:$0xff]   ;;  %v1771_v20 = vld [vmem:[%s2282_s1 + $0x420] ss:$8 sps:$4 sm:$0xff]  }
  0x5b   : > { %1241 = vmatprep.subr.bf16.mxu1 %v1683_v21  ;;  %v1776_v21 = vld [vmem:[%s2282_s1 + $0x414] ss:$8 sps:$4 sm:$0xff]  }
  0x5d   : > { %1199 = vmatpush1.bf16.msra.mxu0 %v1678_v22  ;;  %v1774_v22 = vld [vmem:[%s2282_s1 + $0x410] ss:$8 sps:$4 sm:$0xff]  }
  0x5e   : > { %1200 = vmatprep.subr.bf16.mxu0 %v1686_v23  ;;  %1242 = vmatpush1.bf16.msra.mxu1 %v1681_v24  ;;  %v1779_v23 = vld [vmem:[%s2282_s1 + $0x404] ss:$8 sps:$4 sm:$0xff]   ;;  %v1777_v24 = vld [vmem:[%s2282_s1 + $0x400] ss:$8 sps:$4 sm:$0xff]  }
  0x5f   : > { %1243 = vmatprep.subr.bf16.mxu1 %v1689_v25  ;;  %v1780_v25 = vld [vmem:[%s1960_s30 + $0x20] ss:$36 sps:$4 sm:$0xff]   ;;  %s1541_s30 = sshll.u32 %s2286_s13, 5 }
  0x60   : > { %s170_s18 = scalar_lea.vmem %s2284_s3, %s1541_s30 }
  0x61   : > { %1201 = vmatpush1.bf16.msra.mxu0 %v1684_v26 }
  0x62   : > { %1202 = vmatprep.subr.bf16.mxu0 %v1692_v27  ;;  %1244 = vmatpush1.bf16.msra.mxu1 %v1687_v28  ;;  %v328_v27 = vlaneseq }
  0x63   : > { %1245 = vmatprep.subr.bf16.mxu1 %v1695_v29 }
  0x65   : > { %1203 = vmatpush1.bf16.msra.mxu0 %v1690_v30  ;;  %v329_v30 = vshrl.u32 %v328_v27, 7 }
  0x66   : > { %1204 = vmatprep.subr.bf16.mxu0 %v1698_v32  ;;  %1246 = vmatpush1.bf16.msra.mxu1 %v1693_v31 }
  0x67   : > { %1247 = vmatprep.subr.bf16.mxu1 %v1701_v34  ;;  %v330_v33 = vsub.s32 0, %v329_v30  ;;  %v326_v34 = vld [vmem:[%s2283_s2] sm:$0x3] }
  0x69   : > { %1205 = vmatpush1.bf16.msra.mxu0 %v1696_v35  ;;  %v334_v35 = vsub.s32 1, %v329_v30 }
  0x6a   : > { %1206 = vmatprep.subr.bf16.mxu0 %v1704_v37  ;;  %1248 = vmatpush1.bf16.msra.mxu1 %v1699_v38  ;;  %v331_v38 = vrot.slane %v326_v34, %v330_v33 }
  0x6b   : > { %1249 = vmatprep.subr.bf16.mxu1 %v1707_v39 }
  0x6d   : > { %1207 = vmatpush2.bf16.msra.mxu0 %v1702_v40  ;;  %v335_v40 = vrot.slane %v326_v34, %v334_v35 }
  0x6e   : > { %1208 = vmatprep.subr.bf16.mxu0 %v1710_v41  ;;  %1250 = vmatpush2.bf16.msra.mxu1 %v1705_v42 }
  0x6f   : > { %1251 = vmatprep.subr.bf16.mxu1 %v1713_v43 }
  0x71   : > { %1209 = vmatpush2.bf16.msra.mxu0 %v1708_v44 }
  0x72   : > { %1210 = vmatprep.subr.bf16.mxu0 %v1716_v45  ;;  %1252 = vmatpush2.bf16.msra.mxu1 %v1711_v46 }
  0x73   : > { %1253 = vmatprep.subr.bf16.mxu1 %v1719_v47 }
  0x75   : > { %1211 = vmatpush2.bf16.msra.mxu0 %v1714_v48 }
  0x76   : > { %1212 = vmatprep.subr.bf16.mxu0 %v1722_v49  ;;  %1254 = vmatpush2.bf16.msra.mxu1 %v1717_v50 }
  0x77   : > { %1255 = vmatprep.subr.bf16.mxu1 %v1725_v51 }
  0x79   : > { %1213 = vmatpush2.bf16.msra.mxu0 %v1720_v52 }
  0x7a   : > { %1214 = vmatprep.subr.bf16.mxu0 %v1728_v53  ;;  %1256 = vmatpush2.bf16.msra.mxu1 %v1723_v54 }
  0x7b   : > { %1257 = vmatprep.subr.bf16.mxu1 %v1731_v55 }
  0x7d   : > { %1215 = vmatpush2.bf16.msra.mxu0 %v1726_v56 }
  0x7e   : > { %1216 = vmatprep.subr.bf16.mxu0 %v1734_v57  ;;  %1258 = vmatpush2.bf16.msra.mxu1 %v1729_v58 }
  0x7f   : > { %1259 = vmatprep.subr.bf16.mxu1 %v1737_v59 }
  0x81   : > { %1217 = vmatpush2.bf16.msra.mxu0 %v1732_v60 }
  0x82   : > { %1218 = vmatprep.subr.bf16.mxu0 %v1740_v61  ;;  %1260 = vmatpush2.bf16.msra.mxu1 %v1735_v62 }
  0x83   : > { %1261 = vmatprep.subr.bf16.mxu1 %v1743_v63 }
  0x85   : > { %1219 = vmatpush2.bf16.msra.mxu0 %v1738_v0 }
  0x86   : > { %1220 = vmatprep.subr.bf16.mxu0 %v1746_v1  ;;  %1262 = vmatpush2.bf16.msra.mxu1 %v1741_v2 }
  0x87   : > { %1263 = vmatprep.subr.bf16.mxu1 %v1749_v3 }
  0x89   : > { %1221 = vmatpush2.bf16.msra.mxu0 %v1744_v4 }
  0x8a   : > { %1276 = vmatprep.subr.bf16.mxu0 %v1755_v5  ;;  %1264 = vmatpush2.bf16.msra.mxu1 %v1747_v6 }
  0x8c   : > { %1223 = vmatmul.mubr.bf16.vlgmr.msra.gmra.mxu0 %v1750_v7 }
  0x8d   : > { %1277 = vmatpush1.bf16.msra.mxu0 %v1753_v8  ;;  %1308 = vmatprep.mubr.bf16.mxu0 %v1789_v12 }
  0x8e   : > { %1266 = vmatmul.mubr.bf16.vlgmr.msra.gmra.mxu1 %v1756_v9  ;;  %1278 = vmatprep.subr.bf16.mxu0 %v1761_v10 }
  0x91   : > { %1279 = vmatpush1.bf16.msra.mxu0 %v1759_v11 }
  0x92   : > { %1280 = vmatprep.subr.bf16.mxu0 %v1764_v13 }
  0x95   : > { %1281 = vmatpush1.bf16.msra.mxu0 %v1762_v14 }
  0x96   : > { %1282 = vmatprep.subr.bf16.mxu0 %v1767_v15 }
  0x99   : > { %1283 = vmatpush1.bf16.msra.mxu0 %v1765_v16 }
  0x9a   : > { %1284 = vmatprep.subr.bf16.mxu0 %v1770_v17 }
  0x9d   : > { %1285 = vmatpush1.bf16.msra.mxu0 %v1768_v18 }
  0x9e   : > { %1286 = vmatprep.subr.bf16.mxu0 %v1773_v19 }
  0xa1   : > { %1287 = vmatpush1.bf16.msra.mxu0 %v1771_v20 }
  0xa2   : > { %1288 = vmatprep.subr.bf16.mxu0 %v1776_v21 }
  0xa5   : > { %1289 = vmatpush1.bf16.msra.mxu0 %v1774_v22 }
  0xa6   : > { %1290 = vmatprep.subr.bf16.mxu0 %v1779_v23 }
  0xa9   : > { %1291 = vmatpush1.bf16.msra.mxu0 %v1777_v24 }
  0xac   : > { %1309 = vmatmul.mubr.bf16.vlgmr.msra.gmra.mxu0 %v1780_v25 }
 0x10c   : > { %v1138_v26 = vpop.f32.mrf.mxu0 }
 0x10d   : > { %v1181_v29 = vpop.f32.mrf.mxu1  ;;  %v1139_v42 = vadd.f32 %v1138_v26, %v331_v38 }
 0x10e   : > { %v1140_v28 = vpop.f32.mrf.mxu0 }
 0x10f   : > { %v1183_v32 = vpop.f32.mrf.mxu1  ;;  %v1141_v45 = vadd.f32 %v1140_v28, %v335_v40  ;;  %v1182_v46 = vadd.f32 %v1181_v29, %v1139_v42 }
 0x110   : > { %v1142_v31 = vpop.f32.mrf.mxu0 }
 0x111   : > { %v1185_v37 = vpop.f32.mrf.mxu1  ;;  %v1143_v47 = vadd.f32 %v1142_v31, %v331_v38  ;;  %v1184_v50 = vadd.f32 %v1183_v32, %v1141_v45 }
 0x112   : > { %v1144_v36 = vpop.f32.mrf.mxu0 }
 0x113   : > { %v1187_v41 = vpop.f32.mrf.mxu1  ;;  %v1145_v51 = vadd.f32 %v1144_v36, %v335_v40  ;;  %v1186_v53 = vadd.f32 %v1185_v37, %v1143_v47 }
 0x115   : > { %v1188_v57 = vadd.f32 %v1187_v41, %v1145_v51 }
 0x14c   : > { %v1224_v39 = vpop.f32.mrf.mxu0 }
 0x14d   : > { %v1225_v52 = vadd.f32 %v1224_v39, %v1182_v46 }
 0x14e   : > { %v1226_v43 = vpop.f32.mrf.mxu0  ;;  %v1267_v44 = vpop.f32.mrf.mxu1 }
 0x14f   : > { %v1227_v54 = vadd.f32 %v1226_v43, %v1184_v50  ;;  %v1268_v58 = vadd.f32 %v1267_v44, %v1225_v52 }
 0x150   : > { %v1228_v48 = vpop.f32.mrf.mxu0  ;;  %v1269_v49 = vpop.f32.mrf.mxu1 }
 0x151   : > { %v1229_v59 = vadd.f32 %v1228_v48, %v1186_v53  ;;  %v1270_v61 = vadd.f32 %v1269_v49, %v1227_v54 }
 0x152   : > { %v1230_v55 = vpop.f32.mrf.mxu0  ;;  %v1271_v56 = vpop.f32.mrf.mxu1 }
 0x153   : > { %v1231_v62 = vadd.f32 %v1230_v55, %v1188_v57  ;;  %v1272_v2 = vadd.f32 %v1271_v56, %v1229_v59 }
 0x154   : > { %v1273_v0 = vpop.f32.mrf.mxu1 }
 0x155   : > { %v1274_v5 = vadd.f32 %v1273_v0, %v1231_v62 }
 0x16c   : > { %v1310_v60 = vpop.f32.mrf.mxu0 }
 0x16d   : > { %v1311_v63 = vadd.f32 %v1310_v60, %v1268_v58 }
 0x16e   : > { %v1312_v1 = vpop.f32.mrf.mxu0 }
 0x16f   : > { %1319 = vst [vmem:[%s170_s18] sm:$0xff] %v1311_v63  ;;  %v1313_v3 = vadd.f32 %v1312_v1, %v1270_v61 }
 0x170   : > { %v1314_v4 = vpop.f32.mrf.mxu0 }
 0x171   : > { %1320 = vst [vmem:[%s170_s18 + $0x8] sm:$0xff] %v1313_v3  ;;  %v1315_v6 = vadd.f32 %v1314_v4, %v1272_v2 }
 0x172   : > { %v1316_v7 = vpop.f32.mrf.mxu0 }
 0x173   : > { %1321 = vst [vmem:[%s170_s18 + $0x10] sm:$0xff] %v1315_v6  ;;  %v1317_v8 = vadd.f32 %v1316_v7, %v1274_v5 }
 0x175   : > { %1322 = vst [vmem:[%s170_s18 + $0x18] sm:$0xff] %v1317_v8 }
 0x176 PF: > { %s13_s12 = sadd.s32 1, %s1787_s12  }
 0x177   : > { %p10_p4 = scmp.ge.s32.totalorder %s13_s12, 4  }
 0x179   :  { %12 = sbr.rel (!%p10_p4) target bundleno = 1 (0x1), region = 62 }

// kernel: alexnet_forward.4
= control target key start
LH: loop header
LB: loop body
LE: loop exit
PB: predicated region body
PF: predicated region fallthrough
CT: control target
= control target key end

     0   :  { %s4687_s15 = smov 0   ;;  %s5632_s0 = inlined_call_operand.vmem [shape: bf16[2,64,3200], index: 0, kind: input, shape index: {}]   ;;  %s5633_s1 = inlined_call_operand.vmem [shape: bf16[3200,128], index: 1, kind: input, shape index: {}]   ;;  %s5634_s2 = inlined_call_operand.vmem [shape: f32[1,128], index: 2, kind: input, shape index: {}]   ;;  %s5635_s3 = inlined_call_operand.vmem [shape: f32[2,64,128], index: 3, kind: output, shape index: {0}]   ;;  %s5636_s4 = inlined_call_operand.vmem [shape: f32[2,35,128], index: 4, kind: output, shape index: {1}]  }
   0x1 LB: > { %s3451_s16 = sadd.s32 4294967295, %s4660_s15   ;;  %p3455_p0 = scmp.ge.s32.totalorder %s4660_s15, 1  ;;  %s4660_s15 = sphi %s4687_s15, %s15_s15  }
   0x2   : > { %p165_p1 = scmp.lt.s32.totalorder %s4660_s15, 3 }
   0x4   : > { %p166_p2 = pnand %p3455_p0, %p165_p1 }
   0x6   : > { %169 = sbr.rel (%p166_p2) target bundleno = 490 (0x1ea), region = 32 }
   0xb   : > { %v4306_v0 = vld [vmem:[%s5633_s1 + $0x78] sm:$0xff]   ;;  %v4310_v4 = vld [vmem:[%s5633_s1 + $0x70] sm:$0xff]   ;;  %v4314_v8 = vld [vmem:[%s5633_s1 + $0x68] sm:$0xff]   ;;  %p196_p3 = scmp.lt.s32.totalorder %s3451_s16, 1 }
   0xc   : > { %v4307_v1 = vld [vmem:[%s5633_s1 + $0xf8] sm:$0xff]   ;;  %3764 = vmatprep.subr.bf16.mxu0 %v4306_v0  ;;  %v4311_v5 = vld [vmem:[%s5633_s1 + $0xf0] sm:$0xff]   ;;  %v4315_v9 = vld [vmem:[%s5633_s1 + $0xe8] sm:$0xff]  }
   0xd   : > { %v4308_v2 = vld [vmem:[%s5633_s1 + $0x38] sm:$0xff]   ;;  %3804 = vmatprep.subr.bf16.mxu1 %v4307_v1  ;;  %v4312_v6 = vld [vmem:[%s5633_s1 + $0x30] sm:$0xff]   ;;  %v4316_v10 = vld [vmem:[%s5633_s1 + $0x28] sm:$0xff]   ;;  %s5666_s16 = smov (!%p196_p3, %s3451_s16), 1 }
   0xe   : > { %v4309_v3 = vld [vmem:[%s5633_s1 + $0xb8] sm:$0xff]   ;;  %3765 = vmatpush3.bf16.msra.mxu0 %v4308_v2  ;;  %v4313_v7 = vld [vmem:[%s5633_s1 + $0xb0] sm:$0xff]   ;;  %v4317_v11 = vld [vmem:[%s5633_s1 + $0xa8] sm:$0xff]   ;;  %s4296_s21 = smul.u32 800, %s5666_s16 }
   0xf   : > { %3805 = vmatpush3.bf16.msra.mxu1 %v4309_v3  ;;  %3766 = vmatprep.subr.bf16.mxu0 %v4310_v4  ;;  %v4318_v12 = vld [vmem:[%s5633_s1 + $0x60] sm:$0xff]   ;;  %v4322_v16 = vld [vmem:[%s5633_s1 + $0x58] sm:$0xff]   ;;  %v4326_v20 = vld [vmem:[%s5633_s1 + $0x50] sm:$0xff]   ;;  %s4297_s7 = smul.u32 40, %s5666_s16 }
  0x10   : > { %3806 = vmatprep.subr.bf16.mxu1 %v4311_v5  ;;  %v4319_v13 = vld [vmem:[%s5633_s1 + $0xe0] sm:$0xff]   ;;  %v4323_v17 = vld [vmem:[%s5633_s1 + $0xd8] sm:$0xff]   ;;  %v4327_v21 = vld [vmem:[%s5633_s1 + $0xd0] sm:$0xff]   ;;  %s4795_s6 = scalar_lea.vmem %s5632_s0, %s4296_s21 }
  0x11   : > { %v4320_v14 = vld [vmem:[%s5633_s1 + $0x20] sm:$0xff]   ;;  %v4324_v18 = vld [vmem:[%s5633_s1 + $0x18] sm:$0xff]   ;;  %v4328_v22 = vld [vmem:[%s5633_s1 + $0x10] sm:$0xff]   ;;  %s210_s10 = scalar_lea.vmem %s5636_s4, %s4297_s7 }
  0x12   : > { %3767 = vmatpush3.bf16.msra.mxu0 %v4312_v6  ;;  %v4321_v15 = vld [vmem:[%s5633_s1 + $0xa0] sm:$0xff]   ;;  %v4325_v19 = vld [vmem:[%s5633_s1 + $0x98] sm:$0xff]   ;;  %v4329_v23 = vld [vmem:[%s5633_s1 + $0x90] sm:$0xff]  }
  0x13   : > { %3807 = vmatpush3.bf16.msra.mxu1 %v4313_v7  ;;  %3768 = vmatprep.subr.bf16.mxu0 %v4314_v8  ;;  %v4330_v24 = vld [vmem:[%s5633_s1 + $0x48] sm:$0xff]   ;;  %v4334_v28 = vld [vmem:[%s5633_s1 + $0x40] sm:$0xff]   ;;  %v4344_v36 = vld [vmem:[%s5633_s1 + $0x178] sm:$0xff]  }
  0x14   : > { %3808 = vmatprep.subr.bf16.mxu1 %v4315_v9  ;;  %v4331_v25 = vld [vmem:[%s5633_s1 + $0xc8] sm:$0xff]   ;;  %v4335_v29 = vld [vmem:[%s5633_s1 + $0xc0] sm:$0xff]   ;;  %v4345_v37 = vld [vmem:[%s5633_s1 + $0x1f8] sm:$0xff]  }
  0x15   : > { %v4332_v26 = vld [vmem:[%s5633_s1 + $0x8] sm:$0xff]   ;;  %v4336_v30 = vld [vmem:[%s5633_s1] sm:$0xff]   ;;  %v4346_v38 = vld [vmem:[%s5633_s1 + $0x138] sm:$0xff]  }
  0x16   : > { %3769 = vmatpush3.bf16.msra.mxu0 %v4316_v10  ;;  %v4333_v27 = vld [vmem:[%s5633_s1 + $0x88] sm:$0xff]   ;;  %v4337_v31 = vld [vmem:[%s5633_s1 + $0x80] sm:$0xff]   ;;  %v4347_v39 = vld [vmem:[%s5633_s1 + $0x1b8] sm:$0xff]  }
  0x17   : > { %3809 = vmatpush3.bf16.msra.mxu1 %v4317_v11  ;;  %3770 = vmatprep.subr.bf16.mxu0 %v4318_v12  ;;  %v4338_v32 = vld [vmem:[%s4795_s6] ss:$100 sps:$4 sm:$0xff]   ;;  %v4341_v34 = vld [vmem:[%s4795_s6 + $0x8] ss:$100 sps:$4 sm:$0xff]   ;;  %v4348_v40 = vld [vmem:[%s5633_s1 + $0x170] sm:$0xff]  }
  0x18   : > { %3810 = vmatprep.subr.bf16.mxu1 %v4319_v13  ;;  %v4340_v33 = vld [vmem:[%s4795_s6 + $0x4] ss:$100 sps:$4 sm:$0xff]   ;;  %v4343_v35 = vld [vmem:[%s4795_s6 + $0xc] ss:$100 sps:$4 sm:$0xff]   ;;  %v4354_v45 = vld [vmem:[%s4795_s6 + $0xd4] ss:$100 sps:$4 sm:$0xff]  }
  0x19   : > { %2459 = vmatprep.mubr.bf16.mxu0 %v4340_v33  ;;  %2524 = vmatprep.mubr.bf16.mxu1 %v4343_v35  ;;  %v4349_v41 = vld [vmem:[%s5633_s1 + $0x1f0] sm:$0xff]   ;;  %v4356_v46 = vld [vmem:[%s4795_s6 + $0xc8] ss:$100 sps:$4 sm:$0xff]   ;;  %v4362_v52 = vld [vmem:[%s5633_s1 + $0x160] sm:$0xff]  }
  0x1a   : > { %3771 = vmatpush3.bf16.msra.mxu0 %v4320_v14  ;;  %v4350_v42 = vld [vmem:[%s5633_s1 + $0x130] sm:$0xff]   ;;  %v4358_v48 = vld [vmem:[%s5633_s1 + $0x168] sm:$0xff]   ;;  %v4363_v53 = vld [vmem:[%s5633_s1 + $0x1e0] sm:$0xff]  }
  0x1b   : > { %3811 = vmatpush3.bf16.msra.mxu1 %v4321_v15  ;;  %3772 = vmatprep.subr.bf16.mxu0 %v4322_v16  ;;  %v4351_v43 = vld [vmem:[%s5633_s1 + $0x1b0] sm:$0xff]   ;;  %v4359_v49 = vld [vmem:[%s5633_s1 + $0x1e8] sm:$0xff]   ;;  %v4364_v54 = vld [vmem:[%s5633_s1 + $0x120] sm:$0xff]  }
  0x1c   : > { %3812 = vmatprep.subr.bf16.mxu1 %v4323_v17  ;;  %v4352_v44 = vld [vmem:[%s4795_s6 + $0xcc] ss:$100 sps:$4 sm:$0xff]   ;;  %v4365_v55 = vld [vmem:[%s5633_s1 + $0x1a0] sm:$0xff]   ;;  %v4366_v56 = vld [vmem:[%s4795_s6 + $0x194] ss:$100 sps:$4 sm:$0xff]  }
  0x1d   : > { %v4357_v47 = vld [vmem:[%s4795_s6 + $0xd0] ss:$100 sps:$4 sm:$0xff]   ;;  %v4360_v50 = vld [vmem:[%s5633_s1 + $0x128] sm:$0xff]   ;;  %v4368_v57 = vld [vmem:[%s4795_s6 + $0x19c] ss:$100 sps:$4 sm:$0xff]  }
  0x1e   : > { %3773 = vmatpush3.bf16.msra.mxu0 %v4324_v18  ;;  %v4361_v51 = vld [vmem:[%s5633_s1 + $0x1a8] sm:$0xff]   ;;  %v4370_v58 = vld [vmem:[%s4795_s6 + $0x190] ss:$100 sps:$4 sm:$0xff]   ;;  %v4371_v59 = vld [vmem:[%s4795_s6 + $0x198] ss:$100 sps:$4 sm:$0xff]  }
  0x1f   : > { %3813 = vmatpush3.bf16.msra.mxu1 %v4325_v19  ;;  %3774 = vmatprep.subr.bf16.mxu0 %v4326_v20  ;;  %v4372_v60 = vld [vmem:[%s5633_s1 + $0x158] sm:$0xff]   ;;  %v4376_v0 = vld [vmem:[%s5633_s1 + $0x150] sm:$0xff]   ;;  %v4382_v5 = vld [vmem:[%s4795_s6 + $0x264] ss:$100 sps:$4 sm:$0xff]  }
  0x20   : > { %3814 = vmatprep.subr.bf16.mxu1 %v4327_v21  ;;  %v4373_v61 = vld [vmem:[%s5633_s1 + $0x1d8] sm:$0xff]   ;;  %v4377_v1 = vld [vmem:[%s5633_s1 + $0x1d0] sm:$0xff]   ;;  %v4385_v7 = vld [vmem:[%s4795_s6 + $0x260] ss:$100 sps:$4 sm:$0xff]  }
  0x21   : > { %v4374_v62 = vld [vmem:[%s5633_s1 + $0x118] sm:$0xff]   ;;  %v4378_v2 = vld [vmem:[%s5633_s1 + $0x110] sm:$0xff]   ;;  %v4386_v8 = vld [vmem:[%s5633_s1 + $0x148] sm:$0xff]  }
  0x22   : > { %3775 = vmatpush3.bf16.msra.mxu0 %v4328_v22  ;;  %v4375_v63 = vld [vmem:[%s5633_s1 + $0x198] sm:$0xff]   ;;  %v4379_v3 = vld [vmem:[%s5633_s1 + $0x190] sm:$0xff]   ;;  %v4387_v9 = vld [vmem:[%s5633_s1 + $0x1c8] sm:$0xff]  }
  0x23   : > { %3815 = vmatpush3.bf16.msra.mxu1 %v4329_v23  ;;  %3776 = vmatprep.subr.bf16.mxu0 %v4330_v24  ;;  %v4380_v4 = vld [vmem:[%s4795_s6 + $0x25c] ss:$100 sps:$4 sm:$0xff]   ;;  %v4388_v10 = vld [vmem:[%s5633_s1 + $0x108] sm:$0xff]   ;;  %v4394_v16 = vld [vmem:[%s4795_s6 + $0x10] ss:$100 sps:$4 sm:$0xff]  }
  0x24   : > { %3816 = vmatprep.subr.bf16.mxu1 %v4331_v25  ;;  %v4384_v6 = vld [vmem:[%s4795_s6 + $0x258] ss:$100 sps:$4 sm:$0xff]   ;;  %v4389_v11 = vld [vmem:[%s5633_s1 + $0x188] sm:$0xff]   ;;  %v4390_v12 = vld [vmem:[%s5633_s1 + $0x140] sm:$0xff]  }
  0x25   : > { %v4391_v13 = vld [vmem:[%s5633_s1 + $0x1c0] sm:$0xff]   ;;  %v4396_v17 = vld [vmem:[%s4795_s6 + $0x14] ss:$100 sps:$4 sm:$0xff]   ;;  %v4415_v33 = vld [vmem:[%s5633_s1 + $0x2e8] sm:$0xff]  }
  0x26   : > { %3777 = vmatpush3.bf16.msra.mxu0 %v4332_v26  ;;  %v4392_v14 = vld [vmem:[%s5633_s1 + $0x100] sm:$0xff]   ;;  %v4397_v18 = vld [vmem:[%s4795_s6 + $0x18] ss:$100 sps:$4 sm:$0xff]   ;;  %v4404_v24 = vld [vmem:[%s5633_s1 + $0x270] sm:$0xff]  }
  0x27   : > { %3817 = vmatpush3.bf16.msra.mxu1 %v4333_v27  ;;  %3778 = vmatprep.subr.bf16.mxu0 %v4334_v28  ;;  %v4393_v15 = vld [vmem:[%s5633_s1 + $0x180] sm:$0xff]   ;;  %v4400_v20 = vld [vmem:[%s5633_s1 + $0x278] sm:$0xff]   ;;  %v4405_v25 = vld [vmem:[%s5633_s1 + $0x2f0] sm:$0xff]  }
  0x28   : > { %3818 = vmatprep.subr.bf16.mxu1 %v4335_v29  ;;  %v4399_v19 = vld [vmem:[%s4795_s6 + $0x1c] ss:$100 sps:$4 sm:$0xff]   ;;  %v4406_v26 = vld [vmem:[%s5633_s1 + $0x230] sm:$0xff]   ;;  %v4410_v29 = vld [vmem:[%s4795_s6 + $0xe4] ss:$100 sps:$4 sm:$0xff]  }
  0x29   : > { %v4401_v21 = vld [vmem:[%s5633_s1 + $0x2f8] sm:$0xff]   ;;  %v4407_v27 = vld [vmem:[%s5633_s1 + $0x2b0] sm:$0xff]   ;;  %v4417_v35 = vld [vmem:[%s5633_s1 + $0x2a8] sm:$0xff]  }
  0x2a   : > { %3779 = vmatpush3.bf16.msra.mxu0 %v4336_v30  ;;  %v4402_v22 = vld [vmem:[%s5633_s1 + $0x238] sm:$0xff]  }
  0x2b   : > { %3819 = vmatpush3.bf16.msra.mxu1 %v4337_v31  ;;  %3844 = vmatprep.subr.bf16.mxu0 %v4344_v36  ;;  %v4403_v23 = vld [vmem:[%s5633_s1 + $0x2b8] sm:$0xff]   ;;  %v4413_v31 = vld [vmem:[%s4795_s6 + $0xe0] ss:$100 sps:$4 sm:$0xff]  }
  0x2c   : > { %3884 = vmatprep.subr.bf16.mxu1 %v4345_v37  ;;  %v4408_v28 = vld [vmem:[%s4795_s6 + $0xdc] ss:$100 sps:$4 sm:$0xff]  }
  0x2d   : > { %2460 = vmatmul.mubr.bf16.vlgmr.msra.gmra.mxu0 %v4338_v32  ;;  %v4412_v30 = vld [vmem:[%s4795_s6 + $0xd8] ss:$100 sps:$4 sm:$0xff]   ;;  %v4414_v32 = vld [vmem:[%s5633_s1 + $0x268] sm:$0xff]   ;;  %v4418_v36 = vld [vmem:[%s5633_s1 + $0x260] sm:$0xff]  }
  0x2e   : > { %2525 = vmatmul.mubr.bf16.vlgmr.msra.gmra.mxu1 %v4341_v34  ;;  %3845 = vmatpush3.bf16.msra.mxu0 %v4346_v38  ;;  %v4416_v34 = vld [vmem:[%s5633_s1 + $0x228] sm:$0xff]   ;;  %v4419_v37 = vld [vmem:[%s5633_s1 + $0x2e0] sm:$0xff]  }
  0x2f   : > { %3885 = vmatpush3.bf16.msra.mxu1 %v4347_v39  ;;  %3846 = vmatprep.subr.bf16.mxu0 %v4348_v40  ;;  %v4420_v38 = vld [vmem:[%s5633_s1 + $0x220] sm:$0xff]  }
  0x30   : > { %3886 = vmatprep.subr.bf16.mxu1 %v4349_v41  ;;  %2467 = vmatprep.mubr.bf16.mxu0 %v4352_v44  ;;  %v4421_v39 = vld [vmem:[%s5633_s1 + $0x2a0] sm:$0xff]   ;;  %v4424_v41 = vld [vmem:[%s4795_s6 + $0x1ac] ss:$100 sps:$4 sm:$0xff]   ;;  %v4428_v44 = vld [vmem:[%s5633_s1 + $0x258] sm:$0xff]  }
  0x31   : > { %2532 = vmatprep.mubr.bf16.mxu1 %v4354_v45  ;;  %v4422_v40 = vld [vmem:[%s4795_s6 + $0x1a4] ss:$100 sps:$4 sm:$0xff]   ;;  %v4429_v45 = vld [vmem:[%s5633_s1 + $0x2d8] sm:$0xff]  }
  0x32   : > { %3847 = vmatpush3.bf16.msra.mxu0 %v4350_v42  ;;  %v4426_v42 = vld [vmem:[%s4795_s6 + $0x1a0] ss:$100 sps:$4 sm:$0xff]  }
  0x33   : > { %3887 = vmatpush3.bf16.msra.mxu1 %v4351_v43  ;;  %3848 = vmatprep.subr.bf16.mxu0 %v4358_v48  ;;  %v4427_v43 = vld [vmem:[%s4795_s6 + $0x1a8] ss:$100 sps:$4 sm:$0xff]   ;;  %v4432_v48 = vld [vmem:[%s5633_s1 + $0x250] sm:$0xff]  }
  0x34   : > { %3888 = vmatprep.subr.bf16.mxu1 %v4359_v49  ;;  %v4433_v49 = vld [vmem:[%s5633_s1 + $0x2d0] sm:$0xff]  }
  0x35   : > { %2468 = vmatmul.mubr.bf16.gmra.mxu0 %v4356_v46  ;;  %v4430_v46 = vld [vmem:[%s5633_s1 + $0x218] sm:$0xff]  }
  0x36   : > { %2533 = vmatmul.mubr.bf16.gmra.mxu1 %v4357_v47  ;;  %3849 = vmatpush3.bf16.msra.mxu0 %v4360_v50  ;;  %v4431_v47 = vld [vmem:[%s5633_s1 + $0x298] sm:$0xff]   ;;  %v4434_v50 = vld [vmem:[%s5633_s1 + $0x210] sm:$0xff]  }
  0x37   : > { %3889 = vmatpush3.bf16.msra.mxu1 %v4361_v51  ;;  %3850 = vmatprep.subr.bf16.mxu0 %v4362_v52  ;;  %v4435_v51 = vld [vmem:[%s5633_s1 + $0x290] sm:$0xff]  }
  0x38   : > { %3890 = vmatprep.subr.bf16.mxu1 %v4363_v53  ;;  %2475 = vmatprep.mubr.bf16.mxu0 %v4366_v56  ;;  %v4436_v52 = vld [vmem:[%s4795_s6 + $0x26c] ss:$100 sps:$4 sm:$0xff]   ;;  %v4438_v53 = vld [vmem:[%s4795_s6 + $0x274] ss:$100 sps:$4 sm:$0xff]  }
  0x39   : > { %2540 = vmatprep.mubr.bf16.mxu1 %v4368_v57  ;;  %v4442_v56 = vld [vmem:[%s5633_s1 + $0x248] sm:$0xff]  }
  0x3a   : > { %3851 = vmatpush3.bf16.msra.mxu0 %v4364_v54  ;;  %v4440_v54 = vld [vmem:[%s4795_s6 + $0x268] ss:$100 sps:$4 sm:$0xff]  }
  0x3b   : > { %3891 = vmatpush3.bf16.msra.mxu1 %v4365_v55  ;;  %3852 = vmatprep.subr.bf16.mxu0 %v4372_v60  ;;  %v4441_v55 = vld [vmem:[%s4795_s6 + $0x270] ss:$100 sps:$4 sm:$0xff]   ;;  %v4443_v57 = vld [vmem:[%s5633_s1 + $0x2c8] sm:$0xff]   ;;  %v4446_v60 = vld [vmem:[%s5633_s1 + $0x240] sm:$0xff]  }
  0x3c   : > { %3892 = vmatprep.subr.bf16.mxu1 %v4373_v61  ;;  %v4447_v61 = vld [vmem:[%s5633_s1 + $0x2c0] sm:$0xff]  }
  0x3d   : > { %2476 = vmatmul.mubr.bf16.gmra.mxu0 %v4370_v58  ;;  %v4444_v58 = vld [vmem:[%s5633_s1 + $0x208] sm:$0xff]  }
  0x3e   : > { %2541 = vmatmul.mubr.bf16.gmra.mxu1 %v4371_v59  ;;  %3853 = vmatpush3.bf16.msra.mxu0 %v4374_v62  ;;  %v4445_v59 = vld [vmem:[%s5633_s1 + $0x288] sm:$0xff]   ;;  %v4448_v62 = vld [vmem:[%s5633_s1 + $0x200] sm:$0xff]  }
  0x3f   : > { %3893 = vmatpush3.bf16.msra.mxu1 %v4375_v63  ;;  %3854 = vmatprep.subr.bf16.mxu0 %v4376_v0  ;;  %v4449_v63 = vld [vmem:[%s5633_s1 + $0x280] sm:$0xff]  }
  0x40   : > { %3894 = vmatprep.subr.bf16.mxu1 %v4377_v1  ;;  %2483 = vmatprep.mubr.bf16.mxu0 %v4380_v4  ;;  %v4450_v0 = vld [vmem:[%s4795_s6 + $0x20] ss:$100 sps:$4 sm:$0xff]   ;;  %v4456_v4 = vld [vmem:[%s5633_s1 + $0x378] sm:$0xff]  }
  0x41   : > { %2548 = vmatprep.mubr.bf16.mxu1 %v4382_v5  ;;  %v4452_v1 = vld [vmem:[%s4795_s6 + $0x24] ss:$100 sps:$4 sm:$0xff]   ;;  %v4457_v5 = vld [vmem:[%s5633_s1 + $0x3f8] sm:$0xff]  }
  0x42   : > { %3855 = vmatpush3.bf16.msra.mxu0 %v4378_v2  ;;  %v4453_v2 = vld [vmem:[%s4795_s6 + $0x28] ss:$100 sps:$4 sm:$0xff]  }
  0x43   : > { %3895 = vmatpush3.bf16.msra.mxu1 %v4379_v3  ;;  %3856 = vmatprep.subr.bf16.mxu0 %v4386_v8  ;;  %v4455_v3 = vld [vmem:[%s4795_s6 + $0x2c] ss:$100 sps:$4 sm:$0xff]  }
  0x44   : > { %3896 = vmatprep.subr.bf16.mxu1 %v4387_v9  ;;  %v4460_v8 = vld [vmem:[%s5633_s1 + $0x370] sm:$0xff]  }
  0x45   : > { %2484 = vmatmul.mubr.bf16.gmra.mxu0 %v4384_v6  ;;  %v4458_v6 = vld [vmem:[%s5633_s1 + $0x338] sm:$0xff]   ;;  %v4461_v9 = vld [vmem:[%s5633_s1 + $0x3f0] sm:$0xff]  }
  0x46   : > { %2549 = vmatmul.mubr.bf16.gmra.mxu1 %v4385_v7  ;;  %3857 = vmatpush3.bf16.msra.mxu0 %v4388_v10  ;;  %v4459_v7 = vld [vmem:[%s5633_s1 + $0x3b8] sm:$0xff]   ;;  %v4462_v10 = vld [vmem:[%s5633_s1 + $0x330] sm:$0xff]  }
  0x47   : > { %3897 = vmatpush3.bf16.msra.mxu1 %v4389_v11  ;;  %3858 = vmatprep.subr.bf16.mxu0 %v4390_v12  ;;  %v4463_v11 = vld [vmem:[%s5633_s1 + $0x3b0] sm:$0xff]  }
  0x48   : > { %3898 = vmatprep.subr.bf16.mxu1 %v4391_v13  ;;  %2589 = vmatprep.mubr.bf16.mxu0 %v4396_v17  ;;  %v4464_v12 = vld [vmem:[%s4795_s6 + $0xec] ss:$100 sps:$4 sm:$0xff]   ;;  %v4466_v13 = vld [vmem:[%s4795_s6 + $0xf4] ss:$100 sps:$4 sm:$0xff]  }
  0x49   : > { %2654 = vmatprep.mubr.bf16.mxu1 %v4399_v19  ;;  %v4471_v17 = vld [vmem:[%s5633_s1 + $0x3e8] sm:$0xff]  }
  0x4a   : > { %3859 = vmatpush3.bf16.msra.mxu0 %v4392_v14  ;;  %v4468_v14 = vld [vmem:[%s4795_s6 + $0xe8] ss:$100 sps:$4 sm:$0xff]  }
  0x4b   : > { %3899 = vmatpush3.bf16.msra.mxu1 %v4393_v15  ;;  %3924 = vmatprep.subr.bf16.mxu0 %v4400_v20  ;;  %v4469_v15 = vld [vmem:[%s4795_s6 + $0xf0] ss:$100 sps:$4 sm:$0xff]   ;;  %v4473_v19 = vld [vmem:[%s5633_s1 + $0x3a8] sm:$0xff]   ;;  %v4474_v20 = vld [vmem:[%s5633_s1 + $0x360] sm:$0xff]  }
  0x4c   : > { %3964 = vmatprep.subr.bf16.mxu1 %v4401_v21  ;;  %v4475_v21 = vld [vmem:[%s5633_s1 + $0x3e0] sm:$0xff]  }
  0x4d   : > { %2590 = vmatmul.mubr.bf16.vlgmr.msra.gmra.mxu0 %v4394_v16  ;;  %v4470_v16 = vld [vmem:[%s5633_s1 + $0x368] sm:$0xff]  }
  0x4e   : > { %2655 = vmatmul.mubr.bf16.vlgmr.msra.gmra.mxu1 %v4397_v18  ;;  %3925 = vmatpush3.bf16.msra.mxu0 %v4402_v22  ;;  %v4472_v18 = vld [vmem:[%s5633_s1 + $0x328] sm:$0xff]   ;;  %v4476_v22 = vld [vmem:[%s5633_s1 + $0x320] sm:$0xff]  }
  0x4f   : > { %3965 = vmatpush3.bf16.msra.mxu1 %v4403_v23  ;;  %3926 = vmatprep.subr.bf16.mxu0 %v4404_v24  ;;  %v4477_v23 = vld [vmem:[%s5633_s1 + $0x3a0] sm:$0xff]   ;;  %v4478_v24 = vld [vmem:[%s4795_s6 + $0x1b4] ss:$100 sps:$4 sm:$0xff]  }
  0x50   : > { %3966 = vmatprep.subr.bf16.mxu1 %v4405_v25  ;;  %2597 = vmatprep.mubr.bf16.mxu0 %v4408_v28  ;;  %v4480_v25 = vld [vmem:[%s4795_s6 + $0x1bc] ss:$100 sps:$4 sm:$0xff]  }
  0x51   : > { %2662 = vmatprep.mubr.bf16.mxu1 %v4410_v29  ;;  %v4484_v28 = vld [vmem:[%s5633_s1 + $0x358] sm:$0xff]  }
  0x52   : > { %3927 = vmatpush3.bf16.msra.mxu0 %v4406_v26  ;;  %v4482_v26 = vld [vmem:[%s4795_s6 + $0x1b0] ss:$100 sps:$4 sm:$0xff]   ;;  %v4485_v29 = vld [vmem:[%s5633_s1 + $0x3d8] sm:$0xff]  }
  0x53   : > { %3967 = vmatpush3.bf16.msra.mxu1 %v4407_v27  ;;  %3928 = vmatprep.subr.bf16.mxu0 %v4414_v32  ;;  %v4483_v27 = vld [vmem:[%s4795_s6 + $0x1b8] ss:$100 sps:$4 sm:$0xff]   ;;  %v4488_v32 = vld [vmem:[%s5633_s1 + $0x350] sm:$0xff]  }
  0x54   : > { %3968 = vmatprep.subr.bf16.mxu1 %v4415_v33  ;;  %v4489_v33 = vld [vmem:[%s5633_s1 + $0x3d0] sm:$0xff]  }
  0x55   : > { %2598 = vmatmul.mubr.bf16.gmra.mxu0 %v4412_v30  ;;  %v4486_v30 = vld [vmem:[%s5633_s1 + $0x318] sm:$0xff]  }
  0x56   : > { %2663 = vmatmul.mubr.bf16.gmra.mxu1 %v4413_v31  ;;  %3929 = vmatpush3.bf16.msra.mxu0 %v4416_v34  ;;  %v4487_v31 = vld [vmem:[%s5633_s1 + $0x398] sm:$0xff]   ;;  %v4490_v34 = vld [vmem:[%s5633_s1 + $0x310] sm:$0xff]  }
  0x57   : > { %3969 = vmatpush3.bf16.msra.mxu1 %v4417_v35  ;;  %3930 = vmatprep.subr.bf16.mxu0 %v4418_v36  ;;  %v4491_v35 = vld [vmem:[%s5633_s1 + $0x390] sm:$0xff]   ;;  %v4492_v36 = vld [vmem:[%s4795_s6 + $0x27c] ss:$100 sps:$4 sm:$0xff]  }
  0x58   : > { %3970 = vmatprep.subr.bf16.mxu1 %v4419_v37  ;;  %2605 = vmatprep.mubr.bf16.mxu0 %v4422_v40  ;;  %v4494_v37 = vld [vmem:[%s4795_s6 + $0x284] ss:$100 sps:$4 sm:$0xff]  }
  0x59   : > { %2670 = vmatprep.mubr.bf16.mxu1 %v4424_v41  ;;  %v4498_v40 = vld [vmem:[%s5633_s1 + $0x348] sm:$0xff]  }
  0x5a   : > { %3931 = vmatpush3.bf16.msra.mxu0 %v4420_v38  ;;  %v4496_v38 = vld [vmem:[%s4795_s6 + $0x278] ss:$100 sps:$4 sm:$0xff]   ;;  %v4499_v41 = vld [vmem:[%s5633_s1 + $0x3c8] sm:$0xff]  }
  0x5b   : > { %3971 = vmatpush3.bf16.msra.mxu1 %v4421_v39  ;;  %3932 = vmatprep.subr.bf16.mxu0 %v4428_v44  ;;  %v4497_v39 = vld [vmem:[%s4795_s6 + $0x280] ss:$100 sps:$4 sm:$0xff]  }
  0x5c   : > { %3972 = vmatprep.subr.bf16.mxu1 %v4429_v45  ;;  %v4502_v44 = vld [vmem:[%s5633_s1 + $0x340] sm:$0xff]  }
  0x5d   : > { %2606 = vmatmul.mubr.bf16.gmra.mxu0 %v4426_v42  ;;  %v4500_v42 = vld [vmem:[%s5633_s1 + $0x308] sm:$0xff]   ;;  %v4503_v45 = vld [vmem:[%s5633_s1 + $0x3c0] sm:$0xff]  }
  0x5e   : > { %2671 = vmatmul.mubr.bf16.gmra.mxu1 %v4427_v43  ;;  %3933 = vmatpush3.bf16.msra.mxu0 %v4430_v46  ;;  %v4501_v43 = vld [vmem:[%s5633_s1 + $0x388] sm:$0xff]   ;;  %v4504_v46 = vld [vmem:[%s5633_s1 + $0x300] sm:$0xff]  }
  0x5f   : > { %3973 = vmatpush3.bf16.msra.mxu1 %v4431_v47  ;;  %3934 = vmatprep.subr.bf16.mxu0 %v4432_v48  ;;  %v4505_v47 = vld [vmem:[%s5633_s1 + $0x380] sm:$0xff]   ;;  %v4506_v48 = vld [vmem:[%s4795_s6 + $0x30] ss:$100 sps:$4 sm:$0xff]  }
  0x60   : > { %3974 = vmatprep.subr.bf16.mxu1 %v4433_v49  ;;  %2613 = vmatprep.mubr.bf16.mxu0 %v4436_v52  ;;  %v4508_v49 = vld [vmem:[%s4795_s6 + $0x34] ss:$100 sps:$4 sm:$0xff]  }
  0x61   : > { %2678 = vmatprep.mubr.bf16.mxu1 %v4438_v53  ;;  %v4512_v52 = vld [vmem:[%s5633_s1 + $0x478] sm:$0xff]  }
  0x62   : > { %3935 = vmatpush3.bf16.msra.mxu0 %v4434_v50  ;;  %v4509_v50 = vld [vmem:[%s4795_s6 + $0x38] ss:$100 sps:$4 sm:$0xff]  }
  0x63   : > { %3975 = vmatpush3.bf16.msra.mxu1 %v4435_v51  ;;  %3936 = vmatprep.subr.bf16.mxu0 %v4442_v56  ;;  %v4511_v51 = vld [vmem:[%s4795_s6 + $0x3c] ss:$100 sps:$4 sm:$0xff]   ;;  %v4516_v56 = vld [vmem:[%s5633_s1 + $0x470] sm:$0xff]  }
  0x64   : > { %3976 = vmatprep.subr.bf16.mxu1 %v4443_v57  ;;  %v4513_v53 = vld [vmem:[%s5633_s1 + $0x4f8] sm:$0xff]   ;;  %v4517_v57 = vld [vmem:[%s5633_s1 + $0x4f0] sm:$0xff]  }
  0x65   : > { %2614 = vmatmul.mubr.bf16.gmra.mxu0 %v4440_v54  ;;  %v4514_v54 = vld [vmem:[%s5633_s1 + $0x438] sm:$0xff]  }
  0x66   : > { %2679 = vmatmul.mubr.bf16.gmra.mxu1 %v4441_v55  ;;  %3937 = vmatpush3.bf16.msra.mxu0 %v4444_v58  ;;  %v4515_v55 = vld [vmem:[%s5633_s1 + $0x4b8] sm:$0xff]   ;;  %v4518_v58 = vld [vmem:[%s5633_s1 + $0x430] sm:$0xff]  }
  0x67   : > { %3977 = vmatpush3.bf16.msra.mxu1 %v4445_v59  ;;  %3938 = vmatprep.subr.bf16.mxu0 %v4446_v60  ;;  %v4519_v59 = vld [vmem:[%s5633_s1 + $0x4b0] sm:$0xff]   ;;  %v4520_v60 = vld [vmem:[%s4795_s6 + $0xfc] ss:$100 sps:$4 sm:$0xff]  }
  0x68   : > { %3978 = vmatprep.subr.bf16.mxu1 %v4447_v61  ;;  %2719 = vmatprep.mubr.bf16.mxu0 %v4452_v1  ;;  %v4522_v61 = vld [vmem:[%s4795_s6 + $0x104] ss:$100 sps:$4 sm:$0xff]  }
  0x69   : > { %2784 = vmatprep.mubr.bf16.mxu1 %v4455_v3  ;;  %v4527_v1 = vld [vmem:[%s5633_s1 + $0x4e8] sm:$0xff]  }
  0x6a   : > { %3939 = vmatpush3.bf16.msra.mxu0 %v4448_v62  ;;  %v4524_v62 = vld [vmem:[%s4795_s6 + $0xf8] ss:$100 sps:$4 sm:$0xff]   ;;  %v4529_v3 = vld [vmem:[%s5633_s1 + $0x4a8] sm:$0xff]  }
  0x6b   : > { %3979 = vmatpush3.bf16.msra.mxu1 %v4449_v63  ;;  %4004 = vmatprep.subr.bf16.mxu0 %v4456_v4  ;;  %v4525_v63 = vld [vmem:[%s4795_s6 + $0x100] ss:$100 sps:$4 sm:$0xff]  }
  0x6c   : > { %4044 = vmatprep.subr.bf16.mxu1 %v4457_v5  ;;  %v4530_v4 = vld [vmem:[%s5633_s1 + $0x460] sm:$0xff]  }
  0x6d   : > { %2720 = vmatmul.mubr.bf16.vlgmr.msra.gmra.mxu0 %v4450_v0  ;;  %v4526_v0 = vld [vmem:[%s5633_s1 + $0x468] sm:$0xff]   ;;  %v4531_v5 = vld [vmem:[%s5633_s1 + $0x4e0] sm:$0xff]  }
  0x6e   : > { %2785 = vmatmul.mubr.bf16.vlgmr.msra.gmra.mxu1 %v4453_v2  ;;  %4005 = vmatpush3.bf16.msra.mxu0 %v4458_v6  ;;  %v4528_v2 = vld [vmem:[%s5633_s1 + $0x428] sm:$0xff]   ;;  %v4532_v6 = vld [vmem:[%s5633_s1 + $0x420] sm:$0xff]  }
  0x6f   : > { %4045 = vmatpush3.bf16.msra.mxu1 %v4459_v7  ;;  %4006 = vmatprep.subr.bf16.mxu0 %v4460_v8  ;;  %v4533_v7 = vld [vmem:[%s5633_s1 + $0x4a0] sm:$0xff]  }
  0x70   : > { %4046 = vmatprep.subr.bf16.mxu1 %v4461_v9  ;;  %2727 = vmatprep.mubr.bf16.mxu0 %v4464_v12  ;;  %v4534_v8 = vld [vmem:[%s4795_s6 + $0x1c4] ss:$100 sps:$4 sm:$0xff]   ;;  %v4536_v9 = vld [vmem:[%s4795_s6 + $0x1cc] ss:$100 sps:$4 sm:$0xff]   ;;  %v4540_v12 = vld [vmem:[%s5633_s1 + $0x458] sm:$0xff]  }
  0x71   : > { %2792 = vmatprep.mubr.bf16.mxu1 %v4466_v13  ;;  %v4541_v13 = vld [vmem:[%s5633_s1 + $0x4d8] sm:$0xff]  }
  0x72   : > { %4007 = vmatpush3.bf16.msra.mxu0 %v4462_v10  ;;  %v4538_v10 = vld [vmem:[%s4795_s6 + $0x1c0] ss:$100 sps:$4 sm:$0xff]  }
  0x73   : > { %4047 = vmatpush3.bf16.msra.mxu1 %v4463_v11  ;;  %4008 = vmatprep.subr.bf16.mxu0 %v4470_v16  ;;  %v4539_v11 = vld [vmem:[%s4795_s6 + $0x1c8] ss:$100 sps:$4 sm:$0xff]   ;;  %v4544_v16 = vld [vmem:[%s5633_s1 + $0x450] sm:$0xff]  }
  0x74   : > { %4048 = vmatprep.subr.bf16.mxu1 %v4471_v17  ;;  %v4545_v17 = vld [vmem:[%s5633_s1 + $0x4d0] sm:$0xff]  }
  0x75   : > { %2728 = vmatmul.mubr.bf16.gmra.mxu0 %v4468_v14  ;;  %v4542_v14 = vld [vmem:[%s5633_s1 + $0x418] sm:$0xff]  }
  0x76   : > { %2793 = vmatmul.mubr.bf16.gmra.mxu1 %v4469_v15  ;;  %4009 = vmatpush3.bf16.msra.mxu0 %v4472_v18  ;;  %v4543_v15 = vld [vmem:[%s5633_s1 + $0x498] sm:$0xff]   ;;  %v4546_v18 = vld [vmem:[%s5633_s1 + $0x410] sm:$0xff]  }
  0x77   : > { %4049 = vmatpush3.bf16.msra.mxu1 %v4473_v19  ;;  %4010 = vmatprep.subr.bf16.mxu0 %v4474_v20  ;;  %v4547_v19 = vld [vmem:[%s5633_s1 + $0x490] sm:$0xff]  }
  0x78   : > { %4050 = vmatprep.subr.bf16.mxu1 %v4475_v21  ;;  %2735 = vmatprep.mubr.bf16.mxu0 %v4478_v24  ;;  %v4548_v20 = vld [vmem:[%s4795_s6 + $0x28c] ss:$100 sps:$4 sm:$0xff]   ;;  %v4550_v21 = vld [vmem:[%s4795_s6 + $0x294] ss:$100 sps:$4 sm:$0xff]  }
  0x79   : > { %2800 = vmatprep.mubr.bf16.mxu1 %v4480_v25  ;;  %v4554_v24 = vld [vmem:[%s5633_s1 + $0x448] sm:$0xff]  }
  0x7a   : > { %4011 = vmatpush3.bf16.msra.mxu0 %v4476_v22  ;;  %v4552_v22 = vld [vmem:[%s4795_s6 + $0x288] ss:$100 sps:$4 sm:$0xff]  }
  0x7b   : > { %4051 = vmatpush3.bf16.msra.mxu1 %v4477_v23  ;;  %4012 = vmatprep.subr.bf16.mxu0 %v4484_v28  ;;  %v4553_v23 = vld [vmem:[%s4795_s6 + $0x290] ss:$100 sps:$4 sm:$0xff]   ;;  %v4555_v25 = vld [vmem:[%s5633_s1 + $0x4c8] sm:$0xff]   ;;  %v4558_v28 = vld [vmem:[%s5633_s1 + $0x440] sm:$0xff]  }
  0x7c   : > { %4052 = vmatprep.subr.bf16.mxu1 %v4485_v29  ;;  %v4559_v29 = vld [vmem:[%s5633_s1 + $0x4c0] sm:$0xff]  }
  0x7d   : > { %2736 = vmatmul.mubr.bf16.gmra.mxu0 %v4482_v26  ;;  %v4556_v26 = vld [vmem:[%s5633_s1 + $0x408] sm:$0xff]  }
  0x7e   : > { %2801 = vmatmul.mubr.bf16.gmra.mxu1 %v4483_v27  ;;  %4013 = vmatpush3.bf16.msra.mxu0 %v4486_v30  ;;  %v4557_v27 = vld [vmem:[%s5633_s1 + $0x488] sm:$0xff]   ;;  %v4560_v30 = vld [vmem:[%s5633_s1 + $0x400] sm:$0xff]  }
  0x7f   : > { %4053 = vmatpush3.bf16.msra.mxu1 %v4487_v31  ;;  %4014 = vmatprep.subr.bf16.mxu0 %v4488_v32  ;;  %v4561_v31 = vld [vmem:[%s5633_s1 + $0x480] sm:$0xff]  }
  0x80   : > { %4054 = vmatprep.subr.bf16.mxu1 %v4489_v33  ;;  %2743 = vmatprep.mubr.bf16.mxu0 %v4492_v36  ;;  %v4562_v32 = vld [vmem:[%s4795_s6 + $0x40] ss:$100 sps:$4 sm:$0xff]   ;;  %v4568_v36 = vld [vmem:[%s5633_s1 + $0x578] sm:$0xff]  }
  0x81   : > { %2808 = vmatprep.mubr.bf16.mxu1 %v4494_v37  ;;  %v4564_v33 = vld [vmem:[%s4795_s6 + $0x44] ss:$100 sps:$4 sm:$0xff]   ;;  %v4569_v37 = vld [vmem:[%s5633_s1 + $0x5f8] sm:$0xff]  }
  0x82   : > { %4015 = vmatpush3.bf16.msra.mxu0 %v4490_v34  ;;  %v4565_v34 = vld [vmem:[%s4795_s6 + $0x48] ss:$100 sps:$4 sm:$0xff]  }
  0x83   : > { %4055 = vmatpush3.bf16.msra.mxu1 %v4491_v35  ;;  %4016 = vmatprep.subr.bf16.mxu0 %v4498_v40  ;;  %v4567_v35 = vld [vmem:[%s4795_s6 + $0x4c] ss:$100 sps:$4 sm:$0xff]  }
  0x84   : > { %4056 = vmatprep.subr.bf16.mxu1 %v4499_v41  ;;  %v4572_v40 = vld [vmem:[%s5633_s1 + $0x570] sm:$0xff]  }
  0x85   : > { %2744 = vmatmul.mubr.bf16.gmra.mxu0 %v4496_v38  ;;  %v4570_v38 = vld [vmem:[%s5633_s1 + $0x538] sm:$0xff]   ;;  %v4573_v41 = vld [vmem:[%s5633_s1 + $0x5f0] sm:$0xff]  }
  0x86   : > { %2809 = vmatmul.mubr.bf16.gmra.mxu1 %v4497_v39  ;;  %4017 = vmatpush3.bf16.msra.mxu0 %v4500_v42  ;;  %v4571_v39 = vld [vmem:[%s5633_s1 + $0x5b8] sm:$0xff]   ;;  %v4574_v42 = vld [vmem:[%s5633_s1 + $0x530] sm:$0xff]  }
  0x87   : > { %4057 = vmatpush3.bf16.msra.mxu1 %v4501_v43  ;;  %4018 = vmatprep.subr.bf16.mxu0 %v4502_v44  ;;  %v4575_v43 = vld [vmem:[%s5633_s1 + $0x5b0] sm:$0xff]  }
  0x88   : > { %4058 = vmatprep.subr.bf16.mxu1 %v4503_v45  ;;  %2849 = vmatprep.mubr.bf16.mxu0 %v4508_v49  ;;  %v4576_v44 = vld [vmem:[%s4795_s6 + $0x10c] ss:$100 sps:$4 sm:$0xff]   ;;  %v4578_v45 = vld [vmem:[%s4795_s6 + $0x114] ss:$100 sps:$4 sm:$0xff]  }
  0x89   : > { %2914 = vmatprep.mubr.bf16.mxu1 %v4511_v51  ;;  %v4583_v49 = vld [vmem:[%s5633_s1 + $0x5e8] sm:$0xff]  }
  0x8a   : > { %4019 = vmatpush3.bf16.msra.mxu0 %v4504_v46  ;;  %v4580_v46 = vld [vmem:[%s4795_s6 + $0x108] ss:$100 sps:$4 sm:$0xff]  }
  0x8b   : > { %4059 = vmatpush3.bf16.msra.mxu1 %v4505_v47  ;;  %4084 = vmatprep.subr.bf16.mxu0 %v4512_v52  ;;  %v4581_v47 = vld [vmem:[%s4795_s6 + $0x110] ss:$100 sps:$4 sm:$0xff]   ;;  %v4585_v51 = vld [vmem:[%s5633_s1 + $0x5a8] sm:$0xff]   ;;  %v4586_v52 = vld [vmem:[%s5633_s1 + $0x560] sm:$0xff]  }
  0x8c   : > { %4124 = vmatprep.subr.bf16.mxu1 %v4513_v53  ;;  %v4587_v53 = vld [vmem:[%s5633_s1 + $0x5e0] sm:$0xff]  }
  0x8d   : > { %2850 = vmatmul.mubr.bf16.vlgmr.msra.gmra.mxu0 %v4506_v48  ;;  %v4582_v48 = vld [vmem:[%s5633_s1 + $0x568] sm:$0xff]  }
  0x8e   : > { %2915 = vmatmul.mubr.bf16.vlgmr.msra.gmra.mxu1 %v4509_v50  ;;  %4085 = vmatpush3.bf16.msra.mxu0 %v4514_v54  ;;  %v4584_v50 = vld [vmem:[%s5633_s1 + $0x528] sm:$0xff]   ;;  %v4588_v54 = vld [vmem:[%s5633_s1 + $0x520] sm:$0xff]  }
  0x8f   : > { %4125 = vmatpush3.bf16.msra.mxu1 %v4515_v55  ;;  %4086 = vmatprep.subr.bf16.mxu0 %v4516_v56  ;;  %v4589_v55 = vld [vmem:[%s5633_s1 + $0x5a0] sm:$0xff]   ;;  %v4590_v56 = vld [vmem:[%s4795_s6 + $0x1d4] ss:$100 sps:$4 sm:$0xff]  }
  0x90   : > { %4126 = vmatprep.subr.bf16.mxu1 %v4517_v57  ;;  %2857 = vmatprep.mubr.bf16.mxu0 %v4520_v60  ;;  %v4592_v57 = vld [vmem:[%s4795_s6 + $0x1dc] ss:$100 sps:$4 sm:$0xff]  }
  0x91   : > { %2922 = vmatprep.mubr.bf16.mxu1 %v4522_v61  ;;  %v4596_v60 = vld [vmem:[%s5633_s1 + $0x558] sm:$0xff]  }
  0x92   : > { %4087 = vmatpush3.bf16.msra.mxu0 %v4518_v58  ;;  %v4594_v58 = vld [vmem:[%s4795_s6 + $0x1d0] ss:$100 sps:$4 sm:$0xff]   ;;  %v4597_v61 = vld [vmem:[%s5633_s1 + $0x5d8] sm:$0xff]  }
  0x93   : > { %4127 = vmatpush3.bf16.msra.mxu1 %v4519_v59  ;;  %4088 = vmatprep.subr.bf16.mxu0 %v4526_v0  ;;  %v4595_v59 = vld [vmem:[%s4795_s6 + $0x1d8] ss:$100 sps:$4 sm:$0xff]  }
  0x94   : > { %4128 = vmatprep.subr.bf16.mxu1 %v4527_v1  ;;  %v4599_v1 = vld [vmem:[%s5633_s1 + $0x598] sm:$0xff]  }
  0x95   : > { %2858 = vmatmul.mubr.bf16.gmra.mxu0 %v4524_v62 }
  0x96   : > { %2923 = vmatmul.mubr.bf16.gmra.mxu1 %v4525_v63  ;;  %4089 = vmatpush3.bf16.msra.mxu0 %v4528_v2  ;;  %v4598_v63 = vld [vmem:[%s5633_s1 + $0x518] sm:$0xff]  }
  0x97   : > { %4129 = vmatpush3.bf16.msra.mxu1 %v4529_v3  ;;  %4090 = vmatprep.subr.bf16.mxu0 %v4530_v4  ;;  %v4600_v3 = vld [vmem:[%s5633_s1 + $0x550] sm:$0xff]  }
  0x98   : > { %4130 = vmatprep.subr.bf16.mxu1 %v4531_v5  ;;  %2865 = vmatprep.mubr.bf16.mxu0 %v4534_v8 }
  0x99   : > { %2930 = vmatprep.mubr.bf16.mxu1 %v4536_v9  ;;  %v4602_v9 = vld [vmem:[%s5633_s1 + $0x510] sm:$0xff]  }
  0x9a   : > { %4091 = vmatpush3.bf16.msra.mxu0 %v4532_v6  ;;  %v4601_v6 = vld [vmem:[%s5633_s1 + $0x5d0] sm:$0xff]  }
  0x9b   : > { %4131 = vmatpush3.bf16.msra.mxu1 %v4533_v7  ;;  %4092 = vmatprep.subr.bf16.mxu0 %v4540_v12 }
  0x9c   : > { %4132 = vmatprep.subr.bf16.mxu1 %v4541_v13  ;;  %v4604_v13 = vld [vmem:[%s4795_s6 + $0x29c] ss:$100 sps:$4 sm:$0xff]  }
  0x9d   : > { %2866 = vmatmul.mubr.bf16.gmra.mxu0 %v4538_v10 }
  0x9e   : > { %2931 = vmatmul.mubr.bf16.gmra.mxu1 %v4539_v11  ;;  %4093 = vmatpush3.bf16.msra.mxu0 %v4542_v14  ;;  %v4603_v11 = vld [vmem:[%s5633_s1 + $0x590] sm:$0xff]  }
  0x9f   : > { %4133 = vmatpush3.bf16.msra.mxu1 %v4543_v15  ;;  %4094 = vmatprep.subr.bf16.mxu0 %v4544_v16  ;;  %v4606_v16 = vld [vmem:[%s4795_s6 + $0x2a4] ss:$100 sps:$4 sm:$0xff]  }
  0xa0   : > { %4134 = vmatprep.subr.bf16.mxu1 %v4545_v17  ;;  %2873 = vmatprep.mubr.bf16.mxu0 %v4548_v20  ;;  %v4608_v17 = vld [vmem:[%s4795_s6 + $0x298] ss:$100 sps:$4 sm:$0xff]   ;;  %v4610_v20 = vld [vmem:[%s5633_s1 + $0x548] sm:$0xff]  }
  0xa1   : > { %2938 = vmatprep.mubr.bf16.mxu1 %v4550_v21 }
  0xa2   : > { %4095 = vmatpush3.bf16.msra.mxu0 %v4546_v18 }
  0xa3   : > { %4135 = vmatpush3.bf16.msra.mxu1 %v4547_v19  ;;  %4096 = vmatprep.subr.bf16.mxu0 %v4554_v24  ;;  %v4609_v19 = vld [vmem:[%s4795_s6 + $0x2a0] ss:$100 sps:$4 sm:$0xff]   ;;  %v4612_v24 = vld [vmem:[%s5633_s1 + $0x508] sm:$0xff]  }
  0xa4   : > { %4136 = vmatprep.subr.bf16.mxu1 %v4555_v25 }
  0xa5   : > { %2874 = vmatmul.mubr.bf16.gmra.mxu0 %v4552_v22  ;;  %v4611_v22 = vld [vmem:[%s5633_s1 + $0x5c8] sm:$0xff]  }
  0xa6   : > { %2939 = vmatmul.mubr.bf16.gmra.mxu1 %v4553_v23  ;;  %4097 = vmatpush3.bf16.msra.mxu0 %v4556_v26  ;;  %v4613_v26 = vld [vmem:[%s5633_s1 + $0x588] sm:$0xff]  }
  0xa7   : > { %4137 = vmatpush3.bf16.msra.mxu1 %v4557_v27  ;;  %4098 = vmatprep.subr.bf16.mxu0 %v4558_v28 }
  0xa8   : > { %4138 = vmatprep.subr.bf16.mxu1 %v4559_v29  ;;  %2979 = vmatprep.mubr.bf16.mxu0 %v4564_v33  ;;  %v4614_v29 = vld [vmem:[%s5633_s1 + $0x540] sm:$0xff]  }
  0xa9   : > { %3044 = vmatprep.mubr.bf16.mxu1 %v4567_v35 }
  0xaa   : > { %4099 = vmatpush3.bf16.msra.mxu0 %v4560_v30 }
  0xab   : > { %4139 = vmatpush3.bf16.msra.mxu1 %v4561_v31  ;;  %4164 = vmatprep.subr.bf16.mxu0 %v4568_v36  ;;  %v4617_v36 = vld [vmem:[%s5633_s1 + $0x580] sm:$0xff]  }
  0xac   : > { %4204 = vmatprep.subr.bf16.mxu1 %v4569_v37 }
  0xad   : > { %2980 = vmatmul.mubr.bf16.vlgmr.msra.gmra.mxu0 %v4562_v32  ;;  %v4615_v32 = vld [vmem:[%s5633_s1 + $0x5c0] sm:$0xff]  }
  0xae   : > { %3045 = vmatmul.mubr.bf16.vlgmr.msra.gmra.mxu1 %v4565_v34  ;;  %4165 = vmatpush3.bf16.msra.mxu0 %v4570_v38  ;;  %v4616_v34 = vld [vmem:[%s5633_s1 + $0x500] sm:$0xff]  }
  0xaf   : > { %4205 = vmatpush3.bf16.msra.mxu1 %v4571_v39  ;;  %4166 = vmatprep.subr.bf16.mxu0 %v4572_v40  ;;  %v4618_v39 = vld [vmem:[%s4795_s6 + $0x50] ss:$100 sps:$4 sm:$0xff]  }
  0xb0   : > { %4206 = vmatprep.subr.bf16.mxu1 %v4573_v41  ;;  %2987 = vmatprep.mubr.bf16.mxu0 %v4576_v44  ;;  %v4620_v40 = vld [vmem:[%s4795_s6 + $0x54] ss:$100 sps:$4 sm:$0xff]  }
  0xb1   : > { %3052 = vmatprep.mubr.bf16.mxu1 %v4578_v45  ;;  %v4624_v44 = vld [vmem:[%s5633_s1 + $0x638] sm:$0xff]   ;;  %v4625_v45 = vld [vmem:[%s5633_s1 + $0x630] sm:$0xff]  }
  0xb2   : > { %4167 = vmatpush3.bf16.msra.mxu0 %v4574_v42  ;;  %v4621_v42 = vld [vmem:[%s4795_s6 + $0x58] ss:$100 sps:$4 sm:$0xff]  }
  0xb3   : > { %4207 = vmatpush3.bf16.msra.mxu1 %v4575_v43  ;;  %4168 = vmatprep.subr.bf16.mxu0 %v4582_v48  ;;  %v4623_v43 = vld [vmem:[%s4795_s6 + $0x5c] ss:$100 sps:$4 sm:$0xff]  }
  0xb4   : > { %4208 = vmatprep.subr.bf16.mxu1 %v4583_v49  ;;  %v4628_v49 = vld [vmem:[%s4795_s6 + $0x124] ss:$100 sps:$4 sm:$0xff]  }
  0xb5   : > { %2988 = vmatmul.mubr.bf16.gmra.mxu0 %v4580_v46 }
  0xb6   : > { %3053 = vmatmul.mubr.bf16.gmra.mxu1 %v4581_v47  ;;  %4169 = vmatpush3.bf16.msra.mxu0 %v4584_v50  ;;  %v4626_v47 = vld [vmem:[%s4795_s6 + $0x11c] ss:$100 sps:$4 sm:$0xff]  }
  0xb7   : > { %4209 = vmatpush3.bf16.msra.mxu1 %v4585_v51  ;;  %4170 = vmatprep.subr.bf16.mxu0 %v4586_v52  ;;  %v4630_v51 = vld [vmem:[%s4795_s6 + $0x118] ss:$100 sps:$4 sm:$0xff]  }
  0xb8   : > { %4210 = vmatprep.subr.bf16.mxu1 %v4587_v53  ;;  %2995 = vmatprep.mubr.bf16.mxu0 %v4590_v56 }
  0xb9   : > { %3060 = vmatprep.mubr.bf16.mxu1 %v4592_v57  ;;  %v4631_v57 = vld [vmem:[%s4795_s6 + $0x120] ss:$100 sps:$4 sm:$0xff]  }
  0xba   : > { %4171 = vmatpush3.bf16.msra.mxu0 %v4588_v54  ;;  %v4632_v54 = vld [vmem:[%s5633_s1 + $0x628] sm:$0xff]  }
  0xbb   : > { %4211 = vmatpush3.bf16.msra.mxu1 %v4589_v55  ;;  %4172 = vmatprep.subr.bf16.mxu0 %v4596_v60 }
  0xbc   : > { %4212 = vmatprep.subr.bf16.mxu1 %v4597_v61  ;;  %v4633_v61 = vld [vmem:[%s5633_s1 + $0x620] sm:$0xff]  }
  0xbd   : > { %2996 = vmatmul.mubr.bf16.gmra.mxu0 %v4594_v58 }
  0xbe   : > { %3061 = vmatmul.mubr.bf16.gmra.mxu1 %v4595_v59  ;;  %4173 = vmatpush3.bf16.msra.mxu0 %v4598_v63  ;;  %v4634_v59 = vld [vmem:[%s4795_s6 + $0x1e4] ss:$100 sps:$4 sm:$0xff]  }
  0xbf   : > { %4213 = vmatpush3.bf16.msra.mxu1 %v4599_v1  ;;  %4174 = vmatprep.subr.bf16.mxu0 %v4600_v3 }
  0xc0   : > { %4214 = vmatprep.subr.bf16.mxu1 %v4601_v6  ;;  %3003 = vmatprep.mubr.bf16.mxu0 %v4604_v13  ;;  %v4638_v6 = vld [vmem:[%s4795_s6 + $0x1e0] ss:$100 sps:$4 sm:$0xff]  }
  0xc1   : > { %3068 = vmatprep.mubr.bf16.mxu1 %v4606_v16  ;;  %v4641_v16 = vld [vmem:[%s5633_s1 + $0x610] sm:$0xff]  }
  0xc2   : > { %4175 = vmatpush3.bf16.msra.mxu0 %v4602_v9  ;;  %v4642_v9 = vld [vmem:[%s4795_s6 + $0x2ac] ss:$100 sps:$4 sm:$0xff]  }
  0xc3   : > { %4215 = vmatpush3.bf16.msra.mxu1 %v4603_v11  ;;  %4176 = vmatprep.subr.bf16.mxu0 %v4610_v20 }
  0xc4   : > { %4216 = vmatprep.subr.bf16.mxu1 %v4611_v22 }
  0xc5   : > { %3004 = vmatmul.mubr.bf16.gmra.mxu0 %v4608_v17 }
  0xc6   : > { %3069 = vmatmul.mubr.bf16.gmra.mxu1 %v4609_v19  ;;  %4177 = vmatpush3.bf16.msra.mxu0 %v4612_v24  ;;  %v4648_v24 = vld [vmem:[%s5633_s1 + $0x608] sm:$0xff]  }
  0xc7   : > { %4217 = vmatpush3.bf16.msra.mxu1 %v4613_v26  ;;  %4178 = vmatprep.subr.bf16.mxu0 %v4614_v29  ;;  %v4646_v26 = vld [vmem:[%s4795_s6 + $0x2a8] ss:$100 sps:$4 sm:$0xff]  }
  0xc8   : > { %4218 = vmatprep.subr.bf16.mxu1 %v4615_v32  ;;  %3109 = vmatprep.mubr.bf16.mxu0 %v4620_v40 }
  0xc9   : > { %3174 = vmatprep.mubr.bf16.mxu1 %v4623_v43 }
  0xca   : > { %4179 = vmatpush3.bf16.msra.mxu0 %v4616_v34  ;;  %v4650_v34 = vld [vmem:[%s4795_s6 + $0x60] ss:$100 sps:$4 sm:$0xff]  }
  0xcb   : > { %4219 = vmatpush3.bf16.msra.mxu1 %v4617_v36  ;;  %4256 = vmatprep.subr.bf16.mxu0 %v4624_v44 }
  0xcc   : > { %4280 = vmatprep.subr.bf16.mxu1 %v4624_v44 }
  0xcd   : > { %3110 = vmatmul.mubr.bf16.vlgmr.msra.gmra.mxu0 %v4618_v39 }
  0xce   : > { %3175 = vmatmul.mubr.bf16.vlgmr.msra.gmra.mxu1 %v4621_v42  ;;  %4257 = vmatpush3.bf16.msra.mxu0 %v4624_v44  ;;  %v4651_v42 = vld [vmem:[%s4795_s6 + $0x1f0] ss:$100 sps:$4 sm:$0xff]  }
  0xcf   : > { %4288 = vmatpush3.bf16.msra.mxu1 %v4624_v44  ;;  %4258 = vmatprep.subr.bf16.mxu0 %v4625_v45 }
  0xd0   : > { %4281 = vmatprep.subr.bf16.mxu1 %v4625_v45  ;;  %3117 = vmatprep.mubr.bf16.mxu0 %v4626_v47 }
  0xd1   : > { %3182 = vmatprep.mubr.bf16.mxu1 %v4628_v49 }
  0xd2   : > { %4259 = vmatpush3.bf16.msra.mxu0 %v4625_v45 }
  0xd3   : > { %4289 = vmatpush3.bf16.msra.mxu1 %v4625_v45  ;;  %4260 = vmatprep.subr.bf16.mxu0 %v4632_v54 }
  0xd4   : > { %4282 = vmatprep.subr.bf16.mxu1 %v4632_v54 }
  0xd5   : > { %3118 = vmatmul.mubr.bf16.gmra.mxu0 %v4630_v51 }
  0xd6   : > { %3183 = vmatmul.mubr.bf16.gmra.mxu1 %v4631_v57  ;;  %3125 = vmatprep.mubr.bf16.mxu0 %v4634_v59  ;;  %v4653_v57 = vld [vmem:[%s4795_s6 + $0x2b8] ss:$100 sps:$4 sm:$0xff]  }
  0xd7   : > { %4261 = vmatpush3.bf16.msra.mxu0 %v4632_v54  ;;  %4290 = vmatpush3.bf16.msra.mxu1 %v4632_v54 }
  0xd8   : > { %4262 = vmatprep.subr.bf16.mxu0 %v4633_v61  ;;  %4283 = vmatprep.subr.bf16.mxu1 %v4633_v61 }
  0xdb   : > { %4263 = vmatpush3.bf16.msra.mxu0 %v4633_v61  ;;  %4291 = vmatpush3.bf16.msra.mxu1 %v4633_v61 }
  0xdd   : > { %3126 = vmatmul.mubr.bf16.gmra.mxu0 %v4638_v6 }
  0xde   : > { %3133 = vmatprep.mubr.bf16.mxu0 %v4642_v9 }
  0xe5   : > { %3134 = vmatmul.mubr.bf16.gmra.mxu0 %v4646_v26 }
  0xe6   : > { %4272 = vmatprep.mubr.bf16.mxu0 %v4650_v34 }
  0xed   : > { %v3780_v62 = vpop.f32.mrf.mxu0 }
  0xee   : > { %v3820_v0 = vpop.f32.mrf.mxu1 }
  0xef   : > { %v3781_v2 = vpop.f32.mrf.mxu0 }
  0xf0   : > { %v5326_v4 = vadd.f32 %v3781_v2, %v3780_v62  ;;  %v3821_v5 = vpop.f32.mrf.mxu1  ;;  %v4636_v62 = vld [vmem:[%s4795_s6 + $0x1ec] ss:$100 sps:$4 sm:$0xff]   ;;  %v4640_v2 = vld [vmem:[%s5633_s1 + $0x618] sm:$0xff]  }
  0xf1   : > { %v5331_v7 = vadd.f32 %v3821_v5, %v3820_v0  ;;  %v3783_v8 = vpop.f32.mrf.mxu0  ;;  %3190 = vmatprep.mubr.bf16.mxu1 %v4636_v62  ;;  %4264 = vmatprep.subr.bf16.mxu0 %v4640_v2 }
  0xf2   : > { %v3823_v10 = vpop.f32.mrf.mxu1  ;;  %4284 = vmatprep.subr.bf16.mxu1 %v4640_v2  ;;  %4265 = vmatpush3.bf16.msra.mxu0 %v4640_v2 }
  0xf3   : > { %v3784_v12 = vpop.f32.mrf.mxu0  ;;  %4292 = vmatpush3.bf16.msra.mxu1 %v4640_v2  ;;  %4266 = vmatprep.subr.bf16.mxu0 %v4641_v16 }
  0xf4   : > { %v5340_v14 = vadd.f32 %v3784_v12, %v3783_v8  ;;  %v3824_v15 = vpop.f32.mrf.mxu1  ;;  %v4639_v8 = vld [vmem:[%s4795_s6 + $0x1e8] ss:$100 sps:$4 sm:$0xff]   ;;  %v4644_v12 = vld [vmem:[%s4795_s6 + $0x2b4] ss:$100 sps:$4 sm:$0xff]   ;;  %4285 = vmatprep.subr.bf16.mxu1 %v4641_v16 }
  0xf5   : > { %v5344_v18 = vadd.f32 %v3824_v15, %v3823_v10  ;;  %v3786_v21 = vpop.f32.mrf.mxu0  ;;  %3191 = vmatmul.mubr.bf16.gmra.mxu1 %v4639_v8 }
  0xf6   : > { %v3826_v23 = vpop.f32.mrf.mxu1  ;;  %3198 = vmatprep.mubr.bf16.mxu1 %v4644_v12  ;;  %4267 = vmatpush3.bf16.msra.mxu0 %v4641_v16 }
  0xf7   : > { %v3787_v25 = vpop.f32.mrf.mxu0  ;;  %4293 = vmatpush3.bf16.msra.mxu1 %v4641_v16  ;;  %4268 = vmatprep.subr.bf16.mxu0 %v4648_v24 }
  0xf8   : > { %v5359_v27 = vadd.f32 %v3787_v25, %v3786_v21  ;;  %v3827_v28 = vpop.f32.mrf.mxu1  ;;  %v3460_v25 = vld [vmem:[%s5634_s2] ss:$0 sm:$0xff]  ;;  %4286 = vmatprep.subr.bf16.mxu1 %v4648_v24 }
  0xf9   : > { %v5364_v30 = vadd.f32 %v3827_v28, %v3826_v23  ;;  %v3789_v31 = vpop.f32.mrf.mxu0  ;;  %v2462_v28 = vadd.f32 %v5326_v4, %v3460_v25  ;;  %v2465_v29 = vadd.f32 %v5340_v14, %v3460_v25 }
  0xfa   : > { %v3829_v33 = vpop.f32.mrf.mxu1  ;;  %4269 = vmatpush3.bf16.msra.mxu0 %v4648_v24 }
  0xfb   : > { %v3790_v35 = vpop.f32.mrf.mxu0  ;;  %v2527_v43 = vadd.f32 %v5331_v7, %v2462_v28  ;;  %v2530_v4 = vadd.f32 %v5344_v18, %v2465_v29  ;;  %4294 = vmatpush3.bf16.msra.mxu1 %v4648_v24 }
  0xfc   : > { %v5375_v37 = vadd.f32 %v3790_v35, %v3789_v31  ;;  %v3830_v38 = vpop.f32.mrf.mxu1  ;;  %v2470_v31 = vadd.f32 %v5359_v27, %v3460_v25 }
  0xfd   : > { %v5379_v41 = vadd.f32 %v3830_v38, %v3829_v33  ;;  %v3792_v46 = vpop.f32.mrf.mxu0  ;;  %v4647_v33 = vld [vmem:[%s4795_s6 + $0x2b0] ss:$100 sps:$4 sm:$0xff]  }
  0xfe   : > { %v3832_v48 = vpop.f32.mrf.mxu1  ;;  %v2473_v32 = vadd.f32 %v5375_v37, %v3460_v25  ;;  %v2535_v14 = vadd.f32 %v5364_v30, %v2470_v31  ;;  %v4649_v37 = vld [vmem:[%s5633_s1 + $0x600] sm:$0xff]   ;;  %3199 = vmatmul.mubr.bf16.gmra.mxu1 %v4647_v33 }
  0xff   : > { %v3793_v50 = vpop.f32.mrf.mxu0  ;;  %4276 = vmatprep.mubr.bf16.mxu1 %v4651_v42  ;;  %4270 = vmatprep.subr.bf16.mxu0 %v4649_v37 }
 0x100   : > { %v5392_v52 = vadd.f32 %v3793_v50, %v3792_v46  ;;  %v3833_v53 = vpop.f32.mrf.mxu1  ;;  %v2538_v27 = vadd.f32 %v5379_v41, %v2473_v32  ;;  %4287 = vmatprep.subr.bf16.mxu1 %v4649_v37  ;;  %4271 = vmatpush3.bf16.msra.mxu0 %v4649_v37 }
 0x101   : > { %v5397_v55 = vadd.f32 %v3833_v53, %v3832_v48  ;;  %v3795_v56 = vpop.f32.mrf.mxu0  ;;  %4295 = vmatpush3.bf16.msra.mxu1 %v4649_v37 }
 0x102   : > { %v3835_v58 = vpop.f32.mrf.mxu1  ;;  %v2478_v35 = vadd.f32 %v5392_v52, %v3460_v25 }
 0x103   : > { %v3796_v60 = vpop.f32.mrf.mxu0 }
 0x104   : > { %v3797_v63 = vadd.f32 %v3796_v60, %v3795_v56  ;;  %v3836_v0 = vpop.f32.mrf.mxu1  ;;  %v2543_v44 = vadd.f32 %v5397_v55, %v2478_v35  ;;  %v4652_v55 = vld [vmem:[%s4795_s6 + $0x128] ss:$100 sps:$4 sm:$0xff]   ;;  %s3763_s6 = sshll.u32 %s5666_s16, 6 }
 0x105   : > { %v3837_v1 = vadd.f32 %v3836_v0, %v3835_v58  ;;  %v3798_v3 = vpop.f32.mrf.mxu0  ;;  %4273 = vmatmul.mubr.bf16.vlgmr.msra.gmra.mxu0 %v4652_v55  ;;  %s5561_s5 = scalar_lea.vmem %s5635_s3, %s3763_s6 }
 0x106   : > { %v3838_v5 = vpop.f32.mrf.mxu1  ;;  %v2481_v36 = vadd.f32 %v3797_v63, %v3460_v25  ;;  %4277 = vmatmul.mubr.bf16.vlgmr.msra.gmra.mxu1 %v4653_v57 }
 0x107   : > { %v3799_v10 = vpop.f32.mrf.mxu0 }
 0x108   : > { %v3839_v11 = vpop.f32.mrf.mxu1  ;;  %v3800_v13 = vadd.f32 %v3799_v10, %v3798_v3  ;;  %v5438_v45 = vadd.f32 %v3837_v1, %v2481_v36 }
 0x109   : > { %v3840_v15 = vadd.f32 %v3839_v11, %v3838_v5  ;;  %v3801_v17 = vpop.f32.mrf.mxu0 }
 0x10a   : > { %v3841_v19 = vpop.f32.mrf.mxu1  ;;  %v2486_v38 = vadd.f32 %v3800_v13, %v3460_v25 }
 0x10b   : > { %v3802_v20 = vpop.f32.mrf.mxu0 }
 0x10c   : > { %v3842_v21 = vpop.f32.mrf.mxu1  ;;  %v3803_v22 = vadd.f32 %v3802_v20, %v3801_v17  ;;  %v5440_v46 = vadd.f32 %v3840_v15, %v2486_v38 }
 0x10d   : > { %v3843_v23 = vadd.f32 %v3842_v21, %v3841_v19  ;;  %v3860_v40 = vpop.f32.mrf.mxu0 }
 0x10e   : > { %v2489_v39 = vadd.f32 %v3803_v22, %v3460_v25  ;;  %v3900_v47 = vpop.f32.mrf.mxu1 }
 0x10f   : > { %v3861_v7 = vpop.f32.mrf.mxu0 }
 0x110   : > { %v5442_v18 = vadd.f32 %v3843_v23, %v2489_v39  ;;  %v3862_v30 = vadd.f32 %v3861_v7, %v3860_v40  ;;  %v3901_v41 = vpop.f32.mrf.mxu1 }
 0x111   : > { %v3863_v48 = vpop.f32.mrf.mxu0  ;;  %v3902_v50 = vadd.f32 %v3901_v41, %v3900_v47 }
 0x112   : > { %v2592_v49 = vadd.f32 %v3862_v30, %v2527_v43  ;;  %v3903_v51 = vpop.f32.mrf.mxu1 }
 0x113   : > { %v3864_v52 = vpop.f32.mrf.mxu0 }
 0x114   : > { %v5444_v53 = vadd.f32 %v3902_v50, %v2592_v49  ;;  %v3865_v54 = vadd.f32 %v3864_v52, %v3863_v48  ;;  %v3904_v56 = vpop.f32.mrf.mxu1 }
 0x115   : > { %v3905_v59 = vadd.f32 %v3904_v56, %v3903_v51  ;;  %v3866_v61 = vpop.f32.mrf.mxu0 }
 0x116   : > { %v2595_v58 = vadd.f32 %v3865_v54, %v2530_v4  ;;  %v3906_v62 = vpop.f32.mrf.mxu1 }
 0x117   : > { %v3867_v63 = vpop.f32.mrf.mxu0 }
 0x118   : > { %v5448_v60 = vadd.f32 %v3905_v59, %v2595_v58  ;;  %v3868_v0 = vadd.f32 %v3867_v63, %v3866_v61  ;;  %v3907_v1 = vpop.f32.mrf.mxu1 }
 0x119   : > { %v3908_v2 = vadd.f32 %v3907_v1, %v3906_v62  ;;  %v3869_v3 = vpop.f32.mrf.mxu0 }
 0x11a   : > { %v2600_v5 = vadd.f32 %v3868_v0, %v2535_v14  ;;  %v3909_v6 = vpop.f32.mrf.mxu1 }
 0x11b   : > { %v3870_v8 = vpop.f32.mrf.mxu0 }
 0x11c   : > { %v2665_v9 = vadd.f32 %v3908_v2, %v2600_v5  ;;  %v3871_v10 = vadd.f32 %v3870_v8, %v3869_v3  ;;  %v3910_v11 = vpop.f32.mrf.mxu1 }
 0x11d   : > { %v3911_v12 = vadd.f32 %v3910_v11, %v3909_v6  ;;  %v3872_v16 = vpop.f32.mrf.mxu0 }
 0x11e   : > { %v2603_v13 = vadd.f32 %v3871_v10, %v2538_v27  ;;  %v3912_v17 = vpop.f32.mrf.mxu1 }
 0x11f   : > { %v3873_v19 = vpop.f32.mrf.mxu0 }
 0x120   : > { %v5450_v15 = vadd.f32 %v3911_v12, %v2603_v13  ;;  %v3913_v20 = vpop.f32.mrf.mxu1  ;;  %v3874_v21 = vadd.f32 %v3873_v19, %v3872_v16 }
 0x121   : > { %v3914_v22 = vadd.f32 %v3913_v20, %v3912_v17  ;;  %v3875_v23 = vpop.f32.mrf.mxu0 }
 0x122   : > { %v3915_v24 = vpop.f32.mrf.mxu1  ;;  %v2608_v25 = vadd.f32 %v3874_v21, %v2543_v44 }
 0x123   : > { %v3876_v26 = vpop.f32.mrf.mxu0 }
 0x124   : > { %v3916_v28 = vpop.f32.mrf.mxu1  ;;  %v2673_v29 = vadd.f32 %v3914_v22, %v2608_v25  ;;  %v3877_v31 = vadd.f32 %v3876_v26, %v3875_v23 }
 0x125   : > { %v3917_v32 = vadd.f32 %v3916_v28, %v3915_v24  ;;  %v3878_v34 = vpop.f32.mrf.mxu0 }
 0x126   : > { %v2611_v33 = vadd.f32 %v3877_v31, %v5438_v45  ;;  %v3918_v36 = vpop.f32.mrf.mxu1 }
 0x127   : > { %v3879_v38 = vpop.f32.mrf.mxu0 }
 0x128   : > { %v2676_v35 = vadd.f32 %v3917_v32, %v2611_v33  ;;  %v3880_v39 = vadd.f32 %v3879_v38, %v3878_v34  ;;  %v3919_v40 = vpop.f32.mrf.mxu1 }
 0x129   : > { %v3920_v42 = vadd.f32 %v3919_v40, %v3918_v36  ;;  %v3881_v43 = vpop.f32.mrf.mxu0 }
 0x12a   : > { %v2616_v4 = vadd.f32 %v3880_v39, %v5440_v46  ;;  %v3921_v14 = vpop.f32.mrf.mxu1 }
 0x12b   : > { %v3882_v27 = vpop.f32.mrf.mxu0 }
 0x12c   : > { %v2681_v37 = vadd.f32 %v3920_v42, %v2616_v4  ;;  %v3883_v44 = vadd.f32 %v3882_v27, %v3881_v43  ;;  %v3922_v47 = vpop.f32.mrf.mxu1 }
 0x12d   : > { %v3923_v7 = vadd.f32 %v3922_v47, %v3921_v14  ;;  %v3940_v45 = vpop.f32.mrf.mxu0 }
 0x12e   : > { %v2619_v30 = vadd.f32 %v3883_v44, %v5442_v18  ;;  %v3980_v48 = vpop.f32.mrf.mxu1 }
 0x12f   : > { %v3941_v49 = vpop.f32.mrf.mxu0 }
 0x130   : > { %v5455_v41 = vadd.f32 %v3923_v7, %v2619_v30  ;;  %v3942_v50 = vadd.f32 %v3941_v49, %v3940_v45  ;;  %v3981_v51 = vpop.f32.mrf.mxu1 }
 0x131   : > { %v3982_v52 = vadd.f32 %v3981_v51, %v3980_v48  ;;  %v3943_v54 = vpop.f32.mrf.mxu0 }
 0x132   : > { %v2722_v55 = vadd.f32 %v3942_v50, %v5444_v53  ;;  %v3983_v46 = vpop.f32.mrf.mxu1 }
 0x133   : > { %v3944_v56 = vpop.f32.mrf.mxu0 }
 0x134   : > { %v2787_v57 = vadd.f32 %v3982_v52, %v2722_v55  ;;  %v3945_v58 = vadd.f32 %v3944_v56, %v3943_v54  ;;  %v3984_v59 = vpop.f32.mrf.mxu1 }
 0x135   : > { %v3985_v61 = vadd.f32 %v3984_v59, %v3983_v46  ;;  %v3946_v63 = vpop.f32.mrf.mxu0 }
 0x136   : > { %v2725_v62 = vadd.f32 %v3945_v58, %v5448_v60  ;;  %v3986_v0 = vpop.f32.mrf.mxu1 }
 0x137   : > { %v3947_v1 = vpop.f32.mrf.mxu0 }
 0x138   : > { %v5459_v18 = vadd.f32 %v3985_v61, %v2725_v62  ;;  %v3987_v2 = vpop.f32.mrf.mxu1  ;;  %v3948_v3 = vadd.f32 %v3947_v1, %v3946_v63 }
 0x139   : > { %v3988_v5 = vadd.f32 %v3987_v2, %v3986_v0  ;;  %v3949_v6 = vpop.f32.mrf.mxu0 }
 0x13a   : > { %v3989_v8 = vpop.f32.mrf.mxu1  ;;  %v2730_v10 = vadd.f32 %v3948_v3, %v2665_v9 }
 0x13b   : > { %v3950_v53 = vpop.f32.mrf.mxu0 }
 0x13c   : > { %v3990_v11 = vpop.f32.mrf.mxu1  ;;  %v2795_v12 = vadd.f32 %v3988_v5, %v2730_v10  ;;  %v3951_v13 = vadd.f32 %v3950_v53, %v3949_v6 }
 0x13d   : > { %v3991_v16 = vadd.f32 %v3990_v11, %v3989_v8  ;;  %v3952_v19 = vpop.f32.mrf.mxu0 }
 0x13e   : > { %v2733_v17 = vadd.f32 %v3951_v13, %v5450_v15  ;;  %v3992_v20 = vpop.f32.mrf.mxu1 }
 0x13f   : > { %v3953_v21 = vpop.f32.mrf.mxu0 }
 0x140   : > { %v2798_v60 = vadd.f32 %v3991_v16, %v2733_v17  ;;  %v3954_v22 = vadd.f32 %v3953_v21, %v3952_v19  ;;  %v3993_v23 = vpop.f32.mrf.mxu1 }
 0x141   : > { %v3994_v24 = vadd.f32 %v3993_v23, %v3992_v20  ;;  %v3955_v25 = vpop.f32.mrf.mxu0 }
 0x142   : > { %v2738_v26 = vadd.f32 %v3954_v22, %v2673_v29  ;;  %v3995_v28 = vpop.f32.mrf.mxu1 }
 0x143   : > { %v3956_v31 = vpop.f32.mrf.mxu0 }
 0x144   : > { %v2803_v32 = vadd.f32 %v3994_v24, %v2738_v26  ;;  %v3957_v9 = vadd.f32 %v3956_v31, %v3955_v25  ;;  %v3996_v33 = vpop.f32.mrf.mxu1 }
 0x145   : > { %v3997_v34 = vadd.f32 %v3996_v33, %v3995_v28  ;;  %v3958_v39 = vpop.f32.mrf.mxu0 }
 0x146   : > { %v2741_v36 = vadd.f32 %v3957_v9, %v2676_v35  ;;  %v3998_v15 = vpop.f32.mrf.mxu1 }
 0x147   : > { %v3959_v40 = vpop.f32.mrf.mxu0 }
 0x148   : > { %v5462_v38 = vadd.f32 %v3997_v34, %v2741_v36  ;;  %v3960_v42 = vadd.f32 %v3959_v40, %v3958_v39  ;;  %v3999_v43 = vpop.f32.mrf.mxu1 }
 0x149   : > { %v4000_v4 = vadd.f32 %v3999_v43, %v3998_v15  ;;  %v3961_v14 = vpop.f32.mrf.mxu0 }
 0x14a   : > { %v2746_v27 = vadd.f32 %v3960_v42, %v2681_v37  ;;  %v4001_v44 = vpop.f32.mrf.mxu1 }
 0x14b   : > { %v3962_v47 = vpop.f32.mrf.mxu0 }
 0x14c   : > { %v5464_v29 = vadd.f32 %v4000_v4, %v2746_v27  ;;  %v3963_v7 = vadd.f32 %v3962_v47, %v3961_v14  ;;  %v4002_v30 = vpop.f32.mrf.mxu1 }
 0x14d   : > { %v4003_v45 = vadd.f32 %v4002_v30, %v4001_v44  ;;  %v4020_v49 = vpop.f32.mrf.mxu0 }
 0x14e   : > { %v2749_v48 = vadd.f32 %v3963_v7, %v5455_v41  ;;  %v4060_v50 = vpop.f32.mrf.mxu1 }
 0x14f   : > { %v4021_v51 = vpop.f32.mrf.mxu0 }
 0x150   : > { %v5467_v35 = vadd.f32 %v4003_v45, %v2749_v48  ;;  %v4022_v52 = vadd.f32 %v4021_v51, %v4020_v49  ;;  %v4061_v54 = vpop.f32.mrf.mxu1 }
 0x151   : > { %v4062_v55 = vadd.f32 %v4061_v54, %v4060_v50  ;;  %v4023_v46 = vpop.f32.mrf.mxu0 }
 0x152   : > { %v2852_v56 = vadd.f32 %v4022_v52, %v2787_v57  ;;  %v4063_v37 = vpop.f32.mrf.mxu1 }
 0x153   : > { %v4024_v58 = vpop.f32.mrf.mxu0 }
 0x154   : > { %v5469_v59 = vadd.f32 %v4062_v55, %v2852_v56  ;;  %v4025_v61 = vadd.f32 %v4024_v58, %v4023_v46  ;;  %v4064_v62 = vpop.f32.mrf.mxu1 }
 0x155   : > { %v4065_v63 = vadd.f32 %v4064_v62, %v4063_v37  ;;  %v4026_v41 = vpop.f32.mrf.mxu0 }
 0x156   : > { %v2855_v0 = vadd.f32 %v4025_v61, %v5459_v18  ;;  %v4066_v2 = vpop.f32.mrf.mxu1 }
 0x157   : > { %v4027_v3 = vpop.f32.mrf.mxu0 }
 0x158   : > { %v5472_v1 = vadd.f32 %v4065_v63, %v2855_v0  ;;  %v4028_v5 = vadd.f32 %v4027_v3, %v4026_v41  ;;  %v4067_v6 = vpop.f32.mrf.mxu1 }
 0x159   : > { %v4068_v8 = vadd.f32 %v4067_v6, %v4066_v2  ;;  %v4029_v10 = vpop.f32.mrf.mxu0 }
 0x15a   : > { %v2860_v53 = vadd.f32 %v4028_v5, %v2795_v12  ;;  %v4069_v57 = vpop.f32.mrf.mxu1 }
 0x15b   : > { %v4030_v11 = vpop.f32.mrf.mxu0 }
 0x15c   : > { %v5474_v13 = vadd.f32 %v4068_v8, %v2860_v53  ;;  %v4031_v16 = vadd.f32 %v4030_v11, %v4029_v10  ;;  %v4070_v17 = vpop.f32.mrf.mxu1 }
 0x15d   : > { %v4071_v19 = vadd.f32 %v4070_v17, %v4069_v57  ;;  %v4032_v18 = vpop.f32.mrf.mxu0 }
 0x15e   : > { %v2863_v20 = vadd.f32 %v4031_v16, %v2798_v60  ;;  %v4072_v22 = vpop.f32.mrf.mxu1 }
 0x15f   : > { %v4033_v23 = vpop.f32.mrf.mxu0 }
 0x160   : > { %v5476_v21 = vadd.f32 %v4071_v19, %v2863_v20  ;;  %v4034_v24 = vadd.f32 %v4033_v23, %v4032_v18  ;;  %v4073_v25 = vpop.f32.mrf.mxu1 }
 0x161   : > { %v4074_v26 = vadd.f32 %v4073_v25, %v4072_v22  ;;  %v4035_v28 = vpop.f32.mrf.mxu0 }
 0x162   : > { %v2868_v31 = vadd.f32 %v4034_v24, %v2803_v32  ;;  %v4075_v9 = vpop.f32.mrf.mxu1 }
 0x163   : > { %v4036_v12 = vpop.f32.mrf.mxu0 }
 0x164   : > { %v5478_v33 = vadd.f32 %v4074_v26, %v2868_v31  ;;  %v4037_v34 = vadd.f32 %v4036_v12, %v4035_v28  ;;  %v4076_v36 = vpop.f32.mrf.mxu1 }
 0x165   : > { %v4077_v39 = vadd.f32 %v4076_v36, %v4075_v9  ;;  %v4038_v40 = vpop.f32.mrf.mxu0 }
 0x166   : > { %v2871_v15 = vadd.f32 %v4037_v34, %v5462_v38  ;;  %v4078_v42 = vpop.f32.mrf.mxu1 }
 0x167   : > { %v4039_v43 = vpop.f32.mrf.mxu0 }
 0x168   : > { %v5481_v60 = vadd.f32 %v4077_v39, %v2871_v15  ;;  %v4079_v4 = vpop.f32.mrf.mxu1  ;;  %v4040_v34 = vadd.f32 %v4039_v43, %v4038_v40 }
 0x169   : > { %v4041_v14 = vpop.f32.mrf.mxu0 }
 0x16a   : > { %5637 = vst [vmem:[#allocation2_spill] sm:$0xff] %v5481_v60  ;;  %v5483_v27 = vpop.f32.mrf.mxu1 }
 0x16b   : > { %v4042_v44 = vpop.f32.mrf.mxu0 }
 0x16c   : > { %v5485_v32 = vpop.f32.mrf.mxu1 }
 0x16d   : > { %v4100_v47 = vpop.f32.mrf.mxu0 }
 0x16e   : > { %v5487_v7 = vpop.f32.mrf.mxu1 }
 0x16f   : > { %v4101_v30 = vpop.f32.mrf.mxu0 }
 0x170   : > { %v4141_v45 = vpop.f32.mrf.mxu1 }
 0x171   : > { %v5489_v48 = vpop.f32.mrf.mxu0 }
 0x172   : > { %v5491_v38 = vpop.f32.mrf.mxu1 }
 0x173   : > { %v4104_v49 = vpop.f32.mrf.mxu0 }
 0x174   : > { %v5493_v50 = vpop.f32.mrf.mxu1 }
 0x175   : > { %v4106_v51 = vpop.f32.mrf.mxu0 }
 0x176   : > { %v4146_v52 = vpop.f32.mrf.mxu1 }
 0x177   : > { %v4107_v54 = vpop.f32.mrf.mxu0 }
 0x178   : > { %v4147_v55 = vpop.f32.mrf.mxu1  ;;  %v4108_v60 = vadd.f32 %v4107_v54, %v4106_v51 }
 0x179   : > { %v4109_v46 = vpop.f32.mrf.mxu0 }
 0x17a   : > { %v5495_v56 = vpop.f32.mrf.mxu1  ;;  %v2990_v51 = vadd.f32 %v4108_v60, %v5474_v13  ;;  %v4145_v13 = vadd.f32 %v5493_v50, %v5491_v38 }
 0x17b   : > { %v4110_v37 = vpop.f32.mrf.mxu0 }
 0x17c   : > { %v5497_v58 = vpop.f32.mrf.mxu1 }
 0x17d   : > { %v4112_v61 = vpop.f32.mrf.mxu0 }
 0x17e   : > { %v4152_v62 = vpop.f32.mrf.mxu1 }
 0x17f   : > { %v4113_v63 = vpop.f32.mrf.mxu0 }
 0x180   : > { %v4153_v0 = vpop.f32.mrf.mxu1 }
 0x181   : > { %v5499_v41 = vpop.f32.mrf.mxu0 }
 0x182   : > { %5638 = vst [vmem:[#allocation3_spill] sm:$0xff] %v5499_v41  ;;  %v5501_v2 = vpop.f32.mrf.mxu1 }
 0x183   : > { %5639 = vst [vmem:[#allocation4_spill] sm:$0xff] %v5501_v2  ;;  %v5503_v3 = vpop.f32.mrf.mxu0 }
 0x184   : > { %5640 = vst [vmem:[#allocation5_spill] sm:$0xff] %v5503_v3  ;;  %v5505_v5 = vpop.f32.mrf.mxu1 }
 0x185   : > { %5641 = vst [vmem:[#allocation6_spill] sm:$0xff] %v5505_v5  ;;  %v4118_v6 = vpop.f32.mrf.mxu0 }
 0x186   : > { %v4158_v8 = vpop.f32.mrf.mxu1 }
 0x187   : > { %v4119_v10 = vpop.f32.mrf.mxu0 }
 0x188   : > { %v4159_v53 = vpop.f32.mrf.mxu1  ;;  %v4120_v40 = vadd.f32 %v4119_v10, %v4118_v6 }
 0x189   : > { %v4121_v57 = vpop.f32.mrf.mxu0 }
 0x18a   : > { %v5507_v11 = vpop.f32.mrf.mxu1 }
 0x18b   : > { %5642 = vst [vmem:[#allocation7_spill] sm:$0xff] %v5507_v11  ;;  %v4122_v16 = vpop.f32.mrf.mxu0 }
 0x18c   : > { %v5509_v17 = vpop.f32.mrf.mxu1 }
 0x18d   : > { %5643 = vst [vmem:[#allocation8_spill] sm:$0xff] %v5509_v17  ;;  %v4180_v19 = vpop.f32.mrf.mxu0  ;;  %v4114_v17 = vadd.f32 %v4113_v63, %v4112_v61 }
 0x18e   : > { %v5511_v20 = vpop.f32.mrf.mxu1 }
 0x18f   : > { %5644 = vst [vmem:[#allocation9_spill] sm:$0xff] %v5511_v20  ;;  %v4181_v18 = vpop.f32.mrf.mxu0  ;;  %v4043_v20 = vadd.f32 %v4042_v44, %v4041_v14  ;;  %v4142_v14 = vadd.f32 %v4141_v45, %v5487_v7  ;;  %v2998_v54 = vadd.f32 %v4114_v17, %v5478_v33  ;;  %v4160_v45 = vadd.f32 %v4159_v53, %v4158_v8  ;;  %v5652_v33 = vld [vmem:[#allocation5_spill] sm:$0xff] }
 0x190   : > { %v5513_v22 = vpop.f32.mrf.mxu1 }
 0x191   : > { %5645 = vst [vmem:[#allocation10_spill] sm:$0xff] %v5513_v22  ;;  %v5515_v23 = vpop.f32.mrf.mxu0  ;;  %v4080_v22 = vadd.f32 %v4079_v4, %v4078_v42  ;;  %v2879_v3 = vadd.f32 %v4043_v20, %v5467_v35  ;;  %v4105_v42 = vadd.f32 %v4104_v49, %v5489_v48  ;;  %v4148_v4 = vadd.f32 %v4147_v55, %v4146_v52 }
 0x192   : > { %5646 = vst [vmem:[#allocation11_spill] sm:$0xff] %v5515_v23  ;;  %v5517_v24 = vpop.f32.mrf.mxu1  ;;  %v2876_v23 = vadd.f32 %v4040_v34, %v5464_v29  ;;  %v4083_v29 = vadd.f32 %v5485_v32, %v5483_v27  ;;  %v4151_v32 = vadd.f32 %v5497_v58, %v5495_v56  ;;  %v5653_v10 = vld [vmem:[#allocation7_spill] sm:$0xff] }
 0x193   : > { %5647 = vst [vmem:[#allocation12_spill] sm:$0xff] %v5517_v24  ;;  %v5519_v25 = vpop.f32.mrf.mxu0  ;;  %v4102_v24 = vadd.f32 %v4101_v30, %v4100_v47  ;;  %v4123_v47 = vadd.f32 %v4122_v16, %v4121_v57  ;;  %v2985_v52 = vadd.f32 %v4105_v42, %v5472_v1  ;;  %v3055_v63 = vadd.f32 %v4148_v4, %v2990_v51 }
 0x194   : > { %5648 = vst [vmem:[#allocation13_spill] sm:$0xff] %v5519_v25  ;;  %v5521_v26 = vpop.f32.mrf.mxu1  ;;  %v2941_v41 = vadd.f32 %v4080_v22, %v2876_v23  ;;  %v5654_v56 = vld [vmem:[#allocation8_spill] sm:$0xff]  ;;  %v5655_v22 = vld [vmem:[#allocation2_spill] sm:$0xff] }
 0x195   : > { %5649 = vst [vmem:[#allocation14_spill] sm:$0xff] %v5521_v26  ;;  %v4186_v28 = vpop.f32.mrf.mxu0  ;;  %v4111_v26 = vadd.f32 %v4110_v37, %v4109_v46  ;;  %v4154_v46 = vadd.f32 %v4153_v0, %v4152_v62  ;;  %v2944_v37 = vadd.f32 %v4083_v29, %v2879_v3  ;;  %v4182_v3 = vadd.f32 %v4181_v18, %v4180_v19 }
 0x196   : > { %v4226_v31 = vpop.f32.mrf.mxu1  ;;  %v3006_v7 = vadd.f32 %v4120_v40, %v2941_v41  ;;  %v4163_v58 = vadd.f32 %v5654_v56, %v5653_v10  ;;  %v3050_v51 = vadd.f32 %v4145_v13, %v2985_v52 }
 0x197   : > { %v4187_v9 = vpop.f32.mrf.mxu0  ;;  %v2993_v35 = vadd.f32 %v4111_v26, %v5476_v21  ;;  %v5651_v21 = vld [vmem:[#allocation3_spill] sm:$0xff]  ;;  %v3009_v55 = vadd.f32 %v4123_v47, %v2944_v37  ;;  %v3063_v41 = vadd.f32 %v4154_v46, %v2998_v54  ;;  %v5657_v26 = vld [vmem:[#allocation6_spill] sm:$0xff] }
 0x198   : > { %v4227_v12 = vpop.f32.mrf.mxu1  ;;  %v4188_v48 = vadd.f32 %v4187_v9, %v4186_v28  ;;  %v4117_v60 = vadd.f32 %v5652_v33, %v5651_v21  ;;  %v3071_v8 = vadd.f32 %v4160_v45, %v3006_v7  ;;  %v5659_v40 = vld [vmem:[#allocation10_spill] sm:$0xff] }
 0x199   : > { %v4189_v36 = vpop.f32.mrf.mxu0  ;;  %v3058_v0 = vadd.f32 %v4151_v32, %v2993_v35  ;;  %v4228_v38 = vadd.f32 %v4227_v12, %v4226_v31  ;;  %v3074_v19 = vadd.f32 %v4163_v58, %v3009_v55 }
 0x19a   : > { %v5523_v39 = vpop.f32.mrf.mxu1  ;;  %v3120_v16 = vadd.f32 %v4188_v48, %v3055_v63  ;;  %v3001_v23 = vadd.f32 %v4117_v60, %v5655_v22  ;;  %v5663_v33 = vld [vmem:[#allocation12_spill] sm:$0xff] }
 0x19b   : > { %5650 = vst [vmem:[#allocation15_spill] sm:$0xff] %v5523_v39  ;;  %v4190_v15 = vpop.f32.mrf.mxu0  ;;  %v2982_v39 = vadd.f32 %v4102_v24, %v5469_v59  ;;  %v5656_v24 = vld [vmem:[#allocation4_spill] sm:$0xff] }
 0x19c   : > { %v5525_v5 = vpop.f32.mrf.mxu1  ;;  %v4191_v50 = vadd.f32 %v4190_v15, %v4189_v36  ;;  %v4157_v28 = vadd.f32 %v5657_v26, %v5656_v24  ;;  %v3185_v54 = vadd.f32 %v4228_v38, %v3120_v16  ;;  %v5664_v60 = vld [vmem:[#allocation14_spill] sm:$0xff] }
 0x19d   : > { %v4192_v2 = vpop.f32.mrf.mxu0  ;;  %v3047_v27 = vadd.f32 %v4142_v14, %v2982_v39  ;;  %v5658_v39 = vld [vmem:[#allocation9_spill] sm:$0xff]  ;;  %v4225_v55 = vadd.f32 %v5664_v60, %v5663_v33 }
 0x19e   : > { %v5661_v14 = vld [vmem:[#allocation13_spill] sm:$0xff]  ;;  %v3123_v35 = vadd.f32 %v4191_v50, %v3058_v0  ;;  %v3066_v46 = vadd.f32 %v4157_v28, %v3001_v23 }
 0x19f   : > { %v4193_v11 = vpop.f32.mrf.mxu0  ;;  %v3112_v34 = vadd.f32 %v4182_v3, %v3047_v27 }
 0x1a0   : > { %v4194_v53 = vadd.f32 %v4193_v11, %v4192_v2  ;;  %v4222_v2 = vadd.f32 %v5659_v40, %v5658_v39  ;;  %v5660_v11 = vld [vmem:[#allocation11_spill] sm:$0xff] }
 0x1a1   : > { %v4195_v44 = vpop.f32.mrf.mxu0  ;;  %v4185_v29 = vadd.f32 %v5661_v14, %v5660_v11 }
 0x1a2   : > { %v3128_v12 = vadd.f32 %v4194_v53, %v3063_v41  ;;  %v5662_v45 = vld [vmem:[#allocation15_spill] sm:$0xff]  ;;  %v3177_v32 = vadd.f32 %v4222_v2, %v3112_v34 }
 0x1a3   : > { %v4196_v59 = vpop.f32.mrf.mxu0 }
 0x1a4   : > { %v4197_v36 = vadd.f32 %v4196_v59, %v4195_v44  ;;  %v4231_v44 = vadd.f32 %v5525_v5, %v5662_v45 }
 0x1a5   : > { %v4198_v49 = vpop.f32.mrf.mxu0 }
 0x1a6   : > { %v3131_v48 = vadd.f32 %v4197_v36, %v3066_v46  ;;  %v3188_v5 = vadd.f32 %v4231_v44, %v3123_v35 }
 0x1a7   : > { %v4199_v6 = vpop.f32.mrf.mxu0 }
 0x1a8   : > { %v4200_v57 = vadd.f32 %v4199_v6, %v4198_v49 }
 0x1a9   : > { %v4201_v20 = vpop.f32.mrf.mxu0 }
 0x1aa   : > { %v3136_v18 = vadd.f32 %v4200_v57, %v3071_v8 }
 0x1ab   : > { %v4202_v31 = vpop.f32.mrf.mxu0 }
 0x1ac   : > { %v4203_v15 = vadd.f32 %v4202_v31, %v4201_v20 }
 0x1ae   : > { %v3139_v37 = vadd.f32 %v4203_v15, %v3074_v19 }
 0x1b5   : > { %v4232_v25 = vpop.f32.mrf.mxu1 }
 0x1b7   : > { %v4233_v43 = vpop.f32.mrf.mxu1 }
 0x1b8   : > { %v4234_v42 = vadd.f32 %v4233_v43, %v4232_v25  ;;  %v3115_v43 = vadd.f32 %v4185_v29, %v3050_v51 }
 0x1b9   : > { %v5534_v30 = vpop.f32.mrf.mxu1 }
 0x1ba   : > { %v3193_v13 = vadd.f32 %v4234_v42, %v3128_v12  ;;  %v3180_v10 = vadd.f32 %v4225_v55, %v3115_v43 }
 0x1bb   : > { %v5539_v61 = vpop.f32.mrf.mxu1 }
 0x1bc   : > { %v4237_v0 = vadd.f32 %v5539_v61, %v5534_v30 }
 0x1be   : > { %v4238_v62 = vpop.f32.mrf.mxu1  ;;  %v3196_v61 = vadd.f32 %v4237_v0, %v3131_v48 }
 0x1c0   : > { %v4239_v1 = vpop.f32.mrf.mxu1 }
 0x1c1   : > { %v4240_v17 = vadd.f32 %v4239_v1, %v4238_v62 }
 0x1c2   : > { %v4241_v9 = vpop.f32.mrf.mxu1 }
 0x1c3   : > { %v3201_v47 = vadd.f32 %v4240_v17, %v3136_v18 }
 0x1c4   : > { %v4242_v4 = vpop.f32.mrf.mxu1 }
 0x1c5   : > { %v4243_v7 = vadd.f32 %v4242_v4, %v4241_v9  ;;  %v4274_v25 = vpop.f32.mrf.mxu0 }
 0x1c6   : > { %v5565_v59 = vadd.f32 %v4274_v25, %v3185_v54  ;;  %v4278_v27 = vpop.f32.mrf.mxu1 }
 0x1c7   : > { %v3266_v49 = vadd.f32 %v4278_v27, %v3201_v47  ;;  %v3241_v52 = vpop.f32.mrf.mxu0  ;;  %v3204_v21 = vadd.f32 %v4243_v7, %v3139_v37 }
 0x1c8   : > { %3274 = vst [vmem:[%s5561_s5 + $0x10] sm:$0xff] %v5565_v59  ;;  %v3242_v62 = vadd.f32 %v3241_v52, %v3177_v32  ;;  %v3257_v63 = vpop.f32.mrf.mxu1 }
 0x1c9   : > { %3278 = vst [vmem:[%s5561_s5 + $0x30] sm:$0xff] %v3266_v49  ;;  %v5574_v41 = vadd.f32 %v3257_v63, %v3193_v13  ;;  %v4275_v3 = vpop.f32.mrf.mxu0 }
 0x1ca   : > { %3272 = vst [vmem:[%s5561_s5] sm:$0xff] %v3242_v62  ;;  %v5577_v6 = vadd.f32 %v4275_v3, %v3188_v5  ;;  %v4279_v8 = vpop.f32.mrf.mxu1 }
 0x1cb   : > { %3276 = vst [vmem:[%s5561_s5 + $0x20] sm:$0xff] %v5574_v41  ;;  %v3269_v56 = vadd.f32 %v4279_v8, %v3204_v21  ;;  %v3244_v30 = vpop.f32.mrf.mxu0 }
 0x1cc   : > { %3275 = vst [vmem:[%s5561_s5 + $0x18] sm:$0xff] %v5577_v6  ;;  %v3245_v58 = vadd.f32 %v3244_v30, %v3180_v10  ;;  %v3260_v53 = vpop.f32.mrf.mxu1 }
 0x1cd   : > { %3279 = vst [vmem:[%s5561_s5 + $0x38] sm:$0xff] %v3269_v56  ;;  %v5584_v57 = vadd.f32 %v3260_v53, %v3196_v61 }
 0x1ce   : > { %3273 = vst [vmem:[%s5561_s5 + $0x8] sm:$0xff] %v3245_v58 }
 0x1cf   : > { %3277 = vst [vmem:[%s5561_s5 + $0x28] sm:$0xff] %v5584_v57 }
 0x1d0   : > { %v3347_v53 = vld [vmem:[%s5561_s5 + $0x30] sm:$0x7] }
 0x1d2   : > { %v3284_v1 = vld [vmem:[%s5561_s5 + $0x20] sm:$0x7] }
 0x1d3   : > { %v3289_v16 = vld [vmem:[%s5561_s5 + $0x21] sm:$0x7]  ;;  %v3287_v50 = vld [vmem:[%s5561_s5 + $0x11] sm:$0xff]  ;;  %v3288_v17 = vld [vmem:[%s5561_s5 + $0x19] sm:$0xff] }
 0x1d4   : > { %v3294_v38 = vmax.f32 %v3284_v1, %v3289_v16  ;;  %v3299_v20 = vld [vmem:[%s5561_s5 + $0x22] sm:$0x7]  ;;  %v3292_v22 = vmax.f32 %v5565_v59, %v3287_v50  ;;  %v3293_v23 = vmax.f32 %v5577_v6, %v3288_v17  ;;  %v3297_v26 = vld [vmem:[%s5561_s5 + $0x12] sm:$0xff]  ;;  %v3298_v28 = vld [vmem:[%s5561_s5 + $0x1a] sm:$0xff] }
 0x1d5   : > { %v3285_v19 = vld [vmem:[%s5561_s5 + $0x1] sm:$0xff]  ;;  %v3286_v34 = vld [vmem:[%s5561_s5 + $0x9] sm:$0xff]  ;;  %v3307_v40 = vld [vmem:[%s5561_s5 + $0x17] sm:$0xff] }
 0x1d6   : > { %v3304_v24 = vmax.f32 %v3294_v38, %v3299_v20  ;;  %v3302_v18 = vmax.f32 %v3292_v22, %v3297_v26  ;;  %v3303_v9 = vmax.f32 %v3293_v23, %v3298_v28  ;;  %v3290_v39 = vmax.f32 %v3242_v62, %v3285_v19  ;;  %v3308_v2 = vld [vmem:[%s5561_s5 + $0x1f] sm:$0xff]  ;;  %v3296_v31 = vld [vmem:[%s5561_s5 + $0xa] sm:$0xff]  ;;  %v3309_v36 = vld [vmem:[%s5561_s5 + $0x27] sm:$0x7] }
 0x1d7   : > { %v3291_v11 = vmax.f32 %v3245_v58, %v3286_v34  ;;  %v3295_v14 = vld [vmem:[%s5561_s5 + $0x2] sm:$0xff]  ;;  %v3306_v35 = vld [vmem:[%s5561_s5 + $0xf] sm:$0xff] }
 0x1d8   : > { %v3312_v29 = vmax.f32 %v3302_v18, %v3307_v40  ;;  %v3313_v42 = vmax.f32 %v3303_v9, %v3308_v2  ;;  %v3300_v12 = vmax.f32 %v3290_v39, %v3295_v14  ;;  %v3305_v4 = vld [vmem:[%s5561_s5 + $0x7] sm:$0xff]  ;;  %v3314_v47 = vmax.f32 %v3304_v24, %v3309_v36  ;;  %v3331_v48 = vld [vmem:[%s5561_s5 + $0x1e] sm:$0xff]  ;;  %v3330_v3 = vld [vmem:[%s5561_s5 + $0x16] sm:$0xff] }
 0x1d9   : > { %v3301_v15 = vmax.f32 %v3291_v11, %v3296_v31  ;;  %v3316_v46 = vld [vmem:[%s5561_s5 + $0x28] sm:$0x7]  ;;  %v3333_v60 = vld [vmem:[%s5561_s5 + $0x2e] sm:$0x7] }
 0x1da   : > { %v3319_v51 = vmax.f32 %v3312_v29, %v5577_v6  ;;  %v3310_v54 = vmax.f32 %v3300_v12, %v3305_v4  ;;  %v3320_v37 = vmax.f32 %v3313_v42, %v5574_v41  ;;  %v3321_v25 = vmax.f32 %v3314_v47, %v3316_v46  ;;  %v3322_v43 = vld [vmem:[%s5561_s5 + $0x21] sm:$0xff]  ;;  %v3323_v27 = vld [vmem:[%s5561_s5 + $0x29] sm:$0x7]  ;;  %v3329_v63 = vld [vmem:[%s5561_s5 + $0xe] sm:$0xff] }
 0x1db   : > { %v3311_v7 = vmax.f32 %v3301_v15, %v3306_v35  ;;  %v3332_v13 = vld [vmem:[%s5561_s5 + $0x26] sm:$0xff]  ;;  %v3340_v56 = vld [vmem:[%s5561_s5 + $0x2f] sm:$0x7] }
 0x1dc   : > { %v3326_v45 = vmax.f32 %v3319_v51, %v3288_v17  ;;  %v3317_v44 = vmax.f32 %v3310_v54, %v3245_v58  ;;  %v3327_v32 = vmax.f32 %v3320_v37, %v3322_v43  ;;  %v3328_v52 = vmax.f32 %v3321_v25, %v3323_v27  ;;  %v3339_v0 = vld [vmem:[%s5561_s5 + $0x27] sm:$0xff] }
 0x1dd   : > { %v3318_v49 = vmax.f32 %v3311_v7, %v5565_v59 }
 0x1de   : > { %v3336_v21 = vmax.f32 %v3326_v45, %v3331_v48  ;;  %v3324_v33 = vmax.f32 %v3317_v44, %v3286_v34  ;;  %v3337_v55 = vmax.f32 %v3327_v32, %v3332_v13  ;;  %v3338_v5 = vmax.f32 %v3328_v52, %v3333_v60 }
 0x1df   : > { %v3325_v62 = vmax.f32 %v3318_v49, %v3287_v50 }
 0x1e0   : > { %v3343_v8 = vmax.f32 %v3336_v21, %v3308_v2  ;;  %v3334_v10 = vmax.f32 %v3324_v33, %v3329_v63  ;;  %v3344_v30 = vmax.f32 %v3337_v55, %v3339_v0  ;;  %v3345_v58 = vmax.f32 %v3338_v5, %v3340_v56 }
 0x1e1   : > { %v3335_v61 = vmax.f32 %v3325_v62, %v3330_v3 }
 0x1e2   : > { %v3350_v1 = vmax.f32 %v3343_v8, %v5574_v41  ;;  %v3341_v16 = vmax.f32 %v3334_v10, %v3306_v35  ;;  %v3351_v38 = vmax.f32 %v3344_v30, %v5584_v57  ;;  %v3352_v20 = vmax.f32 %v3345_v58, %v3347_v53 }
 0x1e3   : > { %v3342_v17 = vmax.f32 %v3335_v61, %v3307_v40 }
 0x1e4   : > { %v3355_v50 = vmax.f32 %v3350_v1, 0.0  ;;  %v3348_v22 = vmax.f32 %v3341_v16, %v5565_v59  ;;  %v3356_v23 = vmax.f32 %v3351_v38, 0.0  ;;  %v3357_v26 = vmax.f32 %v3352_v20, 0.0 }
 0x1e5   : > { %v3349_v24 = vmax.f32 %v3342_v17, %v5577_v6 }
 0x1e6   : > { %3360 = vst [vmem:[%s210_s10 + $0x10] sm:$0xff] %v3355_v50  ;;  %v3353_v28 = vmax.f32 %v3348_v22, 0.0  ;;  %3361 = vst [vmem:[%s210_s10 + $0x18] sm:$0xff] %v3356_v23 }
 0x1e7   : > { %v3354_v41 = vmax.f32 %v3349_v24, 0.0  ;;  %3362 = vst [vmem:[%s210_s10 + $0x20] sm:$0x7] %v3357_v26 }
 0x1e8   : > { %3358 = vst [vmem:[%s210_s10] sm:$0xff] %v3353_v28 }
 0x1e9   : > { %3359 = vst [vmem:[%s210_s10 + $0x8] sm:$0xff] %v3354_v41 }
 0x1ea PF: > { %s15_s15 = sadd.s32 1, %s4660_s15  }
 0x1eb   : > { %p12_p4 = scmp.ge.s32.totalorder %s15_s15, 4  }
 0x1ed   :  { %14 = sbr.rel (!%p12_p4) target bundleno = 1 (0x1), region = 74 }

</bundles_post_ra>
